<compile_context>
chip_gen: v7x
topology: tpu7x:2x2x1
jax: 0.10.0
libtpu: 0.0.40
codegen_flags: <defaults>
</compile_context>

<pallas_src>
import functools
import math

import jax
import jax.numpy as jnp
from jax import lax
from jax.experimental import pallas as pl
from jax.experimental.pallas import tpu as pltpu

_EPS = 1e-5  # nn.LayerNorm default eps


# ----------------------------------------------------------------------------
# Plain-JAX fallback for tiny tensors (launch overhead would dominate Pallas).
# ----------------------------------------------------------------------------
def _jax_layer_norm(x, weight, bias, eps=_EPS):
    x32 = x.astype(jnp.float32)
    mean = jnp.mean(x32, axis=-1, keepdims=True)
    c = x32 - mean
    var = jnp.mean(c * c, axis=-1, keepdims=True)
    y = c * lax.rsqrt(var + eps)
    return (y * weight.astype(jnp.float32) + bias.astype(jnp.float32)).astype(x.dtype)


# ----------------------------------------------------------------------------
# Pallas kernel: LayerNorm over d-wide lane segments of lane-packed blocks.
# ----------------------------------------------------------------------------
def _layernorm_kernel(*refs, d, n, use_mxu):
    """refs = (params, [sdiag], x_0..x_{n-1}, o_0..o_{n-1}).

    params : (2, kd) f32   -- row 0 = weight tiled k times, row 1 = bias.
    sdiag  : (kd, kd) f32  -- block-diagonal ones (only when use_mxu).
    x_i    : (tile, kd)    -- k original rows packed side by side along lanes.
    """
    if use_mxu:
        params_ref, sdiag_ref = refs[0], refs[1]
        in_refs, out_refs = refs[2:2 + n], refs[2 + n:2 + 2 * n]
        s = sdiag_ref[...]                      # (kd, kd) f32
    else:
        params_ref = refs[0]
        in_refs, out_refs = refs[1:1 + n], refs[1 + n:1 + 2 * n]
        s = None

    w = params_ref[0:1, :]                      # (1, kd) f32
    b = params_ref[1:2, :]                      # (1, kd) f32
    inv_d = jnp.float32(1.0 / d)

    for x_ref, o_ref in zip(in_refs, out_refs):
        x = x_ref[...].astype(jnp.float32)      # (tile, kd)
        if use_mxu:
            # Segmented sums on the (otherwise idle) MXU: each lane ends up holding
            # its own segment's sum, so mean/rstd are already lane-broadcast and all
            # VPU math below is full-width — no narrow slices / concat on the XLU.
            mean = jnp.dot(x, s, precision=lax.Precision.HIGHEST,
                           preferred_element_type=jnp.float32) * inv_d
            c = x - mean
            var = jnp.dot(c * c, s, precision=lax.Precision.HIGHEST,
                          preferred_element_type=jnp.float32) * inv_d
        else:
            # Each packed row is exactly one original row: standard lane reduce.
            mean = jnp.mean(x, axis=-1, keepdims=True)
            c = x - mean
            var = jnp.mean(c * c, axis=-1, keepdims=True)
        y = c * lax.rsqrt(var + _EPS)
        o_ref[...] = (y * w + b).astype(o_ref.dtype)


# ----------------------------------------------------------------------------
# Generation-aware VMEM / pipelining budgets.
# ----------------------------------------------------------------------------
def _pipeline_budgets(n_streams):
    """Returns (per-block byte budget, vmem_limit_bytes, buffer depth)."""
    vmem_cap = None
    try:
        vmem_cap = int(pltpu.get_tpu_info().vmem_capacity_bytes)
    except Exception:  # pragma: no cover - hardware query not available
        vmem_cap = None

    if vmem_cap is not None and vmem_cap > 96 * 1024 * 1024:
        # v5e / v6e: 128 MiB physical VMEM -> larger blocks amortize step overhead.
        vmem_limit = 64 * 1024 * 1024
        pipeline_bytes = 48 * 1024 * 1024
        buffer_count = 2
    else:
        # v7x (64 MiB VMEM/TC, ~3.2 TB/s HBM) or unknown: conservative block size,
        # one extra buffer to hide per-step DMA issue latency behind the fast HBM.
        vmem_limit = 32 * 1024 * 1024
        pipeline_bytes = 24 * 1024 * 1024
        buffer_count = 3 if vmem_cap is not None else 2
    block_budget = max(64 * 1024, pipeline_bytes // (buffer_count * n_streams))
    return block_budget, vmem_limit, buffer_count


# ----------------------------------------------------------------------------
# Wrapper: LayerNorm over the last axis of one tensor or a list of tensors that
# share the same shape / feature dim / affine params (fused in ONE pallas_call).
# ----------------------------------------------------------------------------
def pallas_layer_norm(tensors, weight, bias, *, min_rows_for_pallas=64,
                      block_rows=None):
    single = not isinstance(tensors, (list, tuple))
    if single:
        tensors = [tensors]
    n = len(tensors)

    # Fuse only identically-shaped tensors; otherwise process separately.
    if len({(tuple(t.shape), jnp.dtype(t.dtype).name) for t in tensors}) > 1:
        outs = [pallas_layer_norm(t, weight, bias,
                                  min_rows_for_pallas=min_rows_for_pallas,
                                  block_rows=block_rows) for t in tensors]
        return outs[0] if single else outs

    shape = tensors[0].shape
    dtype = tensors[0].dtype
    d = int(shape[-1])
    rows = int(math.prod(shape[:-1])) if len(shape) > 1 else 1

    # Tiny tensors: a pallas_call's fixed launch / pipeline-prologue cost and extra
    # HBM round trip dominate -> plain JAX (XLA fuses it into surrounding ops).
    if rows < min_rows_for_pallas:
        outs = [_jax_layer_norm(t, weight, bias) for t in tensors]
        return outs[0] if single else outs

    itemsize = jnp.dtype(dtype).itemsize
    sublane = max(8, 32 // itemsize)          # 8 for f32, 16 for bf16, 32 for int8

    # Lane packing: place k original rows side by side so the kernel's last dim is
    # exactly 128 lanes (full-width unmasked vector loads/stores).  The reshape is a
    # row-major-contiguous bitcast, so no extra HBM traffic.
    if d < 128 and 128 % d == 0 and rows % (128 // d) == 0:
        k = 128 // d
    else:
        k = 1  # d already lane-dense, or awkward d: masked-store perf cliff (documented).
    kd = k * d
    packed_rows = rows // k
    use_mxu = (kd % 128 == 0) and (kd <= 512)

    block_budget, vmem_limit, buffer_count = _pipeline_budgets(2 * n)
    tile_cap = max(sublane, (block_budget // (kd * itemsize)) // sublane * sublane)
    if block_rows is not None:                # explicit override (testing / tuning)
        tile_cap = max(sublane, (block_rows // sublane) * sublane)
    if packed_rows <= tile_cap:
        row_tile = packed_rows                # single block == full array dim (allowed)
    else:
        row_tile = tile_cap                   # ragged tail handled by edge-block clipping
    grid = (pl.cdiv(packed_rows, row_tile),)

    packed = [t.reshape(packed_rows, kd) for t in tensors]

    # Affine params stay in f32 (matches PyTorch's f32 LayerNorm params), tiled k
    # times along lanes, folded into a single (2, kd) operand.
    params = jnp.stack([weight.astype(jnp.float32).reshape(d),
                        bias.astype(jnp.float32).reshape(d)], axis=0)
    if k > 1:
        params = jnp.tile(params, (1, k))

    def _row_spec():
        if buffer_count > 2:
            return pl.BlockSpec((row_tile, kd), lambda i: (i, 0),
                                pipeline_mode=pl.Buffered(buffer_count))
        return pl.BlockSpec((row_tile, kd), lambda i: (i, 0))

    in_specs = [pl.BlockSpec((2, kd), lambda i: (0, 0))]
    inputs = [params]
    if use_mxu:
        seg = jnp.arange(kd, dtype=jnp.int32) // d
        sdiag = (seg[:, None] == seg[None, :]).astype(jnp.float32)   # (kd, kd) block-diag ones
        in_specs.append(pl.BlockSpec((kd, kd), lambda i: (0, 0)))
        inputs.append(sdiag)
    in_specs += [_row_spec() for _ in range(n)]
    inputs += packed

    out_specs = tuple(pl.BlockSpec((row_tile, kd), lambda i: (i, 0)) for _ in range(n))
    out_shape = tuple(jax.ShapeDtypeStruct((packed_rows, kd), dtype) for _ in range(n))

    kernel = functools.partial(_layernorm_kernel, d=d, n=n, use_mxu=use_mxu)

    outs = pl.pallas_call(
        kernel,
        out_shape=out_shape,
        grid_spec=pltpu.PrefetchScalarGridSpec(
            num_scalar_prefetch=0,
            grid=grid,
            in_specs=in_specs,
            out_specs=out_specs,
        ),
        compiler_params=pltpu.CompilerParams(
            dimension_semantics=("parallel",),       # row axis shards across TCs (v7x)
            vmem_limit_bytes=vmem_limit,
        ),
    )(*inputs)

    if not isinstance(outs, (list, tuple)):
        outs = (outs,)
    results = [o.reshape(shape) for o in outs]
    return results[0] if single else results


# ----------------------------------------------------------------------------
# PreNorm module port.
# ----------------------------------------------------------------------------
class PreNormPallas:
    """JAX/Pallas port of PreNorm(dim, fn, context_dim=None)."""

    def __init__(self, dim, fn, context_dim=None):
        self.fn = fn
        # nn.LayerNorm default init: weight = ones, bias = zeros (kept in f32).
        self.norm_weight = jnp.ones((dim,), dtype=jnp.float32)
        self.norm_bias = jnp.zeros((dim,), dtype=jnp.float32)
        if context_dim is not None:
            self.ctx_weight = jnp.ones((context_dim,), dtype=jnp.float32)
            self.ctx_bias = jnp.zeros((context_dim,), dtype=jnp.float32)
        else:
            self.ctx_weight = None
            self.ctx_bias = None

    def __call__(self, x, **kwargs):
        # TODO(synk): `fn` is an arbitrary user module; the ideal structural fix is to
        # fuse these LayerNorms into fn's own Pallas kernel prologue (saves an extra
        # HBM round trip), which requires knowledge of fn's kernel.
        x = pallas_layer_norm(x, self.norm_weight, self.norm_bias)
        if self.ctx_weight is not None:
            # Both context norms share shape + params -> ONE fused pallas_call with two
            # in/out refs (no host-side concat / pad / slice).
            pub, priv = pallas_layer_norm(
                [kwargs["image_public"], kwargs["image_private"]],
                self.ctx_weight, self.ctx_bias,
            )
            kwargs.update(image_public=pub, image_private=priv)
        return self.fn(x, **kwargs)


def _passthrough_fn(x, **kwargs):
    # TODO(synk): `fn` is an arbitrary user-supplied module in the original code;
    # a deterministic passthrough stands in for it here.
    return x, kwargs["image_public"], kwargs["image_private"]


def _ref_layernorm(x, w, b, eps=_EPS):
    mean = jnp.mean(x, axis=-1, keepdims=True)
    var = jnp.mean((x - mean) ** 2, axis=-1, keepdims=True)
    return (x - mean) / jnp.sqrt(var + eps) * w + b


if __name__ == "__main__":
    key = jax.random.PRNGKey(0)
    k1, k2, k3, k4 = jax.random.split(key, 4)

    # Small shapes consistent with PreNorm(dim=32, fn, context_dim=64).
    B, N, DIM = 2, 8, 32           # x: tiny -> plain-JAX fast path (launch overhead)
    M, CTX_DIM = 128, 64           # context: lane-packed (k=2) fused Pallas path

    x = jax.random.normal(k1, (B, N, DIM), dtype=jnp.float32)
    image_public = jax.random.normal(k2, (B, M, CTX_DIM), dtype=jnp.float32)
    image_private = jax.random.normal(k3, (B, M, CTX_DIM), dtype=jnp.float32)

    module = PreNormPallas(DIM, _passthrough_fn, context_dim=CTX_DIM)

    fwd = jax.jit(
        lambda xx, pub, priv: module(xx, image_public=pub, image_private=priv)
    )
    out_x, out_pub, out_priv = fwd(x, image_public, image_private)
    jax.block_until_ready((out_x, out_pub, out_priv))

    # Correctness vs. a pure-JAX reference of the same semantics.
    ref_x = _ref_layernorm(x, module.norm_weight, module.norm_bias)
    ref_pub = _ref_layernorm(image_public, module.ctx_weight, module.ctx_bias)
    ref_priv = _ref_layernorm(image_private, module.ctx_weight, module.ctx_bias)
    assert out_x.shape == x.shape and out_pub.shape == image_public.shape
    assert jnp.allclose(out_x, ref_x, atol=1e-5, rtol=1e-5)
    assert jnp.allclose(out_pub, ref_pub, atol=1e-5, rtol=1e-5)
    assert jnp.allclose(out_priv, ref_priv, atol=1e-5, rtol=1e-5)

    # Extra check: multi-step grid with a ragged (edge-clipped) last block.
    big = jax.random.normal(k4, (2, 100, CTX_DIM), dtype=jnp.float32)  # 100 packed rows
    got = jax.jit(
        lambda t: pallas_layer_norm(t, module.ctx_weight, module.ctx_bias,
                                    block_rows=32)
    )(big)
    jax.block_until_ready(got)
    ref_big = _ref_layernorm(big, module.ctx_weight, module.ctx_bias)
    assert jnp.allclose(got, ref_big, atol=1e-5, rtol=1e-5)

    print("KERNEL_OK")
</pallas_src>

<mosaic_0001>
module attributes {stable_mosaic.version = 11 : i64} {
  func.func @_layernorm_kernel(%arg0: i32, %arg1: memref<2x128xf32, #tpu.memory_space<vmem>>, %arg2: memref<128x128xf32, #tpu.memory_space<vmem>>, %arg3: memref<128x128xf32, #tpu.memory_space<vmem>>, %arg4: memref<128x128xf32, #tpu.memory_space<vmem>>, %arg5: memref<128x128xf32, #tpu.memory_space<vmem>>, %arg6: memref<128x128xf32, #tpu.memory_space<vmem>>) attributes {dimension_semantics = [#tpu.dimension_semantics<parallel>], iteration_bounds = array<i64: 1>, scalar_prefetch = 0 : i64, scratch_operands = 0 : i64, tpu.core_type = #tpu.core_type<tc>, window_params = [{pipeline_mode = #tpu.pipeline_mode<synchronous>, transform_indices = @transform_0, window_bounds = array<i64: 2, 128>}, {pipeline_mode = #tpu.pipeline_mode<synchronous>, transform_indices = @transform_1, window_bounds = array<i64: 128, 128>}, {transform_indices = @transform_2, window_bounds = array<i64: 128, 128>}, {transform_indices = @transform_3, window_bounds = array<i64: 128, 128>}, {transform_indices = @transform_4, window_bounds = array<i64: 128, 128>}, {transform_indices = @transform_5, window_bounds = array<i64: 128, 128>}]} {
    %c0 = arith.constant 0 : index
    %c0_0 = arith.constant 0 : index
    %0 = vector.load %arg2[%c0, %c0_0] : memref<128x128xf32, #tpu.memory_space<vmem>>, vector<128x128xf32>
    %c0_1 = arith.constant 0 : index
    %c0_2 = arith.constant 0 : index
    %1 = vector.load %arg1[%c0_1, %c0_2] : memref<2x128xf32, #tpu.memory_space<vmem>>, vector<1x128xf32>
    %c1 = arith.constant 1 : index
    %c0_3 = arith.constant 0 : index
    %2 = vector.load %arg1[%c1, %c0_3] : memref<2x128xf32, #tpu.memory_space<vmem>>, vector<1x128xf32>
    %c0_4 = arith.constant 0 : index
    %c0_5 = arith.constant 0 : index
    %3 = vector.load %arg3[%c0_4, %c0_5] : memref<128x128xf32, #tpu.memory_space<vmem>>, vector<128x128xf32>
    %cst = arith.constant dense<0.000000e+00> : vector<128x128xf32>
    %4 = tpu.matmul %3, %0, %cst {dimension_numbers = #tpu.dot_dimension_numbers<[1], [0], [0], [1], [0, 0, 1, 1], [], []>, precision = #tpu.contract_precision<fp32>} : vector<128x128xf32>, vector<128x128xf32>, vector<128x128xf32> -> vector<128x128xf32>
    %cst_6 = arith.constant 1.562500e-02 : f32
    %5 = vector.broadcast %cst_6 : f32 to vector<128x128xf32>
    %6 = arith.mulf %4, %5 : vector<128x128xf32>
    %7 = arith.subf %3, %6 : vector<128x128xf32>
    %8 = arith.mulf %7, %7 : vector<128x128xf32>
    %cst_7 = arith.constant dense<0.000000e+00> : vector<128x128xf32>
    %9 = tpu.matmul %8, %0, %cst_7 {dimension_numbers = #tpu.dot_dimension_numbers<[1], [0], [0], [1], [0, 0, 1, 1], [], []>, precision = #tpu.contract_precision<fp32>} : vector<128x128xf32>, vector<128x128xf32>, vector<128x128xf32> -> vector<128x128xf32>
    %cst_8 = arith.constant 1.562500e-02 : f32
    %10 = vector.broadcast %cst_8 : f32 to vector<128x128xf32>
    %11 = arith.mulf %9, %10 : vector<128x128xf32>
    %cst_9 = arith.constant 9.99999974E-6 : f32
    %12 = vector.broadcast %cst_9 : f32 to vector<128x128xf32>
    %13 = arith.addf %11, %12 : vector<128x128xf32>
    %14 = math.rsqrt %13 : vector<128x128xf32>
    %15 = arith.mulf %7, %14 : vector<128x128xf32>
    %16 = vector.broadcast %1 : vector<1x128xf32> to vector<128x128xf32>
    %17 = arith.mulf %15, %16 : vector<128x128xf32>
    %18 = vector.broadcast %2 : vector<1x128xf32> to vector<128x128xf32>
    %19 = arith.addf %17, %18 : vector<128x128xf32>
    %c0_10 = arith.constant 0 : index
    %c0_11 = arith.constant 0 : index
    %20 = vector.load %arg5[%c0_10, %c0_11] : memref<128x128xf32, #tpu.memory_space<vmem>>, vector<128x128xf32>
    tpu.vector_store %arg5[%c0_10, %c0_11], %19 {strides = array<i32>} : memref<128x128xf32, #tpu.memory_space<vmem>>, vector<128x128xf32>,
    %c0_12 = arith.constant 0 : index
    %c0_13 = arith.constant 0 : index
    %21 = vector.load %arg4[%c0_12, %c0_13] : memref<128x128xf32, #tpu.memory_space<vmem>>, vector<128x128xf32>
    %cst_14 = arith.constant dense<0.000000e+00> : vector<128x128xf32>
    %22 = tpu.matmul %21, %0, %cst_14 {dimension_numbers = #tpu.dot_dimension_numbers<[1], [0], [0], [1], [0, 0, 1, 1], [], []>, precision = #tpu.contract_precision<fp32>} : vector<128x128xf32>, vector<128x128xf32>, vector<128x128xf32> -> vector<128x128xf32>
    %cst_15 = arith.constant 1.562500e-02 : f32
    %23 = vector.broadcast %cst_15 : f32 to vector<128x128xf32>
    %24 = arith.mulf %22, %23 : vector<128x128xf32>
    %25 = arith.subf %21, %24 : vector<128x128xf32>
    %26 = arith.mulf %25, %25 : vector<128x128xf32>
    %cst_16 = arith.constant dense<0.000000e+00> : vector<128x128xf32>
    %27 = tpu.matmul %26, %0, %cst_16 {dimension_numbers = #tpu.dot_dimension_numbers<[1], [0], [0], [1], [0, 0, 1, 1], [], []>, precision = #tpu.contract_precision<fp32>} : vector<128x128xf32>, vector<128x128xf32>, vector<128x128xf32> -> vector<128x128xf32>
    %cst_17 = arith.constant 1.562500e-02 : f32
    %28 = vector.broadcast %cst_17 : f32 to vector<128x128xf32>
    %29 = arith.mulf %27, %28 : vector<128x128xf32>
    %cst_18 = arith.constant 9.99999974E-6 : f32
    %30 = vector.broadcast %cst_18 : f32 to vector<128x128xf32>
    %31 = arith.addf %29, %30 : vector<128x128xf32>
    %32 = math.rsqrt %31 : vector<128x128xf32>
    %33 = arith.mulf %25, %32 : vector<128x128xf32>
    %34 = vector.broadcast %1 : vector<1x128xf32> to vector<128x128xf32>
    %35 = arith.mulf %33, %34 : vector<128x128xf32>
    %36 = vector.broadcast %2 : vector<1x128xf32> to vector<128x128xf32>
    %37 = arith.addf %35, %36 : vector<128x128xf32>
    %c0_19 = arith.constant 0 : index
    %c0_20 = arith.constant 0 : index
    %38 = vector.load %arg6[%c0_19, %c0_20] : memref<128x128xf32, #tpu.memory_space<vmem>>, vector<128x128xf32>
    tpu.vector_store %arg6[%c0_19, %c0_20], %37 {strides = array<i32>} : memref<128x128xf32, #tpu.memory_space<vmem>>, vector<128x128xf32>,
    return
  }
  func.func @transform_0(%arg0: i32) -> (i32, i32) {
    %c0_i32 = arith.constant 0 : i32
    %c0_i32_0 = arith.constant 0 : i32
    %c0_i32_1 = arith.constant 0 : i32
    return %c0_i32, %c0_i32_0 : i32, i32
  }
  func.func @transform_1(%arg0: i32) -> (i32, i32) {
    %c0_i32 = arith.constant 0 : i32
    %c0_i32_0 = arith.constant 0 : i32
    %c0_i32_1 = arith.constant 0 : i32
    return %c0_i32, %c0_i32_0 : i32, i32
  }
  func.func @transform_2(%arg0: i32) -> (i32, i32) {
    %c0_i32 = arith.constant 0 : i32
    %c0_i32_0 = arith.constant 0 : i32
    return %arg0, %c0_i32 : i32, i32
  }
  func.func @transform_3(%arg0: i32) -> (i32, i32) {
    %c0_i32 = arith.constant 0 : i32
    %c0_i32_0 = arith.constant 0 : i32
    return %arg0, %c0_i32 : i32, i32
  }
  func.func @transform_4(%arg0: i32) -> (i32, i32) {
    %c0_i32 = arith.constant 0 : i32
    %c0_i32_0 = arith.constant 0 : i32
    return %arg0, %c0_i32 : i32, i32
  }
  func.func @transform_5(%arg0: i32) -> (i32, i32) {
    %c0_i32 = arith.constant 0 : i32
    %c0_i32_0 = arith.constant 0 : i32
    return %arg0, %c0_i32 : i32, i32
  }
}

</mosaic_0001>

<bundles_post_ra>
// kernel: tile.7
= control target key start
LH: loop header
LB: loop body
LE: loop exit
PB: predicated region body
PF: predicated region fallthrough
CT: control target
= control target key end

     0   :  { %s10_s10 = smov 3  ;;  %vm12_vm0 = vcmask 523264   ;;  %s29_s11 = smov 64   ;;  %vm19_vm1 = vcmask 1048064   ;;  %s49_s0 = inlined_call_operand.vmem [shape: f32[2,2,64], index: 0, kind: input, shape index: {}]   ;;  %s50_s1 = inlined_call_operand.vmem [shape: f32[2,128], index: 1, kind: output, shape index: {}]  }
   0x1   :  { %v27_v0 = vld [vmem:[%s49_s0 + $0x2] sm:$0x3]  ;;  %v8_v1 = vld [vmem:[%s49_s0] sm:$0x3]  ;;  %s15_s0 = smov 3 }
   0x2   :  { %7 = vst [vmem:[#allocation1 + $0x8] sm:$0x3] %v27_v0  ;;  %9 = vst [vmem:[#allocation1] sm:$0x3] %v8_v1 }
   0x9   :  { %v16_v2 = vld [vmem:[#allocation1 + $0x1] ss:$8 sm:%s15_s0]   ;;  %v11_v3 = vld [vmem:[#allocation1] ss:$8 sm:%s10_s10]  }
   0xa   :  { %17 = vrot.lane.b32.xlu0 %v16_v2, %s29_s11  ;;  %13 = vst.msk [vmem:[#allocation0] sm:$0x3] %vm12_vm0, %v11_v3  }
  0x7c   :  { %v18_v4 = vpop.permute.xlu0 %17  }
  0x7d   :  { %20 = vst.msk [vmem:[#allocation0] sm:$0x3] %vm19_vm1, %v18_v4  }
  0x84   :  { %v24_v5 = vld [vmem:[#allocation0] sm:$0x3] }
  0x85   :  { %26 = vst [vmem:[%s50_s1] sm:$0x3] %v24_v5 }

// kernel: _lambda_.1
= control target key start
LH: loop header
LB: loop body
LE: loop exit
PB: predicated region body
PF: predicated region fallthrough
CT: control target
= control target key end

     0   :  { %s11100_s1 = inlined_call_operand.vmem [shape: f32[128,128], index: 1, kind: input, shape index: {}]   ;;  %s11101_s2 = inlined_call_operand.vmem [shape: f32[128,128], index: 2, kind: input, shape index: {}]   ;;  %s11102_s3 = inlined_call_operand.vmem [shape: f32[128,128], index: 3, kind: input, shape index: {}]   ;;  %s11103_s0 = inlined_call_operand.vmem [shape: f32[2,128], index: 0, kind: input, shape index: {}]   ;;  %s11104_s4 = inlined_call_operand.vmem [shape: f32[128,128], index: 4, kind: output, shape index: {0}]   ;;  %s11105_s5 = inlined_call_operand.vmem [shape: f32[128,128], index: 5, kind: output, shape index: {1}]  }
   0x1   :  { %v19_v0 = vld [vmem:[%s11100_s1] sm:$0xff]  ;;  %v20_v1 = vld [vmem:[%s11100_s1 + $0x8] sm:$0xff]  ;;  %v21_v2 = vld [vmem:[%s11100_s1 + $0x10] sm:$0xff] }
   0x2   :  { %v54_v3 = vand.u32 4294901760, %v19_v0  ;;  %v57_v4 = vand.u32 4294901760, %v20_v1  ;;  %v22_v5 = vld [vmem:[%s11100_s1 + $0x18] sm:$0xff]  ;;  %v60_v6 = vand.u32 4294901760, %v21_v2  ;;  %v8892_v7 = vld [vmem:[%s11100_s1 + $0x20] sm:$0xff]  ;;  %v8897_v8 = vld [vmem:[%s11100_s1 + $0x28] sm:$0xff] }
   0x3   :  { %v63_v9 = vand.u32 4294901760, %v22_v5  ;;  %v66_v11 = vand.u32 4294901760, %v8892_v7  ;;  %v69_v12 = vand.u32 4294901760, %v8897_v8  ;;  %v8908_v14 = vld [vmem:[%s11100_s1 + $0x30] sm:$0xff]  ;;  %v8913_v15 = vld [vmem:[%s11100_s1 + $0x38] sm:$0xff]  ;;  %v37_v16 = vld [vmem:[%s11101_s2] sm:$0xff] }
   0x4   :  { %v8899_v10 = vpack.c.bf16 %v57_v4, %v54_v3  ;;  %v38_v17 = vld [vmem:[%s11101_s2 + $0x8] sm:$0xff]  ;;  %v8924_v18 = vand.u32 4294901760, %v37_v16  ;;  %v72_v20 = vand.u32 4294901760, %v8908_v14  ;;  %v75_v21 = vand.u32 4294901760, %v8913_v15  ;;  %v8939_v22 = vld [vmem:[%s11100_s1 + $0x40] sm:$0xff]  ;;  %v39_v26 = vld [vmem:[%s11101_s2 + $0x10] sm:$0xff] }
   0x5   :  { %v8903_v13 = vpack.c.bf16 %v63_v9, %v60_v6  ;;  %v8932_v19 = vpack.c.bf16 %v69_v12, %v66_v11  ;;  %v8945_v23 = vld [vmem:[%s11100_s1 + $0x48] sm:$0xff]  ;;  %v8950_v25 = vand.u32 4294901760, %v38_v17  ;;  %v40_v27 = vld [vmem:[%s11101_s2 + $0x18] sm:$0xff]  ;;  %v78_v28 = vand.u32 4294901760, %v8939_v22  ;;  %v8973_v32 = vld [vmem:[%s11100_s1 + $0x50] sm:$0xff] }
   0x6   :  { %11266 = vst [vmem:[#allocation2_spill] sm:$0xff] %v8899_v10  ;;  %7664 = vmatprep.subr.bf16.mxu0 %v8899_v10  ;;  %7856 = vmatprep.subr.bf16.mxu1 %v8899_v10  ;;  %v8948_v24 = vsub.f32 %v37_v16, %v8924_v18  ;;  %v8967_v30 = vpack.c.bf16 %v75_v21, %v72_v20  ;;  %v81_v31 = vand.u32 4294901760, %v8945_v23  ;;  %v8983_v35 = vld [vmem:[%s11100_s1 + $0x58] sm:$0xff]  ;;  %v8991_v38 = vand.u32 4294901760, %v39_v26  ;;  %v9002_v42 = vld [vmem:[%s11100_s1 + $0x60] sm:$0xff]  ;;  %v9007_v43 = vld [vmem:[%s11100_s1 + $0x68] sm:$0xff] }
   0x7   :  { %11267 = vst [vmem:[#allocation3_spill] sm:$0xff] %v8903_v13  ;;  %7666 = vmatpush3.bf16.msra.mxu0 %v8899_v10  ;;  %7858 = vmatpush3.bf16.msra.mxu1 %v8899_v10  ;;  %11268 = vst [vmem:[#allocation4_spill] sm:$0xff] %v8932_v19  ;;  %v8975_v33 = vsub.f32 %v19_v0, %v54_v3  ;;  %v8977_v34 = vsub.f32 %v20_v1, %v57_v4  ;;  %v8993_v39 = vand.u32 4294901760, %v40_v27  ;;  %v9021_v47 = vld [vmem:[%s11100_s1 + $0x70] sm:$0xff]  ;;  %v41_v50 = vld [vmem:[%s11101_s2 + $0x20] sm:$0xff] }
   0x8   :  { %7668 = vmatprep.subr.bf16.mxu0 %v8903_v13  ;;  %7860 = vmatprep.subr.bf16.mxu1 %v8903_v13  ;;  %11269 = vst [vmem:[#allocation5_spill] sm:$0xff] %v8948_v24  ;;  %v11107_v29 = vand.u32 4294901760, %v8948_v24  ;;  %11270 = vst [vmem:[#allocation6_spill] sm:$0xff] %v8967_v30  ;;  %v8989_v37 = vsub.f32 %v38_v17, %v8950_v25  ;;  %v8995_v40 = vsub.f32 %v21_v2, %v60_v6  ;;  %v42_v51 = vld [vmem:[%s11101_s2 + $0x28] sm:$0xff]  ;;  %v9036_v52 = vld [vmem:[%s11100_s1 + $0x78] sm:$0xff] }
   0x9   :  { %v84_v41 = vand.u32 4294901760, %v8973_v32  ;;  %v9015_v45 = vpack.c.bf16 %v81_v31, %v78_v28  ;;  %v11118_v46 = vand.u32 4294901760, %v8983_v35  ;;  %v11111_v48 = vand.u32 4294901760, %v8975_v33  ;;  %v43_v3 = vld [vmem:[%s11101_s2 + $0x30] sm:$0xff] }
   0xa   :  { %v137_v36 = vsub.f32 %v8948_v24, %v11107_v29  ;;  %11271 = vst [vmem:[#allocation7_spill] sm:$0xff] %v8989_v37  ;;  %v9024_v49 = vsub.f32 %v22_v5, %v63_v9  ;;  %v11106_v53 = vand.u32 4294901760, %v8989_v37  ;;  %v11110_v54 = vand.u32 4294901760, %v8977_v34 }
   0xb   :  { %7670 = vmatpush3.bf16.msra.mxu0 %v8903_v13  ;;  %7862 = vmatpush3.bf16.msra.mxu1 %v8903_v13  ;;  %11272 = vst [vmem:[#allocation8_spill] sm:$0xff] %v9015_v45  ;;  %v9041_v55 = vsub.f32 %v39_v26, %v8991_v38  ;;  %v9044_v56 = vsub.f32 %v40_v27, %v8993_v39  ;;  %v11117_v57 = vand.u32 4294901760, %v9002_v42  ;;  %v11108_v58 = vand.u32 4294901760, %v8995_v40 }
   0xc   :  { %7672 = vmatprep.subr.bf16.mxu0 %v8932_v19  ;;  %7864 = vmatprep.subr.bf16.mxu1 %v8932_v19  ;;  %v138_v44 = vand.u32 4294901760, %v137_v36  ;;  %v11116_v59 = vand.u32 4294901760, %v9007_v43  ;;  %v11115_v60 = vand.u32 4294901760, %v9021_v47  ;;  %v9051_v61 = vand.u32 4294901760, %v41_v50 }
   0xd   :  { %11273 = vst [vmem:[#allocation9_spill] sm:$0xff] %v9041_v55  ;;  %11274 = vst [vmem:[#allocation10_spill] sm:$0xff] %v9044_v56  ;;  %v9053_v62 = vand.u32 4294901760, %v42_v51  ;;  %v9061_v63 = vpack.c.bf16 %v11118_v46, %v84_v41  ;;  %v11114_v0 = vand.u32 4294901760, %v9036_v52  ;;  %v298_v1 = vsub.f32 %v8975_v33, %v11111_v48 }
   0xe   :  { %6351 = vmatprep.mubr.f32.mxu0 %v138_v44  ;;  %v11109_v2 = vand.u32 4294901760, %v9024_v49  ;;  %v9075_v4 = vsub.f32 %v8989_v37, %v11106_v53  ;;  %v305_v5 = vsub.f32 %v8977_v34, %v11110_v54  ;;  %v11112_v6 = vand.u32 4294901760, %v9041_v55 }
   0xf   :  { %7674 = vmatpush3.bf16.msra.mxu0 %v8932_v19  ;;  %7866 = vmatpush3.bf16.msra.mxu1 %v8932_v19  ;;  %11275 = vst [vmem:[#allocation11_spill] sm:$0xff] %v9061_v63  ;;  %v11113_v9 = vand.u32 4294901760, %v9044_v56  ;;  %v312_v16 = vsub.f32 %v8995_v40, %v11108_v58  ;;  %v9088_v17 = vsub.f32 %v8892_v7, %v66_v11  ;;  %v9102_v44 = vand.u32 4294901760, %v43_v3  ;;  %v44_v7 = vld [vmem:[%s11101_s2 + $0x38] sm:$0xff] }
  0x10   :  { %7676 = vmatprep.subr.bf16.mxu0 %v8967_v30  ;;  %7868 = vmatprep.subr.bf16.mxu1 %v8967_v30  ;;  %v9093_v26 = vsub.f32 %v8897_v8, %v69_v12  ;;  %v9097_v27 = vsub.f32 %v41_v50, %v9051_v61  ;;  %v9100_v36 = vsub.f32 %v42_v51, %v9053_v62  ;;  %v299_v12 = vand.u32 4294901760, %v298_v1  ;;  %v45_v1 = vld [vmem:[%s11101_s2 + $0x40] sm:$0xff] }
  0x11   :  { %v9113_v8 = vpack.c.bf16 %v11116_v59, %v11117_v57  ;;  %v9119_v11 = vpack.c.bf16 %v11114_v0, %v11115_v60  ;;  %v319_v50 = vsub.f32 %v9024_v49, %v11109_v2  ;;  %v306_v53 = vand.u32 4294901760, %v305_v5  ;;  %v46_v2 = vld [vmem:[%s11101_s2 + $0x48] sm:$0xff] }
  0x12   :  { %11276 = vst [vmem:[#allocation12_spill] sm:$0xff] %v9097_v27  ;;  %11277 = vst [vmem:[#allocation13_spill] sm:$0xff] %v9100_v36  ;;  %v9129_v29 = vsub.f32 %v9041_v55, %v11112_v6  ;;  %v9134_v58 = vsub.f32 %v9044_v56, %v11113_v9  ;;  %v313_v54 = vand.u32 4294901760, %v312_v16  ;;  %v11121_v5 = vand.u32 4294901760, %v9088_v17 }
  0x13   :  { %7678 = vmatpush3.bf16.msra.mxu0 %v8967_v30  ;;  %7870 = vmatpush3.bf16.msra.mxu1 %v8967_v30  ;;  %11278 = vst [vmem:[#allocation14_spill] sm:$0xff] %v9113_v8  ;;  %11279 = vst [vmem:[#allocation15_spill] sm:$0xff] %v9119_v11  ;;  %v11119_v48 = vand.u32 4294901760, %v9093_v26  ;;  %v9144_v6 = vand.u32 4294901760, %v44_v7  ;;  %v11120_v9 = vand.u32 4294901760, %v9097_v27  ;;  %v11122_v0 = vand.u32 4294901760, %v9100_v36 }
  0x14   :  { %7680 = vmatprep.subr.bf16.mxu0 %v9015_v45  ;;  %7872 = vmatprep.subr.bf16.mxu1 %v9015_v45  ;;  %v9150_v60 = vsub.f32 %v43_v3, %v9102_v44  ;;  %v9155_v59 = vsub.f32 %v8908_v14, %v72_v20  ;;  %v320_v16 = vand.u32 4294901760, %v319_v50  ;;  %v9162_v57 = vsub.f32 %v8913_v15, %v75_v21 }
  0x15   :  { %v9164_v51 = vand.u32 4294901760, %v45_v1  ;;  %v9166_v46 = vand.u32 4294901760, %v46_v2  ;;  %v9169_v3 = vpack.c.bf16 %v306_v53, %v299_v12  ;;  %v158_v14 = vand.u32 4294901760, %v9129_v29 }
  0x16   :  { %11280 = vst [vmem:[#allocation16_spill] sm:$0xff] %v9150_v60  ;;  %v9175_v20 = vsub.f32 %v8939_v22, %v78_v28  ;;  %v9180_v15 = vsub.f32 %v8945_v23, %v81_v31  ;;  %v326_v50 = vsub.f32 %v9088_v17, %v11121_v5  ;;  %v333_v29 = vsub.f32 %v9093_v26, %v11119_v48  ;;  %v47_v22 = vld [vmem:[%s11101_s2 + $0x50] sm:$0xff] }
  0x17   :  { %7682 = vmatpush3.bf16.msra.mxu0 %v9015_v45  ;;  %7874 = vmatpush3.bf16.msra.mxu1 %v9015_v45  ;;  %11281 = vst [vmem:[#allocation17_spill] sm:$0xff] %v9169_v3  ;;  %v9190_v53 = vsub.f32 %v44_v7, %v9144_v6  ;;  %v9199_v23 = vsub.f32 %v9097_v27, %v11120_v9  ;;  %v9222_v7 = vand.u32 4294901760, %v47_v22  ;;  %v11286_v31 = vand.u32 4294901760, %v8983_v35 }
  0x18   :  { %7684 = vmatprep.subr.bf16.mxu0 %v9061_v63  ;;  %7876 = vmatprep.subr.bf16.mxu1 %v9061_v63  ;;  %v9204_v28 = vsub.f32 %v9100_v36, %v11122_v0  ;;  %v9210_v12 = vpack.c.bf16 %v320_v16, %v313_v54  ;;  %v9214_v9 = vsub.f32 %v45_v1, %v9164_v51  ;;  %v48_v54 = vld [vmem:[%s11101_s2 + $0x58] sm:$0xff]  ;;  %v327_v16 = vand.u32 4294901760, %v326_v50 }
  0x19   :  { %11282 = vst [vmem:[#allocation18_spill] sm:$0xff] %v9190_v53  ;;  %v9217_v5 = vsub.f32 %v46_v2, %v9166_v46  ;;  %v9230_v1 = vsub.f32 %v8973_v32, %v84_v41  ;;  %v334_v2 = vand.u32 4294901760, %v333_v29  ;;  %v9236_v0 = vsub.f32 %v8983_v35, %v11286_v31  ;;  %v49_v35 = vld [vmem:[%s11101_s2 + $0x60] sm:$0xff] }
  0x1a   :  { %11283 = vst [vmem:[#allocation19_spill] sm:$0xff] %v9210_v12  ;;  %11284 = vst [vmem:[#allocation20_spill] sm:$0xff] %v9214_v9  ;;  %v178_v21 = vand.u32 4294901760, %v9199_v23  ;;  %v11288_v41 = vand.u32 4294901760, %v9155_v59  ;;  %v11289_v29 = vand.u32 4294901760, %v9162_v57  ;;  %v9259_v31 = vand.u32 4294901760, %v48_v54 }
  0x1b   :  { %7686 = vmatpush3.bf16.msra.mxu0 %v9061_v63  ;;  %7878 = vmatpush3.bf16.msra.mxu1 %v9061_v63  ;;  %11285 = vst [vmem:[#allocation21_spill] sm:$0xff] %v9217_v5  ;;  %v11287_v63 = vand.u32 4294901760, %v9150_v60  ;;  %v9269_v30 = vsub.f32 %v47_v22, %v9222_v7  ;;  %v9280_v19 = vand.u32 4294901760, %v49_v35  ;;  %v11317_v24 = vand.u32 4294901760, %v9155_v59 }
  0x1c   :  { %7688 = vmatprep.subr.bf16.mxu0 %v9113_v8  ;;  %7880 = vmatprep.subr.bf16.mxu1 %v9113_v8  ;;  %v340_v50 = vsub.f32 %v9155_v59, %v11288_v41  ;;  %v347_v23 = vsub.f32 %v9162_v57, %v11289_v29  ;;  %v11290_v41 = vand.u32 4294901760, %v9175_v20  ;;  %v11299_v29 = vand.u32 4294901760, %v9217_v5 }
  0x1d   :  { %v9244_v32 = vsub.f32 %v9150_v60, %v11287_v63  ;;  %11292 = vst [vmem:[#allocation22_spill] sm:$0xff] %v9269_v30  ;;  %v9274_v63 = vpack.c.bf16 %v334_v2, %v327_v16  ;;  %v11295_v60 = vand.u32 4294901760, %v9190_v53  ;;  %v11296_v16 = vand.u32 4294901760, %v9002_v42 }
  0x1e   :  { %v354_v48 = vsub.f32 %v9175_v20, %v11290_v41  ;;  %v374_v41 = vand.u32 4294901760, %v9236_v0  ;;  %v341_v22 = vand.u32 4294901760, %v340_v50  ;;  %v11306_v37 = vand.u32 4294901760, %v9269_v30 }
  0x1f   :  { %7690 = vmatpush3.bf16.msra.mxu0 %v9113_v8  ;;  %7882 = vmatpush3.bf16.msra.mxu1 %v9113_v8  ;;  %v188_v8 = vand.u32 4294901760, %v9204_v28  ;;  %v11293_v28 = vand.u32 4294901760, %v9075_v4  ;;  %11294 = vst [vmem:[#allocation23_spill] sm:$0xff] %v9274_v63  ;;  %v207_v36 = vsub.f32 %v9190_v53, %v11295_v60  ;;  %v50_v4 = vld [vmem:[%s11101_s2 + $0x68] sm:$0xff]  ;;  %v9290_v2 = vsub.f32 %v9002_v42, %v11296_v16 }
  0x20   :  { %7692 = vmatprep.subr.bf16.mxu0 %v9119_v11  ;;  %7884 = vmatprep.subr.bf16.mxu1 %v9119_v11  ;;  %v11297_v60 = vand.u32 4294901760, %v9007_v43  ;;  %v9307_v42 = vsub.f32 %v48_v54, %v9259_v31  ;;  %v355_v16 = vand.u32 4294901760, %v354_v48  ;;  %v11300_v53 = vand.u32 4294901760, %v9230_v1 }
  0x21   :  { %v9320_v54 = vsub.f32 %v49_v35, %v9280_v19  ;;  %v9322_v27 = vand.u32 4294901760, %v50_v4 }
  0x23   :  { %7694 = vmatpush3.bf16.msra.mxu0 %v9119_v11  ;;  %7886 = vmatpush3.bf16.msra.mxu1 %v9119_v11  ;;  %v11291_v11 = vand.u32 4294901760, %v9180_v15 }
  0x24   :  { %7696 = vmatprep.subr.bf16.mxu0 %v9169_v3  ;;  %7888 = vmatprep.subr.bf16.mxu1 %v9169_v3 }
  0x25   :  { %v361_v45 = vsub.f32 %v9180_v15, %v11291_v11  ;;  %v198_v11 = vand.u32 4294901760, %v9244_v32  ;;  %v11298_v32 = vand.u32 4294901760, %v9214_v9 }
  0x26   :  { %6352 = vmatmul.mubr.f32.vlgmr.msra.gmra.mrb[0].mxu0 %v11293_v28  ;;  %v9295_v28 = vsub.f32 %v9007_v43, %v11297_v60  ;;  %v51_v43 = vld [vmem:[%s11101_s2 + $0x70] sm:$0xff] }
  0x27   :  { %7698 = vmatpush3.bf16.msra.mxu0 %v9169_v3  ;;  %6354 = vmatprep.mubr.f32.mxu0 %v158_v14  ;;  %v348_v14 = vand.u32 4294901760, %v347_v23  ;;  %v217_v50 = vsub.f32 %v9214_v9, %v11298_v32  ;;  %v9304_v3 = vsub.f32 %v9217_v5, %v11299_v29  ;;  %v362_v60 = vand.u32 4294901760, %v361_v45 }
  0x28   :  { %7700 = vmatprep.subr.bf16.mxu0 %v9210_v12  ;;  %v368_v32 = vsub.f32 %v9230_v1, %v11300_v53  ;;  %v11301_v9 = vand.u32 4294901760, %v9134_v58  ;;  %v208_v29 = vand.u32 4294901760, %v207_v36  ;;  %v375_v5 = vsub.f32 %v9236_v0, %v374_v41  ;;  %v52_v58 = vld [vmem:[%s11101_s2 + $0x78] sm:$0xff] }
  0x29   :  { %v381_v45 = vand.u32 4294901760, %v9290_v2  ;;  %v388_v48 = vand.u32 4294901760, %v9295_v28  ;;  %v9327_v23 = vand.u32 4294901760, %v51_v43  ;;  %v9338_v53 = vpack.c.bf16 %v348_v14, %v341_v22 }
  0x2a   :  { %6355 = vmatmul.mubr.f32.gmra.mrb[2].mxu0 %v11301_v9  ;;  %v11302_v9 = vand.u32 4294901760, %v9021_v47  ;;  %v228_v13 = vand.u32 4294901760, %v9304_v3  ;;  %v9347_v55 = vpack.c.bf16 %v362_v60, %v355_v16  ;;  %v376_v22 = vand.u32 4294901760, %v375_v5 }
  0x2b   :  { %7702 = vmatpush3.bf16.msra.mxu0 %v9210_v12  ;;  %6357 = vmatprep.mubr.f32.mxu0 %v178_v21  ;;  %11303 = vst [vmem:[#allocation24_spill] sm:$0xff] %v9338_v53  ;;  %v218_v21 = vand.u32 4294901760, %v217_v50  ;;  %v11304_v12 = vand.u32 4294901760, %v9036_v52  ;;  %v9354_v50 = vsub.f32 %v50_v4, %v9322_v27  ;;  %v9356_v35 = vand.u32 4294901760, %v52_v58 }
  0x2c   :  { %v9335_v36 = vsub.f32 %v9021_v47, %v11302_v9  ;;  %7704 = vmatprep.subr.bf16.mxu0 %v9274_v63  ;;  %11305 = vst [vmem:[#allocation25_spill] sm:$0xff] %v9347_v55  ;;  %v237_v47 = vsub.f32 %v9269_v30, %v11306_v37  ;;  %v369_v9 = vand.u32 4294901760, %v368_v32  ;;  %v389_v3 = vsub.f32 %v9295_v28, %v388_v48 }
  0x2d   :  { %v9344_v56 = vsub.f32 %v9036_v52, %v11304_v12  ;;  %v382_v52 = vsub.f32 %v9290_v2, %v381_v45  ;;  %v9362_v12 = vsub.f32 %v51_v43, %v9327_v23  ;;  %v11307_v5 = vand.u32 4294901760, %v8975_v33 }
  0x2e   :  { %6358 = vmatmul.mubr.f32.gmra.mrb[4].mxu0 %v188_v8  ;;  %v395_v37 = vand.u32 4294901760, %v9335_v36  ;;  %v11308_v4 = vand.u32 4294901760, %v8977_v34  ;;  %v11311_v60 = vand.u32 4294901760, %v9024_v49  ;;  %v11313_v43 = vand.u32 4294901760, %v9088_v17 }
  0x2f   :  { %7706 = vmatpush3.bf16.msra.mxu0 %v9274_v63  ;;  %6360 = vmatprep.mubr.f32.mxu0 %v198_v11  ;;  %v402_v8 = vand.u32 4294901760, %v9344_v56  ;;  %v11310_v11 = vand.u32 4294901760, %v8995_v40  ;;  %v11314_v14 = vand.u32 4294901760, %v9093_v26  ;;  %v11316_v30 = vand.u32 4294901760, %v9307_v42 }
  0x30   :  { %7708 = vmatprep.subr.bf16.mxu0 %v9338_v53  ;;  %v9371_v16 = vpack.c.bf16 %v11308_v4, %v11307_v5  ;;  %v11318_v5 = vand.u32 4294901760, %v9162_v57 }
  0x31   :  { %v9377_v32 = vpack.c.bf16 %v11311_v60, %v11310_v11  ;;  %v9383_v63 = vpack.c.bf16 %v11314_v14, %v11313_v43  ;;  %v247_v10 = vsub.f32 %v9307_v42, %v11316_v30  ;;  %v11321_v11 = vand.u32 4294901760, %v9180_v15 }
  0x32   :  { %11309 = vst [vmem:[#allocation26_spill] sm:$0xff] %v9371_v16  ;;  %v9392_v4 = vpack.c.bf16 %v11318_v5, %v11317_v24  ;;  %v11320_v16 = vand.u32 4294901760, %v9175_v20  ;;  %6361 = vmatmul.mubr.f32.gmra.mrb[6].mxu0 %v208_v29  ;;  %v9406_v30 = vsub.f32 %v52_v58, %v9356_v35  ;;  %v9410_v24 = vpack.c.bf16 %v402_v8, %v395_v37 }
  0x33   :  { %11312 = vst [vmem:[#allocation27_spill] sm:$0xff] %v9377_v32  ;;  %11315 = vst [vmem:[#allocation28_spill] sm:$0xff] %v9383_v63  ;;  %v11323_v32 = vand.u32 4294901760, %v9230_v1  ;;  %v9408_v63 = vpack.c.bf16 %v388_v48, %v381_v45  ;;  %7710 = vmatpush3.bf16.msra.mxu0 %v9338_v53  ;;  %6363 = vmatprep.mubr.f32.mxu0 %v218_v21  ;;  %v238_v5 = vand.u32 4294901760, %v237_v47  ;;  %v11171_v29 = vand.u32 4294901760, %v9362_v12 }
  0x34   :  { %11319 = vst [vmem:[#allocation29_spill] sm:$0xff] %v9392_v4  ;;  %v9398_v60 = vpack.c.bf16 %v11321_v11, %v11320_v16  ;;  %11326 = vst [vmem:[#allocation33_spill] sm:$0xff] %v9410_v24  ;;  %v9413_v16 = vpack.c.bf16 %v376_v22, %v369_v9  ;;  %v11327_v11 = vand.u32 4294901760, %v9320_v54  ;;  %7712 = vmatprep.subr.bf16.mxu0 %v9347_v55  ;;  %v383_v58 = vand.u32 4294901760, %v382_v52 }
  0x35   :  { %v9402_v14 = vpack.c.bf16 %v374_v41, %v11323_v32  ;;  %11325 = vst [vmem:[#allocation32_spill] sm:$0xff] %v9408_v63  ;;  %v390_v32 = vand.u32 4294901760, %v389_v3  ;;  %v396_v45 = vsub.f32 %v9335_v36, %v395_v37  ;;  %v403_v48 = vsub.f32 %v9344_v56, %v402_v8 }
  0x36   :  { %11322 = vst [vmem:[#allocation30_spill] sm:$0xff] %v9398_v60  ;;  %v257_v41 = vsub.f32 %v9320_v54, %v11327_v11  ;;  %6364 = vmatmul.mubr.f32.gmra.mrb[8].mxu0 %v228_v13  ;;  %v248_v43 = vand.u32 4294901760, %v247_v10  ;;  %v11328_v21 = vand.u32 4294901760, %v9354_v50  ;;  %v11170_v9 = vand.u32 4294901760, %v9406_v30 }
  0x37   :  { %11324 = vst [vmem:[#allocation31_spill] sm:$0xff] %v9402_v14  ;;  %7714 = vmatpush3.bf16.msra.mxu0 %v9347_v55  ;;  %6366 = vmatprep.mubr.f32.mxu0 %v238_v5  ;;  %v277_v52 = vsub.f32 %v9362_v12, %v11171_v29  ;;  %v9431_v3 = vpack.c.bf16 %v390_v32, %v383_v58  ;;  %v397_v13 = vand.u32 4294901760, %v396_v45  ;;  %v404_v10 = vand.u32 4294901760, %v403_v48  ;;  %v11339_v32 = vld [vmem:[#allocation6_spill] sm:$0xff]  ;;  %v11341_v48 = vld [vmem:[#allocation20_spill] sm:$0xff] }
  0x38   :  { %v267_v47 = vsub.f32 %v9354_v50, %v11328_v21  ;;  %v258_v22 = vand.u32 4294901760, %v257_v41  ;;  %7716 = vmatprep.subr.bf16.mxu0 %v9413_v16  ;;  %v287_v8 = vsub.f32 %v9406_v30, %v11170_v9  ;;  %v9451_v58 = vpack.c.bf16 %v9024_v49, %v8995_v40  ;;  %v11340_v45 = vld [vmem:[#allocation18_spill] sm:$0xff]  ;;  %v11342_v21 = vld [vmem:[#allocation8_spill] sm:$0xff] }
  0x39   :  { %v278_v5 = vand.u32 4294901760, %v277_v52  ;;  %v9438_v11 = vpack.c.bf16 %v404_v10, %v397_v13  ;;  %v9475_v40 = vpack.c.bf16 %v9180_v15, %v9175_v20  ;;  %v9483_v49 = vpack.c.bf16 %v9236_v0, %v9230_v1  ;;  %v11329_v0 = vld [vmem:[#allocation5_spill] sm:$0xff]  ;;  %v11333_v20 = vld [vmem:[#allocation3_spill] sm:$0xff]  ;;  %v11334_v15 = vld [vmem:[#allocation10_spill] sm:$0xff] }
  0x3a   :  { %6367 = vmatmul.mubr.f32.gmra.mrb[10].mxu0 %v248_v43  ;;  %v268_v37 = vand.u32 4294901760, %v267_v47  ;;  %v288_v41 = vand.u32 4294901760, %v287_v8  ;;  %v9444_v43 = vpack.c.bf16 %v8977_v34, %v8975_v33  ;;  %v9459_v33 = vpack.c.bf16 %v9093_v26, %v9088_v17  ;;  %v11330_v17 = vld [vmem:[#allocation2_spill] sm:$0xff]  ;;  %v11331_v26 = vld [vmem:[#allocation7_spill] sm:$0xff]  ;;  %v11335_v1 = vld [vmem:[#allocation12_spill] sm:$0xff] }
  0x3b   :  { %7718 = vmatpush3.bf16.msra.mxu0 %v9413_v16  ;;  %6369 = vmatprep.mubr.f32.mxu0 %v258_v22  ;;  %v9467_v34 = vpack.c.bf16 %v9162_v57, %v9155_v59  ;;  %v9491_v57 = vpack.c.bf16 %v9295_v28, %v9290_v2  ;;  %v9499_v59 = vpack.c.bf16 %v9344_v56, %v9335_v36  ;;  %v11332_v56 = vld [vmem:[#allocation9_spill] sm:$0xff]  ;;  %v11336_v2 = vld [vmem:[#allocation4_spill] sm:$0xff]  ;;  %v11344_v22 = vld [vmem:[#allocation22_spill] sm:$0xff]  ;;  %v11353_v29 = vand.u32 4294901760, %v11334_v15 }
  0x3c   :  { %7720 = vmatprep.subr.bf16.mxu0 %v9431_v3  ;;  %v11337_v28 = vld [vmem:[#allocation13_spill] sm:$0xff]  ;;  %v11338_v36 = vld [vmem:[#allocation16_spill] sm:$0xff]  ;;  %v11345_v52 = vld [vmem:[#allocation11_spill] sm:$0xff] }
  0x3d   :  { %v11343_v47 = vld [vmem:[#allocation21_spill] sm:$0xff]  ;;  %v11346_v13 = vld [vmem:[#allocation14_spill] sm:$0xff]  ;;  %v11347_v10 = vld [vmem:[#allocation15_spill] sm:$0xff] }
  0x3e   :  { %6370 = vmatmul.mubr.f32.gmra.mrb[12].mxu0 %v268_v37  ;;  %v11348_v37 = vand.u32 4294901760, %v11329_v0  ;;  %v11349_v8 = vld [vmem:[#allocation26_spill] sm:$0xff]  ;;  %v11352_v9 = vld [vmem:[#allocation27_spill] sm:$0xff] }
  0x3f   :  { %7722 = vmatpush3.bf16.msra.mxu0 %v9431_v3  ;;  %6372 = vmatprep.mubr.f32.mxu0 %v278_v5  ;;  %v11350_v5 = vand.u32 4294901760, %v11331_v26 }
  0x40   :  { %7724 = vmatprep.subr.bf16.mxu0 %v9438_v11 }
  0x42   :  { %6373 = vmatmul.mubr.f32.gmra.mrb[14].mxu0 %v288_v41  ;;  %v11351_v41 = vand.u32 4294901760, %v11332_v56 }
  0x43   :  { %7726 = vmatpush3.bf16.msra.mxu0 %v9438_v11  ;;  %6407 = vmatprep.mubr.f32.mxu0 %v8924_v18 }
  0x44   :  { %7728 = vmatprep.subr.bf16.mxu0 %v9444_v43 }
  0x46   :  { %6408 = vmatmul.mubr.f32.vlgmr.msra.gmra.mrb[0].mxu0 %v8950_v25 }
  0x47   :  { %7730 = vmatpush3.bf16.msra.mxu0 %v9444_v43  ;;  %6410 = vmatprep.mubr.f32.mxu0 %v8991_v38 }
  0x48   :  { %7732 = vmatprep.subr.bf16.mxu0 %v9451_v58 }
  0x4a   :  { %6411 = vmatmul.mubr.f32.gmra.mrb[2].mxu0 %v8993_v39 }
  0x4b   :  { %7734 = vmatpush3.bf16.msra.mxu0 %v9451_v58  ;;  %6413 = vmatprep.mubr.f32.mxu0 %v9051_v61 }
  0x4c   :  { %7736 = vmatprep.subr.bf16.mxu0 %v9459_v33 }
  0x4e   :  { %6414 = vmatmul.mubr.f32.gmra.mrb[4].mxu0 %v9053_v62 }
  0x4f   :  { %7738 = vmatpush3.bf16.msra.mxu0 %v9459_v33  ;;  %6416 = vmatprep.mubr.f32.mxu0 %v9102_v44 }
  0x50   :  { %7740 = vmatprep.subr.bf16.mxu0 %v9467_v34 }
  0x52   :  { %6417 = vmatmul.mubr.f32.gmra.mrb[6].mxu0 %v9144_v6 }
  0x53   :  { %7742 = vmatpush3.bf16.msra.mxu0 %v9467_v34  ;;  %6419 = vmatprep.mubr.f32.mxu0 %v9164_v51 }
  0x54   :  { %7744 = vmatprep.subr.bf16.mxu0 %v9475_v40 }
  0x56   :  { %6420 = vmatmul.mubr.f32.gmra.mrb[8].mxu0 %v9166_v46 }
  0x57   :  { %7746 = vmatpush3.bf16.msra.mxu0 %v9475_v40  ;;  %6422 = vmatprep.mubr.f32.mxu0 %v9222_v7 }
  0x58   :  { %7748 = vmatprep.subr.bf16.mxu0 %v9483_v49 }
  0x5a   :  { %6423 = vmatmul.mubr.f32.gmra.mrb[10].mxu0 %v9259_v31 }
  0x5b   :  { %7750 = vmatpush3.bf16.msra.mxu0 %v9483_v49  ;;  %6425 = vmatprep.mubr.f32.mxu0 %v9280_v19 }
  0x5c   :  { %7752 = vmatprep.subr.bf16.mxu0 %v9491_v57 }
  0x5e   :  { %6426 = vmatmul.mubr.f32.gmra.mrb[12].mxu0 %v9322_v27 }
  0x5f   :  { %7754 = vmatpush3.bf16.msra.mxu0 %v9491_v57  ;;  %6428 = vmatprep.mubr.f32.mxu0 %v9327_v23 }
  0x60   :  { %7756 = vmatprep.subr.bf16.mxu0 %v9499_v59 }
  0x62   :  { %6429 = vmatmul.mubr.f32.gmra.mrb[14].mxu0 %v9356_v35 }
  0x63   :  { %7758 = vmatpush3.bf16.msra.mxu0 %v9499_v59  ;;  %6463 = vmatprep.mubr.f32.mxu0 %v11329_v0  ;;  %v11354_v0 = vand.u32 4294901760, %v11335_v1 }
  0x64   :  { %7760 = vmatprep.subr.bf16.mxu0 %v11330_v17 }
  0x66   :  { %6464 = vmatmul.mubr.f32.vlgmr.msra.gmra.mrb[0].mxu0 %v11331_v26  ;;  %v11356_v26 = vand.u32 4294901760, %v11337_v28 }
  0x67   :  { %7762 = vmatpush3.bf16.msra.mxu0 %v11330_v17  ;;  %6466 = vmatprep.mubr.f32.mxu0 %v11332_v56  ;;  %v11357_v56 = vand.u32 4294901760, %v11338_v36 }
  0x68   :  { %7764 = vmatprep.subr.bf16.mxu0 %v11333_v20 }
  0x6a   :  { %6467 = vmatmul.mubr.f32.gmra.mrb[2].mxu0 %v11334_v15  ;;  %v11358_v15 = vand.u32 4294901760, %v11340_v45 }
  0x6b   :  { %7766 = vmatpush3.bf16.msra.mxu0 %v11333_v20  ;;  %6469 = vmatprep.mubr.f32.mxu0 %v11335_v1  ;;  %v11360_v1 = vand.u32 4294901760, %v11343_v47 }
  0x6c   :  { %7768 = vmatprep.subr.bf16.mxu0 %v11336_v2 }
  0x6e   :  { %6470 = vmatmul.mubr.f32.gmra.mrb[4].mxu0 %v11337_v28  ;;  %v11361_v28 = vand.u32 4294901760, %v11344_v22 }
  0x6f   :  { %7770 = vmatpush3.bf16.msra.mxu0 %v11336_v2  ;;  %6472 = vmatprep.mubr.f32.mxu0 %v11338_v36  ;;  %v11362_v36 = vand.u32 4294901760, %v9307_v42 }
  0x70   :  { %7772 = vmatprep.subr.bf16.mxu0 %v11339_v32 }
  0x72   :  { %6473 = vmatmul.mubr.f32.gmra.mrb[6].mxu0 %v11340_v45  ;;  %v11363_v45 = vand.u32 4294901760, %v9320_v54 }
  0x73   :  { %7774 = vmatpush3.bf16.msra.mxu0 %v11339_v32  ;;  %6475 = vmatprep.mubr.f32.mxu0 %v11341_v48 }
  0x74   :  { %7776 = vmatprep.subr.bf16.mxu0 %v11342_v21 }
  0x76   :  { %6476 = vmatmul.mubr.f32.gmra.mrb[8].mxu0 %v11343_v47  ;;  %v11365_v47 = vand.u32 4294901760, %v9362_v12 }
  0x77   :  { %7778 = vmatpush3.bf16.msra.mxu0 %v11342_v21  ;;  %6478 = vmatprep.mubr.f32.mxu0 %v11344_v22 }
  0x78   :  { %7780 = vmatprep.subr.bf16.mxu0 %v11345_v52 }
  0x7a   :  { %6479 = vmatmul.mubr.f32.gmra.mrb[10].mxu0 %v9307_v42  ;;  %v11366_v42 = vand.u32 4294901760, %v9406_v30 }
  0x7b   :  { %7782 = vmatpush3.bf16.msra.mxu0 %v11345_v52  ;;  %6481 = vmatprep.mubr.f32.mxu0 %v9320_v54  ;;  %v2796_v54 = vld [vmem:[%s11102_s3 + $0x18] sm:$0xff] }
  0x7c   :  { %7784 = vmatprep.subr.bf16.mxu0 %v11346_v13 }
  0x7e   :  { %6482 = vmatmul.mubr.f32.gmra.mrb[12].mxu0 %v9354_v50 }
  0x7f   :  { %7786 = vmatpush3.bf16.msra.mxu0 %v11346_v13  ;;  %6484 = vmatprep.mubr.f32.mxu0 %v9362_v12  ;;  %v2798_v12 = vld [vmem:[%s11102_s3 + $0x28] sm:$0xff] }
  0x80   :  { %7788 = vmatprep.subr.bf16.mxu0 %v11347_v10 }
  0x82   :  { %6485 = vmatmul.mubr.f32.gmra.mrb[14].mxu0 %v9406_v30 }
  0x83   :  { %7790 = vmatpush3.bf16.msra.mxu0 %v11347_v10  ;;  %6519 = vmatprep.mubr.f32.mxu0 %v11348_v37  ;;  %v11355_v37 = vld [vmem:[#allocation28_spill] sm:$0xff] }
  0x84   :  { %7792 = vmatprep.subr.bf16.mxu0 %v11349_v8 }
  0x86   :  { %6520 = vmatmul.mubr.f32.vlgmr.msra.gmra.mrb[0].mxu0 %v11350_v5 }
  0x87   :  { %7794 = vmatpush3.bf16.msra.mxu0 %v11349_v8  ;;  %6522 = vmatprep.mubr.f32.mxu0 %v11351_v41  ;;  %v9682_v41 = vand.u32 4294901760, %v2798_v12 }
  0x88   :  { %7796 = vmatprep.subr.bf16.mxu0 %v11352_v9 }
  0x8a   :  { %6523 = vmatmul.mubr.f32.gmra.mrb[2].mxu0 %v11353_v29  ;;  %v11359_v29 = vand.u32 4294901760, %v11341_v48  ;;  %v11364_v48 = vand.u32 4294901760, %v9354_v50 }
  0x8b   :  { %7798 = vmatpush3.bf16.msra.mxu0 %v11352_v9  ;;  %6525 = vmatprep.mubr.f32.mxu0 %v11354_v0 }
  0x8c   :  { %7800 = vmatprep.subr.bf16.mxu0 %v11355_v37 }
  0x8e   :  { %6526 = vmatmul.mubr.f32.gmra.mrb[4].mxu0 %v11356_v26 }
  0x8f   :  { %7802 = vmatpush3.bf16.msra.mxu0 %v11355_v37  ;;  %6528 = vmatprep.mubr.f32.mxu0 %v11357_v56  ;;  %v2800_v56 = vld [vmem:[%s11102_s3 + $0x38] sm:$0xff] }
  0x90   :  { %7804 = vmatprep.subr.bf16.mxu0 %v9392_v4 }
  0x92   :  { %6529 = vmatmul.mubr.f32.gmra.mrb[6].mxu0 %v11358_v15 }
  0x93   :  { %7806 = vmatpush3.bf16.msra.mxu0 %v9392_v4  ;;  %6531 = vmatprep.mubr.f32.mxu0 %v11359_v29 }
  0x94   :  { %7808 = vmatprep.subr.bf16.mxu0 %v9398_v60 }
  0x96   :  { %6532 = vmatmul.mubr.f32.gmra.mrb[8].mxu0 %v11360_v1  ;;  %v2801_v1 = vld [vmem:[%s11102_s3 + $0x40] sm:$0xff] }
  0x97   :  { %7810 = vmatpush3.bf16.msra.mxu0 %v9398_v60  ;;  %6534 = vmatprep.mubr.f32.mxu0 %v11361_v28  ;;  %v9708_v28 = vsub.f32 %v2798_v12, %v9682_v41 }
  0x98   :  { %7812 = vmatprep.subr.bf16.mxu0 %v9402_v14 }
  0x9a   :  { %6535 = vmatmul.mubr.f32.gmra.mrb[10].mxu0 %v11362_v36  ;;  %v9710_v36 = vand.u32 4294901760, %v2800_v56 }
  0x9b   :  { %7814 = vmatpush3.bf16.msra.mxu0 %v9402_v14  ;;  %6537 = vmatprep.mubr.f32.mxu0 %v11363_v45 }
  0x9c   :  { %7816 = vmatprep.subr.bf16.mxu0 %v9408_v63 }
  0x9e   :  { %6538 = vmatmul.mubr.f32.gmra.mrb[12].mxu0 %v11364_v48 }
  0x9f   :  { %7818 = vmatpush3.bf16.msra.mxu0 %v9408_v63  ;;  %6540 = vmatprep.mubr.f32.mxu0 %v11365_v47 }
  0xa0   :  { %7820 = vmatprep.subr.bf16.mxu0 %v9410_v24 }
  0xa2   :  { %6541 = vmatmul.mubr.f32.gmra.mrb[14].mxu0 %v11366_v42 }
  0xa3   :  { %7822 = vmatpush3.bf16.msra.mxu0 %v9410_v24  ;;  %6575 = vmatprep.mubr.f32.mxu0 %v8924_v18 }
  0xa4   :  { %7824 = vmatprep.subr.bf16.mxu0 %v11330_v17 }
  0xa6   :  { %6576 = vmatmul.mubr.f32.vlgmr.msra.gmra.mrb[0].mxu0 %v8950_v25 }
  0xa7   :  { %7826 = vmatpush3.bf16.msra.mxu0 %v11330_v17  ;;  %6578 = vmatprep.mubr.f32.mxu0 %v8991_v38 }
  0xa8   :  { %7828 = vmatprep.subr.bf16.mxu0 %v11333_v20 }
  0xaa   :  { %6579 = vmatmul.mubr.f32.gmra.mrb[2].mxu0 %v8993_v39 }
  0xab   :  { %7830 = vmatpush3.bf16.msra.mxu0 %v11333_v20  ;;  %6581 = vmatprep.mubr.f32.mxu0 %v9051_v61 }
  0xac   :  { %7832 = vmatprep.subr.bf16.mxu0 %v11336_v2 }
  0xae   :  { %6582 = vmatmul.mubr.f32.gmra.mrb[4].mxu0 %v9053_v62 }
  0xaf   :  { %7834 = vmatpush3.bf16.msra.mxu0 %v11336_v2  ;;  %6584 = vmatprep.mubr.f32.mxu0 %v9102_v44 }
  0xb0   :  { %7836 = vmatprep.subr.bf16.mxu0 %v11339_v32 }
  0xb2   :  { %6585 = vmatmul.mubr.f32.gmra.mrb[6].mxu0 %v9144_v6 }
  0xb3   :  { %7838 = vmatpush3.bf16.msra.mxu0 %v11339_v32  ;;  %6587 = vmatprep.mubr.f32.mxu0 %v9164_v51 }
  0xb4   :  { %7840 = vmatprep.subr.bf16.mxu0 %v11342_v21 }
  0xb6   :  { %6588 = vmatmul.mubr.f32.gmra.mrb[8].mxu0 %v9166_v46 }
  0xb7   :  { %7842 = vmatpush3.bf16.msra.mxu0 %v11342_v21  ;;  %6590 = vmatprep.mubr.f32.mxu0 %v9222_v7 }
  0xb8   :  { %7844 = vmatprep.subr.bf16.mxu0 %v11345_v52 }
  0xba   :  { %6591 = vmatmul.mubr.f32.gmra.mrb[10].mxu0 %v9259_v31 }
  0xbb   :  { %7846 = vmatpush3.bf16.msra.mxu0 %v11345_v52  ;;  %6593 = vmatprep.mubr.f32.mxu0 %v9280_v19 }
  0xbc   :  { %7848 = vmatprep.subr.bf16.mxu0 %v11346_v13 }
  0xbe   :  { %6594 = vmatmul.mubr.f32.gmra.mrb[12].mxu0 %v9322_v27 }
  0xbf   :  { %7850 = vmatpush3.bf16.msra.mxu0 %v11346_v13  ;;  %6596 = vmatprep.mubr.f32.mxu0 %v9327_v23 }
  0xc0   :  { %7852 = vmatprep.subr.bf16.mxu0 %v11347_v10 }
  0xc2   :  { %6597 = vmatmul.mubr.f32.gmra.mrb[14].mxu0 %v9356_v35 }
  0xc3   :  { %7854 = vmatpush3.bf16.msra.mxu0 %v11347_v10  ;;  %6631 = vmatprep.mubr.f32.mxu0 %v8924_v18  ;;  %v2793_v18 = vld [vmem:[%s11102_s3] sm:$0xff] }
  0xc4   :  { %8048 = vmatprep.subr.bf16.mxu0 %v11330_v17 }
  0xc6   :  { %6632 = vmatmul.mubr.f32.vlgmr.msra.gmra.mrb[0].mxu0 %v8950_v25  ;;  %v9635_v25 = vand.u32 4294901760, %v2793_v18 }
  0xc7   :  { %8050 = vmatpush3.bf16.msra.mxu0 %v11330_v17  ;;  %6634 = vmatprep.mubr.f32.mxu0 %v8991_v38  ;;  %v2794_v38 = vld [vmem:[%s11102_s3 + $0x8] sm:$0xff] }
  0xc8   :  { %8052 = vmatprep.subr.bf16.mxu0 %v11333_v20 }
  0xca   :  { %6635 = vmatmul.mubr.f32.gmra.mrb[2].mxu0 %v8993_v39  ;;  %v2795_v39 = vld [vmem:[%s11102_s3 + $0x10] sm:$0xff] }
  0xcb   :  { %8054 = vmatpush3.bf16.msra.mxu0 %v11333_v20  ;;  %6637 = vmatprep.mubr.f32.mxu0 %v9051_v61  ;;  %v9645_v61 = vand.u32 4294901760, %v2794_v38 }
  0xcc   :  { %8056 = vmatprep.subr.bf16.mxu0 %v11336_v2 }
  0xcd   :  { %v9663_v50 = vsub.f32 %v2794_v38, %v9645_v61  ;;  %v2802_v38 = vld [vmem:[%s11102_s3 + $0x48] sm:$0xff] }
  0xce   :  { %6638 = vmatmul.mubr.f32.gmra.mrb[4].mxu0 %v9053_v62  ;;  %v9650_v62 = vsub.f32 %v2793_v18, %v9635_v25  ;;  %v9726_v18 = vand.u32 4294901760, %v2801_v1 }
  0xcf   :  { %8058 = vmatpush3.bf16.msra.mxu0 %v11336_v2  ;;  %6640 = vmatprep.mubr.f32.mxu0 %v9102_v44  ;;  %v9652_v44 = vand.u32 4294901760, %v2795_v39  ;;  %v11173_v0 = vand.u32 4294901760, %v9663_v50 }
  0xd0   :  { %8060 = vmatprep.subr.bf16.mxu0 %v11339_v32  ;;  %v11176_v30 = vand.u32 4294901760, %v9650_v62 }
  0xd1   :  { %v9674_v22 = vsub.f32 %v2795_v39, %v9652_v44  ;;  %v2803_v39 = vld [vmem:[%s11102_s3 + $0x50] sm:$0xff] }
  0xd2   :  { %6641 = vmatmul.mubr.f32.gmra.mrb[6].mxu0 %v9144_v6  ;;  %v2797_v6 = vld [vmem:[%s11102_s3 + $0x20] sm:$0xff]  ;;  %v2893_v15 = vsub.f32 %v9650_v62, %v11176_v30 }
  0xd3   :  { %8062 = vmatpush3.bf16.msra.mxu0 %v11339_v32  ;;  %6643 = vmatprep.mubr.f32.mxu0 %v9164_v51  ;;  %v9665_v51 = vand.u32 4294901760, %v2796_v54  ;;  %v9676_v5 = vand.u32 4294901760, %v2797_v6 }
  0xd4   :  { %8064 = vmatprep.subr.bf16.mxu0 %v11342_v21  ;;  %v2894_v47 = vand.u32 4294901760, %v2893_v15  ;;  %v9744_v15 = vand.u32 4294901760, %v2802_v38 }
  0xd5   :  { %v9701_v29 = vsub.f32 %v2797_v6, %v9676_v5 }
  0xd6   :  { %6644 = vmatmul.mubr.f32.gmra.mrb[8].mxu0 %v9166_v46  ;;  %v2799_v46 = vld [vmem:[%s11102_s3 + $0x30] sm:$0xff]  ;;  %v9770_v24 = vsub.f32 %v2802_v38, %v9744_v15 }
  0xd7   :  { %8066 = vmatpush3.bf16.msra.mxu0 %v11342_v21  ;;  %6646 = vmatprep.mubr.f32.mxu0 %v9222_v7  ;;  %v9687_v7 = vsub.f32 %v2796_v54, %v9665_v51  ;;  %v9689_v26 = vand.u32 4294901760, %v2799_v46  ;;  %v9737_v54 = vsub.f32 %v2800_v56, %v9710_v36  ;;  %v2807_v38 = vld [vmem:[%s11102_s3 + $0x70] sm:$0xff] }
  0xd8   :  { %8068 = vmatprep.subr.bf16.mxu0 %v11345_v52 }
  0xd9   :  { %v11174_v45 = vand.u32 4294901760, %v9687_v7  ;;  %v9718_v48 = vsub.f32 %v2799_v46, %v9689_v26 }
  0xda   :  { %6647 = vmatmul.mubr.f32.gmra.mrb[10].mxu0 %v9259_v31  ;;  %v11172_v31 = vand.u32 4294901760, %v9674_v22 }
  0xdb   :  { %8070 = vmatpush3.bf16.msra.mxu0 %v11345_v52  ;;  %6649 = vmatprep.mubr.f32.mxu0 %v9280_v19  ;;  %v2903_v19 = vsub.f32 %v9663_v50, %v11173_v0  ;;  %v2923_v12 = vsub.f32 %v9687_v7, %v11174_v45  ;;  %v11186_v46 = vand.u32 4294901760, %v9718_v48  ;;  %v9751_v0 = vsub.f32 %v2801_v1, %v9726_v18  ;;  %v11367_v45 = vld [vmem:[#allocation17_spill] sm:$0xff] }
  0xdc   :  { %8072 = vmatprep.subr.bf16.mxu0 %v11346_v13  ;;  %v2913_v42 = vsub.f32 %v9674_v22, %v11172_v31 }
  0xdd   :  { %v2904_v6 = vand.u32 4294901760, %v2903_v19  ;;  %v2804_v19 = vld [vmem:[%s11102_s3 + $0x58] sm:$0xff]  ;;  %v2924_v1 = vand.u32 4294901760, %v2923_v12  ;;  %v2953_v30 = vsub.f32 %v9718_v48, %v11186_v46  ;;  %v2806_v12 = vld [vmem:[%s11102_s3 + $0x68] sm:$0xff]  ;;  %v11370_v37 = vand.u32 4294901760, %v9751_v0 }
  0xde   :  { %6650 = vmatmul.mubr.f32.gmra.mrb[12].mxu0 %v9322_v27  ;;  %v11175_v27 = vand.u32 4294901760, %v9701_v29  ;;  %v2914_v31 = vand.u32 4294901760, %v2913_v42  ;;  %v9772_v63 = vand.u32 4294901760, %v2804_v19  ;;  %v11368_v46 = vld [vmem:[#allocation19_spill] sm:$0xff]  ;;  %v9795_v4 = vand.u32 4294901760, %v2806_v12 }
  0xdf   :  { %8074 = vmatpush3.bf16.msra.mxu0 %v11346_v13  ;;  %6652 = vmatprep.mubr.f32.mxu0 %v9327_v23  ;;  %v11185_v23 = vand.u32 4294901760, %v9708_v28 }
  0xe0   :  { %8076 = vmatprep.subr.bf16.mxu0 %v11347_v10  ;;  %v2933_v56 = vsub.f32 %v9701_v29, %v11175_v27  ;;  %v9816_v9 = vsub.f32 %v2806_v12, %v9795_v4 }
  0xe1   :  { %v2943_v42 = vsub.f32 %v9708_v28, %v11185_v23 }
  0xe2   :  { %6653 = vmatmul.mubr.f32.gmra.mrb[14].mxu0 %v9356_v35  ;;  %v9753_v35 = vand.u32 4294901760, %v2803_v39  ;;  %v2934_v14 = vand.u32 4294901760, %v2933_v56 }
  0xe3   :  { %8078 = vmatpush3.bf16.msra.mxu0 %v11347_v10  ;;  %7023 = vmatprep.mubr.f32.mxu0 %v2894_v47  ;;  %v2805_v47 = vld [vmem:[%s11102_s3 + $0x60] sm:$0xff]  ;;  %v2944_v27 = vand.u32 4294901760, %v2943_v42  ;;  %v2973_v42 = vsub.f32 %v9751_v0, %v11370_v37 }
  0xe4   :  { %8080 = vmatprep.subr.bf16.mxu0 %v11367_v45  ;;  %v9777_v23 = vsub.f32 %v2803_v39, %v9753_v35  ;;  %v2954_v39 = vand.u32 4294901760, %v2953_v30  ;;  %v9805_v30 = vand.u32 4294901760, %v2807_v38 }
  0xe5   :  { %v2974_v8 = vand.u32 4294901760, %v2973_v42 }
  0xe6   :  { %7024 = vmatmul.mubr.f32.vlgmr.msra.gmra.mrb[16].mxu0 %v2904_v6  ;;  %v9779_v6 = vand.u32 4294901760, %v2805_v47  ;;  %v11373_v10 = vand.u32 4294901760, %v9777_v23  ;;  %v9826_v13 = vsub.f32 %v2807_v38, %v9805_v30 }
  0xe7   :  { %8082 = vmatpush3.bf16.msra.mxu0 %v11367_v45  ;;  %7026 = vmatprep.mubr.f32.mxu0 %v2914_v31  ;;  %v11369_v31 = vand.u32 4294901760, %v9737_v54  ;;  %v9793_v45 = vsub.f32 %v2804_v19, %v9772_v63  ;;  %v2808_v19 = vld [vmem:[%s11102_s3 + $0x78] sm:$0xff] }
  0xe8   :  { %8084 = vmatprep.subr.bf16.mxu0 %v11368_v46 }
  0xe9   :  { %v2963_v56 = vsub.f32 %v9737_v54, %v11369_v31  ;;  %v9803_v31 = vsub.f32 %v2805_v47, %v9779_v6  ;;  %v11196_v37 = vand.u32 4294901760, %v9793_v45  ;;  %v9818_v47 = vand.u32 4294901760, %v2808_v19 }
  0xea   :  { %7027 = vmatmul.mubr.f32.gmra.mrb[18].mxu0 %v2924_v1  ;;  %v11371_v1 = vld [vmem:[#allocation23_spill] sm:$0xff] }
  0xeb   :  { %8086 = vmatpush3.bf16.msra.mxu0 %v11368_v46  ;;  %7029 = vmatprep.mubr.f32.mxu0 %v2934_v14  ;;  %v2964_v60 = vand.u32 4294901760, %v2963_v56  ;;  %v11372_v14 = vand.u32 4294901760, %v9770_v24  ;;  %v2993_v56 = vsub.f32 %v9777_v23, %v11373_v10  ;;  %v9834_v42 = vsub.f32 %v2808_v19, %v9818_v47 }
  0xec   :  { %8088 = vmatprep.subr.bf16.mxu0 %v11371_v1 }
  0xed   :  { %v2983_v46 = vsub.f32 %v9770_v24, %v11372_v14  ;;  %v3003_v14 = vsub.f32 %v9793_v45, %v11196_v37  ;;  %v2994_v10 = vand.u32 4294901760, %v2993_v56  ;;  %v3042_v19 = vand.u32 4294901760, %v9834_v42 }
  0xee   :  { %7030 = vmatmul.mubr.f32.gmra.mrb[20].mxu0 %v2944_v27  ;;  %v11197_v27 = vand.u32 4294901760, %v9803_v31 }
  0xef   :  { %8090 = vmatpush3.bf16.msra.mxu0 %v11371_v1  ;;  %7032 = vmatprep.mubr.f32.mxu0 %v2954_v39  ;;  %v2984_v12 = vand.u32 4294901760, %v2983_v46  ;;  %v3022_v39 = vand.u32 4294901760, %v9816_v9  ;;  %v3004_v46 = vand.u32 4294901760, %v3003_v14 }
  0xf0   :  { %8092 = vmatprep.subr.bf16.mxu0 %v9338_v53  ;;  %v3013_v38 = vsub.f32 %v9803_v31, %v11197_v27 }
  0xf1   :  { %v3023_v37 = vsub.f32 %v9816_v9, %v3022_v39 }
  0xf2   :  { %7033 = vmatmul.mubr.f32.gmra.mrb[22].mxu0 %v2964_v60  ;;  %v3032_v60 = vand.u32 4294901760, %v9826_v13 }
  0xf3   :  { %8094 = vmatpush3.bf16.msra.mxu0 %v9338_v53  ;;  %7035 = vmatprep.mubr.f32.mxu0 %v2974_v8  ;;  %v3014_v8 = vand.u32 4294901760, %v3013_v38  ;;  %v3024_v27 = vand.u32 4294901760, %v3023_v37  ;;  %v11374_v37 = vld [vmem:[#allocation14_spill] sm:$0xff]  ;;  %v11376_v38 = vand.u32 4294901760, %v9650_v62 }
  0xf4   :  { %8096 = vmatprep.subr.bf16.mxu0 %v9347_v55  ;;  %v3033_v56 = vsub.f32 %v9826_v13, %v3032_v60 }
  0xf6   :  { %7036 = vmatmul.mubr.f32.gmra.mrb[24].mxu0 %v2984_v12  ;;  %v3043_v12 = vsub.f32 %v9834_v42, %v3042_v19  ;;  %v3034_v14 = vand.u32 4294901760, %v3033_v56  ;;  %v11379_v56 = vand.u32 4294901760, %v9674_v22 }
  0xf7   :  { %8098 = vmatpush3.bf16.msra.mxu0 %v9347_v55  ;;  %7038 = vmatprep.mubr.f32.mxu0 %v2994_v10 }
  0xf8   :  { %8100 = vmatprep.subr.bf16.mxu0 %v9413_v16  ;;  %v3044_v10 = vand.u32 4294901760, %v3043_v12  ;;  %v11380_v12 = vld [vmem:[#allocation27_spill] sm:$0xff] }
  0xfa   :  { %7039 = vmatmul.mubr.f32.gmra.mrb[26].mxu0 %v3004_v46  ;;  %v11377_v46 = vld [vmem:[#allocation26_spill] sm:$0xff] }
  0xfb   :  { %8102 = vmatpush3.bf16.msra.mxu0 %v9413_v16  ;;  %7041 = vmatprep.mubr.f32.mxu0 %v3014_v8  ;;  %v11378_v8 = vand.u32 4294901760, %v9663_v50 }
  0xfc   :  { %8104 = vmatprep.subr.bf16.mxu0 %v9431_v3 }
  0xfe   :  { %7042 = vmatmul.mubr.f32.gmra.mrb[28].mxu0 %v3024_v27  ;;  %v11375_v27 = vld [vmem:[#allocation15_spill] sm:$0xff] }
  0xff   :  { %8106 = vmatpush3.bf16.msra.mxu0 %v9431_v3  ;;  %7044 = vmatprep.mubr.f32.mxu0 %v3034_v14  ;;  %v11381_v14 = vand.u32 4294901760, %v9687_v7 }
 0x100   :  { %8108 = vmatprep.subr.bf16.mxu0 %v9438_v11 }
 0x102   :  { %7045 = vmatmul.mubr.f32.gmra.mrb[30].mxu0 %v3044_v10  ;;  %v11383_v10 = vld [vmem:[#allocation28_spill] sm:$0xff] }
 0x103   :  { %8110 = vmatpush3.bf16.msra.mxu0 %v9438_v11  ;;  %7079 = vmatprep.mubr.f32.mxu0 %v9635_v25 }
 0x104   :  { %8112 = vmatprep.subr.bf16.mxu0 %v9444_v43 }
 0x106   :  { %7080 = vmatmul.mubr.f32.vlgmr.msra.gmra.mrb[16].mxu0 %v9645_v61 }
 0x107   :  { %8114 = vmatpush3.bf16.msra.mxu0 %v9444_v43  ;;  %7082 = vmatprep.mubr.f32.mxu0 %v9652_v44 }
 0x108   :  { %8116 = vmatprep.subr.bf16.mxu0 %v9451_v58 }
 0x10a   :  { %7083 = vmatmul.mubr.f32.gmra.mrb[18].mxu0 %v9665_v51 }
 0x10b   :  { %8118 = vmatpush3.bf16.msra.mxu0 %v9451_v58  ;;  %7085 = vmatprep.mubr.f32.mxu0 %v9676_v5 }
 0x10c   :  { %8120 = vmatprep.subr.bf16.mxu0 %v9459_v33 }
 0x10e   :  { %7086 = vmatmul.mubr.f32.gmra.mrb[20].mxu0 %v9682_v41 }
 0x10f   :  { %8122 = vmatpush3.bf16.msra.mxu0 %v9459_v33  ;;  %7088 = vmatprep.mubr.f32.mxu0 %v9689_v26 }
 0x110   :  { %8124 = vmatprep.subr.bf16.mxu0 %v9467_v34 }
 0x112   :  { %7089 = vmatmul.mubr.f32.gmra.mrb[22].mxu0 %v9710_v36 }
 0x113   :  { %8126 = vmatpush3.bf16.msra.mxu0 %v9467_v34  ;;  %7091 = vmatprep.mubr.f32.mxu0 %v9726_v18 }
 0x114   :  { %8128 = vmatprep.subr.bf16.mxu0 %v9475_v40 }
 0x116   :  { %7092 = vmatmul.mubr.f32.gmra.mrb[24].mxu0 %v9744_v15 }
 0x117   :  { %8130 = vmatpush3.bf16.msra.mxu0 %v9475_v40  ;;  %7094 = vmatprep.mubr.f32.mxu0 %v9753_v35 }
 0x118   :  { %8132 = vmatprep.subr.bf16.mxu0 %v9483_v49 }
 0x11a   :  { %7095 = vmatmul.mubr.f32.gmra.mrb[26].mxu0 %v9772_v63 }
 0x11b   :  { %8134 = vmatpush3.bf16.msra.mxu0 %v9483_v49  ;;  %7097 = vmatprep.mubr.f32.mxu0 %v9779_v6 }
 0x11c   :  { %8136 = vmatprep.subr.bf16.mxu0 %v9491_v57 }
 0x11e   :  { %7098 = vmatmul.mubr.f32.gmra.mrb[28].mxu0 %v9795_v4 }
 0x11f   :  { %8138 = vmatpush3.bf16.msra.mxu0 %v9491_v57  ;;  %7100 = vmatprep.mubr.f32.mxu0 %v9805_v30 }
 0x120   :  { %8140 = vmatprep.subr.bf16.mxu0 %v9499_v59 }
 0x122   :  { %7101 = vmatmul.mubr.f32.gmra.mrb[30].mxu0 %v9818_v47 }
 0x123   :  { %8142 = vmatpush3.bf16.msra.mxu0 %v9499_v59  ;;  %7135 = vmatprep.mubr.f32.mxu0 %v9650_v62  ;;  %v11382_v62 = vand.u32 4294901760, %v9701_v29 }
 0x124   :  { %8144 = vmatprep.subr.bf16.mxu0 %v11330_v17 }
 0x126   :  { %7136 = vmatmul.mubr.f32.vlgmr.msra.gmra.mrb[16].mxu0 %v9663_v50  ;;  %v11384_v50 = vand.u32 4294901760, %v9708_v28 }
 0x127   :  { %8146 = vmatpush3.bf16.msra.mxu0 %v11330_v17  ;;  %7138 = vmatprep.mubr.f32.mxu0 %v9674_v22  ;;  %v11385_v22 = vand.u32 4294901760, %v9718_v48 }
 0x128   :  { %8148 = vmatprep.subr.bf16.mxu0 %v11333_v20 }
 0x12a   :  { %7139 = vmatmul.mubr.f32.gmra.mrb[18].mxu0 %v9687_v7  ;;  %v11387_v7 = vand.u32 4294901760, %v9737_v54 }
 0x12b   :  { %8150 = vmatpush3.bf16.msra.mxu0 %v11333_v20  ;;  %7141 = vmatprep.mubr.f32.mxu0 %v9701_v29  ;;  %v11388_v29 = vand.u32 4294901760, %v9751_v0 }
 0x12c   :  { %8152 = vmatprep.subr.bf16.mxu0 %v11336_v2 }
 0x12e   :  { %7142 = vmatmul.mubr.f32.gmra.mrb[20].mxu0 %v9708_v28  ;;  %v11390_v28 = vand.u32 4294901760, %v9770_v24 }
 0x12f   :  { %8154 = vmatpush3.bf16.msra.mxu0 %v11336_v2  ;;  %7144 = vmatprep.mubr.f32.mxu0 %v9718_v48  ;;  %v11391_v48 = vand.u32 4294901760, %v9777_v23 }
 0x130   :  { %8156 = vmatprep.subr.bf16.mxu0 %v11339_v32 }
 0x132   :  { %7145 = vmatmul.mubr.f32.gmra.mrb[22].mxu0 %v9737_v54  ;;  %v11393_v54 = vand.u32 4294901760, %v9793_v45 }
 0x133   :  { %8158 = vmatpush3.bf16.msra.mxu0 %v11339_v32  ;;  %7147 = vmatprep.mubr.f32.mxu0 %v9751_v0  ;;  %v11394_v0 = vand.u32 4294901760, %v9803_v31 }
 0x134   :  { %8160 = vmatprep.subr.bf16.mxu0 %v11342_v21 }
 0x136   :  { %7148 = vmatmul.mubr.f32.gmra.mrb[24].mxu0 %v9770_v24  ;;  %v11396_v24 = vld [vmem:[#allocation33_spill] sm:$0xff] }
 0x137   :  { %8162 = vmatpush3.bf16.msra.mxu0 %v11342_v21  ;;  %7150 = vmatprep.mubr.f32.mxu0 %v9777_v23 }
 0x138   :  { %8164 = vmatprep.subr.bf16.mxu0 %v11345_v52 }
 0x13a   :  { %7151 = vmatmul.mubr.f32.gmra.mrb[26].mxu0 %v9793_v45 }
 0x13b   :  { %8166 = vmatpush3.bf16.msra.mxu0 %v11345_v52  ;;  %7153 = vmatprep.mubr.f32.mxu0 %v9803_v31 }
 0x13c   :  { %8168 = vmatprep.subr.bf16.mxu0 %v11374_v37 }
 0x13e   :  { %7154 = vmatmul.mubr.f32.gmra.mrb[28].mxu0 %v9816_v9 }
 0x13f   :  { %8170 = vmatpush3.bf16.msra.mxu0 %v11374_v37  ;;  %7156 = vmatprep.mubr.f32.mxu0 %v9826_v13 }
 0x140   :  { %8172 = vmatprep.subr.bf16.mxu0 %v11375_v27 }
 0x142   :  { %7157 = vmatmul.mubr.f32.gmra.mrb[30].mxu0 %v9834_v42 }
 0x143   :  { %8174 = vmatpush3.bf16.msra.mxu0 %v11375_v27  ;;  %7191 = vmatprep.mubr.f32.mxu0 %v11376_v38  ;;  %v11386_v38 = vld [vmem:[#allocation29_spill] sm:$0xff] }
 0x144   :  { %8176 = vmatprep.subr.bf16.mxu0 %v11377_v46 }
 0x146   :  { %7192 = vmatmul.mubr.f32.vlgmr.msra.gmra.mrb[16].mxu0 %v11378_v8  ;;  %v11389_v8 = vld [vmem:[#allocation30_spill] sm:$0xff] }
 0x147   :  { %8178 = vmatpush3.bf16.msra.mxu0 %v11377_v46  ;;  %7194 = vmatprep.mubr.f32.mxu0 %v11379_v56  ;;  %v11392_v56 = vld [vmem:[#allocation31_spill] sm:$0xff] }
 0x148   :  { %8180 = vmatprep.subr.bf16.mxu0 %v11380_v12 }
 0x14a   :  { %7195 = vmatmul.mubr.f32.gmra.mrb[18].mxu0 %v11381_v14  ;;  %v11395_v14 = vld [vmem:[#allocation32_spill] sm:$0xff] }
 0x14b   :  { %8182 = vmatpush3.bf16.msra.mxu0 %v11380_v12  ;;  %7197 = vmatprep.mubr.f32.mxu0 %v11382_v62 }
 0x14c   :  { %8184 = vmatprep.subr.bf16.mxu0 %v11383_v10 }
 0x14e   :  { %7198 = vmatmul.mubr.f32.gmra.mrb[20].mxu0 %v11384_v50 }
 0x14f   :  { %8186 = vmatpush3.bf16.msra.mxu0 %v11383_v10  ;;  %7200 = vmatprep.mubr.f32.mxu0 %v11385_v22 }
 0x150   :  { %8188 = vmatprep.subr.bf16.mxu0 %v11386_v38 }
 0x152   :  { %7201 = vmatmul.mubr.f32.gmra.mrb[22].mxu0 %v11387_v7 }
 0x153   :  { %8190 = vmatpush3.bf16.msra.mxu0 %v11386_v38  ;;  %7203 = vmatprep.mubr.f32.mxu0 %v11388_v29 }
 0x154   :  { %8192 = vmatprep.subr.bf16.mxu0 %v11389_v8 }
 0x156   :  { %7204 = vmatmul.mubr.f32.gmra.mrb[24].mxu0 %v11390_v28  ;;  %v8819_v28 = vld [vmem:[%s11101_s2 + $0x28] sm:$0xff] }
 0x157   :  { %8194 = vmatpush3.bf16.msra.mxu0 %v11389_v8  ;;  %7206 = vmatprep.mubr.f32.mxu0 %v11391_v48 }
 0x158   :  { %8196 = vmatprep.subr.bf16.mxu0 %v11392_v56 }
 0x15a   :  { %7207 = vmatmul.mubr.f32.gmra.mrb[26].mxu0 %v11393_v54 }
 0x15b   :  { %8198 = vmatpush3.bf16.msra.mxu0 %v11392_v56  ;;  %7209 = vmatprep.mubr.f32.mxu0 %v11394_v0 }
 0x15c   :  { %8200 = vmatprep.subr.bf16.mxu0 %v11395_v14 }
 0x15e   :  { %7210 = vmatmul.mubr.f32.gmra.mrb[28].mxu0 %v3022_v39 }
 0x15f   :  { %8202 = vmatpush3.bf16.msra.mxu0 %v11395_v14  ;;  %7212 = vmatprep.mubr.f32.mxu0 %v3032_v60 }
 0x160   :  { %8204 = vmatprep.subr.bf16.mxu0 %v11396_v24 }
 0x162   :  { %7213 = vmatmul.mubr.f32.gmra.mrb[30].mxu0 %v3042_v19 }
 0x163   :  { %8206 = vmatpush3.bf16.msra.mxu0 %v11396_v24  ;;  %7247 = vmatprep.mubr.f32.mxu0 %v9635_v25 }
 0x164   :  { %8208 = vmatprep.subr.bf16.mxu0 %v11330_v17 }
 0x166   :  { %7248 = vmatmul.mubr.f32.vlgmr.msra.gmra.mrb[16].mxu0 %v9645_v61 }
 0x167   :  { %8210 = vmatpush3.bf16.msra.mxu0 %v11330_v17  ;;  %7250 = vmatprep.mubr.f32.mxu0 %v9652_v44 }
 0x168   :  { %8212 = vmatprep.subr.bf16.mxu0 %v11333_v20 }
 0x16a   :  { %7251 = vmatmul.mubr.f32.gmra.mrb[18].mxu0 %v9665_v51 }
 0x16b   :  { %8214 = vmatpush3.bf16.msra.mxu0 %v11333_v20  ;;  %7253 = vmatprep.mubr.f32.mxu0 %v9676_v5 }
 0x16c   :  { %8216 = vmatprep.subr.bf16.mxu0 %v11336_v2 }
 0x16e   :  { %7254 = vmatmul.mubr.f32.gmra.mrb[20].mxu0 %v9682_v41 }
 0x16f   :  { %8218 = vmatpush3.bf16.msra.mxu0 %v11336_v2  ;;  %7256 = vmatprep.mubr.f32.mxu0 %v9689_v26 }
 0x170   :  { %8220 = vmatprep.subr.bf16.mxu0 %v11339_v32 }
 0x172   :  { %7257 = vmatmul.mubr.f32.gmra.mrb[22].mxu0 %v9710_v36 }
 0x173   :  { %8222 = vmatpush3.bf16.msra.mxu0 %v11339_v32  ;;  %7259 = vmatprep.mubr.f32.mxu0 %v9726_v18 }
 0x174   :  { %8224 = vmatprep.subr.bf16.mxu0 %v11342_v21 }
 0x176   :  { %7260 = vmatmul.mubr.f32.gmra.mrb[24].mxu0 %v9744_v15 }
 0x177   :  { %8226 = vmatpush3.bf16.msra.mxu0 %v11342_v21  ;;  %7262 = vmatprep.mubr.f32.mxu0 %v9753_v35 }
 0x178   :  { %8228 = vmatprep.subr.bf16.mxu0 %v11345_v52 }
 0x17a   :  { %7263 = vmatmul.mubr.f32.gmra.mrb[26].mxu0 %v9772_v63 }
 0x17b   :  { %8230 = vmatpush3.bf16.msra.mxu0 %v11345_v52  ;;  %7265 = vmatprep.mubr.f32.mxu0 %v9779_v6 }
 0x17c   :  { %8232 = vmatprep.subr.bf16.mxu0 %v11374_v37 }
 0x17e   :  { %7266 = vmatmul.mubr.f32.gmra.mrb[28].mxu0 %v9795_v4 }
 0x17f   :  { %8234 = vmatpush3.bf16.msra.mxu0 %v11374_v37  ;;  %7268 = vmatprep.mubr.f32.mxu0 %v9805_v30 }
 0x180   :  { %8236 = vmatprep.subr.bf16.mxu0 %v11375_v27 }
 0x182   :  { %7269 = vmatmul.mubr.f32.gmra.mrb[30].mxu0 %v9818_v47 }
 0x183   :  { %8238 = vmatpush3.bf16.msra.mxu0 %v11375_v27  ;;  %7303 = vmatprep.mubr.f32.mxu0 %v9635_v25 }
 0x186   :  { %7304 = vmatmul.mubr.f32.vlgmr.msra.gmra.mrb[16].mxu0 %v9645_v61 }
 0x187   :  { %7306 = vmatprep.mubr.f32.mxu0 %v9652_v44  ;;  %v8815_v44 = vld [vmem:[%s11101_s2 + $0x8] sm:$0xff] }
 0x18a   :  { %7307 = vmatmul.mubr.f32.gmra.mrb[18].mxu0 %v9665_v51 }
 0x18b   :  { %7309 = vmatprep.mubr.f32.mxu0 %v9676_v5  ;;  %v8816_v5 = vld [vmem:[%s11101_s2] sm:$0xff] }
 0x18e   :  { %7310 = vmatmul.mubr.f32.gmra.mrb[20].mxu0 %v9682_v41 }
 0x18f   :  { %7312 = vmatprep.mubr.f32.mxu0 %v9689_v26 }
 0x192   :  { %7313 = vmatmul.mubr.f32.gmra.mrb[22].mxu0 %v9710_v36 }
 0x193   :  { %7315 = vmatprep.mubr.f32.mxu0 %v9726_v18 }
 0x196   :  { %7316 = vmatmul.mubr.f32.gmra.mrb[24].mxu0 %v9744_v15 }
 0x197   :  { %7318 = vmatprep.mubr.f32.mxu0 %v9753_v35  ;;  %v8817_v35 = vld [vmem:[%s11101_s2 + $0x18] sm:$0xff] }
 0x199   :  { %v6633_v9 = vpop.f32.mrb[0].mxu0 }
 0x19a   :  { %v1340_v13 = vmul.f32 0.015625, %v6633_v9  ;;  %v1245_v25 = vpop.f32.mrb[1].mxu0  ;;  %7319 = vmatmul.mubr.f32.gmra.mrb[26].mxu0 %v9772_v63 }
 0x19b   :  { %v1339_v61 = vmul.f32 0.015625, %v1245_v25  ;;  %7321 = vmatprep.mubr.f32.mxu0 %v9779_v6 }
 0x19c   :  { %v10019_v51 = vsub.f32 %v8815_v44, %v1340_v13 }
 0x19d   :  { %v10024_v41 = vsub.f32 %v8816_v5, %v1339_v61  ;;  %v6636_v26 = vpop.f32.mrb[2].mxu0 }
 0x19e   :  { %11397 = vst [vmem:[#allocation5_spill] sm:$0xff] %v10019_v51  ;;  %v1372_v36 = vmul.f32 %v10019_v51, %v10019_v51  ;;  %v1342_v63 = vmul.f32 0.015625, %v6636_v26  ;;  %v1257_v45 = vpop.f32.mrb[3].mxu0  ;;  %7322 = vmatmul.mubr.f32.gmra.mrb[28].mxu0 %v9795_v4  ;;  %v8818_v4 = vld [vmem:[%s11101_s2 + $0x10] sm:$0xff] }
 0x19f   :  { %11398 = vst [vmem:[#allocation2_spill] sm:$0xff] %v10024_v41  ;;  %v1371_v18 = vmul.f32 %v10024_v41, %v10024_v41  ;;  %v1341_v23 = vmul.f32 0.015625, %v1257_v45  ;;  %7324 = vmatprep.mubr.f32.mxu0 %v9805_v30  ;;  %v8825_v41 = vld [vmem:[%s11101_s2 + $0x58] sm:$0xff] }
 0x1a0   :  { %v10032_v15 = vand.u32 4294901760, %v1372_v36  ;;  %v10037_v6 = vsub.f32 %v8817_v35, %v1342_v63 }
 0x1a1   :  { %v10039_v31 = vand.u32 4294901760, %v1371_v18  ;;  %v10044_v39 = vsub.f32 %v8818_v4, %v1341_v23  ;;  %v6639_v42 = vpop.f32.mrb[4].mxu0  ;;  %v8821_v4 = vld [vmem:[%s11101_s2 + $0x38] sm:$0xff] }
 0x1a2   :  { %11399 = vst [vmem:[#allocation7_spill] sm:$0xff] %v10037_v6  ;;  %v10047_v60 = vsub.f32 %v1372_v36, %v10032_v15  ;;  %v1374_v30 = vmul.f32 %v10037_v6, %v10037_v6  ;;  %v1344_v19 = vmul.f32 0.015625, %v6639_v42  ;;  %v1269_v62 = vpop.f32.mrb[5].mxu0  ;;  %7325 = vmatmul.mubr.f32.gmra.mrb[30].mxu0 %v9818_v47  ;;  %v8820_v47 = vld [vmem:[%s11101_s2 + $0x20] sm:$0xff] }
 0x1a3   :  { %11400 = vst [vmem:[#allocation9_spill] sm:$0xff] %v10044_v39  ;;  %v1373_v50 = vmul.f32 %v10044_v39, %v10044_v39  ;;  %v1343_v22 = vmul.f32 0.015625, %v1269_v62  ;;  %v10055_v7 = vsub.f32 %v1371_v18, %v10039_v31 }
 0x1a4   :  { %v10057_v29 = vand.u32 4294901760, %v1374_v30  ;;  %v10062_v48 = vsub.f32 %v8819_v28, %v1344_v19  ;;  %v11198_v54 = vand.u32 4294901760, %v10047_v60 }
 0x1a5   :  { %v10065_v0 = vand.u32 4294901760, %v1373_v50  ;;  %v10070_v9 = vsub.f32 %v8820_v47, %v1343_v22  ;;  %v6642_v13 = vpop.f32.mrb[6].mxu0  ;;  %v11199_v25 = vand.u32 4294901760, %v10055_v7 }
 0x1a6   :  { %11401 = vst [vmem:[#allocation3_spill] sm:$0xff] %v10062_v48  ;;  %v10074_v61 = vsub.f32 %v1374_v30, %v10057_v29  ;;  %v1376_v44 = vmul.f32 %v10062_v48, %v10062_v48  ;;  %v1346_v5 = vmul.f32 0.015625, %v6642_v13  ;;  %v1281_v26 = vpop.f32.mrb[7].mxu0  ;;  %v1481_v36 = vsub.f32 %v10047_v60, %v11198_v54 }
 0x1a7   :  { %11402 = vst [vmem:[#allocation10_spill] sm:$0xff] %v10070_v9  ;;  %v10082_v63 = vsub.f32 %v1373_v50, %v10065_v0  ;;  %v1375_v45 = vmul.f32 %v10070_v9, %v10070_v9  ;;  %v1345_v18 = vmul.f32 0.015625, %v1281_v26  ;;  %v1471_v23 = vsub.f32 %v10055_v7, %v11199_v25  ;;  %v8822_v50 = vld [vmem:[%s11101_s2 + $0x30] sm:$0xff] }
 0x1a8   :  { %v10089_v35 = vand.u32 4294901760, %v1376_v44  ;;  %v10094_v42 = vsub.f32 %v8821_v4, %v1346_v5  ;;  %v1482_v30 = vand.u32 4294901760, %v1481_v36  ;;  %v11201_v19 = vand.u32 4294901760, %v10074_v61 }
 0x1a9   :  { %v10097_v62 = vand.u32 4294901760, %v1375_v45  ;;  %v10102_v22 = vsub.f32 %v8822_v50, %v1345_v18  ;;  %v6645_v28 = vpop.f32.mrb[8].mxu0  ;;  %v1472_v47 = vand.u32 4294901760, %v1471_v23  ;;  %v11203_v13 = vand.u32 4294901760, %v10082_v63 }
 0x1aa   :  { %11403 = vst [vmem:[#allocation12_spill] sm:$0xff] %v10094_v42  ;;  %v10106_v26 = vsub.f32 %v1376_v44, %v10089_v35  ;;  %v1378_v5 = vmul.f32 %v10094_v42, %v10094_v42  ;;  %v1348_v36 = vmul.f32 0.015625, %v6645_v28  ;;  %v1293_v4 = vpop.f32.mrb[9].mxu0  ;;  %v1501_v54 = vsub.f32 %v10074_v61, %v11201_v19  ;;  %v8823_v28 = vld [vmem:[%s11101_s2 + $0x48] sm:$0xff] }
 0x1ab   :  { %11404 = vst [vmem:[#allocation4_spill] sm:$0xff] %v10102_v22  ;;  %v10114_v25 = vsub.f32 %v1375_v45, %v10097_v62  ;;  %v1377_v18 = vmul.f32 %v10102_v22, %v10102_v22  ;;  %v1347_v23 = vmul.f32 0.015625, %v1293_v4  ;;  %6687 = vmatprep.mubr.f32.mxu1 %v1472_v47  ;;  %v1491_v44 = vsub.f32 %v10082_v63, %v11203_v13  ;;  %v8824_v47 = vld [vmem:[%s11101_s2 + $0x40] sm:$0xff]  ;;  %v11407_v22 = vld [vmem:[#allocation17_spill] sm:$0xff]  ;;  %v11408_v19 = vld [vmem:[#allocation19_spill] sm:$0xff] }
 0x1ac   :  { %v10121_v50 = vand.u32 4294901760, %v1378_v5  ;;  %v10126_v42 = vsub.f32 %v8823_v28, %v1348_v36  ;;  %6688 = vmatmul.mubr.f32.vlgmr.msra.gmra.mrb[0].mxu1 %v1482_v30  ;;  %v1502_v45 = vand.u32 4294901760, %v1501_v54  ;;  %v11409_v6 = vand.u32 4294901760, %v10106_v26 }
 0x1ad   :  { %v10129_v9 = vand.u32 4294901760, %v1377_v18  ;;  %v10134_v4 = vsub.f32 %v8824_v47, %v1347_v23  ;;  %v6648_v13 = vpop.f32.mrb[10].mxu0  ;;  %7890 = vmatpush3.bf16.msra.mxu1 %v11407_v22  ;;  %v1492_v48 = vand.u32 4294901760, %v1491_v44 }
 0x1ae   :  { %11405 = vst [vmem:[#allocation13_spill] sm:$0xff] %v10126_v42  ;;  %v10139_v36 = vsub.f32 %v1378_v5, %v10121_v50  ;;  %v1380_v54 = vmul.f32 %v10126_v42, %v10126_v42  ;;  %v1350_v30 = vmul.f32 0.015625, %v6648_v13  ;;  %v1305_v28 = vpop.f32.mrb[11].mxu0  ;;  %7892 = vmatprep.subr.bf16.mxu1 %v11408_v19  ;;  %v1521_v23 = vsub.f32 %v10106_v26, %v11409_v6 }
 0x1af   :  { %11406 = vst [vmem:[#allocation16_spill] sm:$0xff] %v10134_v4  ;;  %v10148_v47 = vsub.f32 %v1377_v18, %v10129_v9  ;;  %v1379_v44 = vmul.f32 %v10134_v4, %v10134_v4  ;;  %v1349_v39 = vmul.f32 0.015625, %v1305_v28  ;;  %6690 = vmatprep.mubr.f32.mxu1 %v1492_v48  ;;  %v11410_v5 = vand.u32 4294901760, %v10114_v25  ;;  %v8826_v48 = vld [vmem:[%s11101_s2 + $0x50] sm:$0xff] }
 0x1b0   :  { %v10155_v13 = vand.u32 4294901760, %v1380_v54  ;;  %v10160_v51 = vsub.f32 %v8825_v41, %v1350_v30  ;;  %6691 = vmatmul.mubr.f32.gmra.mrb[2].mxu1 %v1502_v45  ;;  %v1522_v6 = vand.u32 4294901760, %v1521_v23  ;;  %v11216_v18 = vand.u32 4294901760, %v10139_v36 }
 0x1b1   :  { %v1511_v42 = vsub.f32 %v10114_v25, %v11410_v5  ;;  %v10163_v22 = vand.u32 4294901760, %v1379_v44  ;;  %v10168_v28 = vsub.f32 %v8826_v48, %v1349_v39  ;;  %v6651_v5 = vpop.f32.mrb[12].mxu0  ;;  %7894 = vmatpush3.bf16.msra.mxu1 %v11408_v19  ;;  %v8827_v19 = vld [vmem:[%s11101_s2 + $0x68] sm:$0xff] }
 0x1b2   :  { %11411 = vst [vmem:[#allocation6_spill] sm:$0xff] %v10160_v51  ;;  %v10173_v41 = vsub.f32 %v1380_v54, %v10155_v13  ;;  %v1382_v45 = vmul.f32 %v10160_v51, %v10160_v51  ;;  %v1352_v30 = vmul.f32 0.015625, %v6651_v5  ;;  %v1317_v23 = vpop.f32.mrb[13].mxu0  ;;  %7896 = vmatprep.subr.bf16.mxu1 %v11371_v1  ;;  %v1541_v39 = vsub.f32 %v10139_v36, %v11216_v18 }
 0x1b3   :  { %11412 = vst [vmem:[#allocation18_spill] sm:$0xff] %v10168_v28  ;;  %v1512_v4 = vand.u32 4294901760, %v1511_v42  ;;  %v10182_v48 = vsub.f32 %v1379_v44, %v10163_v22  ;;  %v1381_v42 = vmul.f32 %v10168_v28, %v10168_v28  ;;  %v1351_v24 = vmul.f32 0.015625, %v1317_v23 }
 0x1b4   :  { %v11413_v54 = vand.u32 4294901760, %v10148_v47  ;;  %v10189_v5 = vand.u32 4294901760, %v1382_v45  ;;  %v10194_v14 = vsub.f32 %v8827_v19, %v1352_v30  ;;  %v1542_v44 = vand.u32 4294901760, %v1541_v39 }
 0x1b5   :  { %6693 = vmatprep.mubr.f32.mxu1 %v1512_v4  ;;  %v11223_v18 = vand.u32 4294901760, %v10173_v41  ;;  %v10197_v56 = vand.u32 4294901760, %v1381_v42  ;;  %v8828_v4 = vld [vmem:[%s11101_s2 + $0x60] sm:$0xff]  ;;  %7898 = vmatpush3.bf16.msra.mxu1 %v11371_v1  ;;  %v8829_v1 = vld [vmem:[%s11101_s2 + $0x78] sm:$0xff] }
 0x1b6   :  { %v1531_v51 = vsub.f32 %v10148_v47, %v11413_v54  ;;  %11414 = vst [vmem:[#allocation20_spill] sm:$0xff] %v10194_v14  ;;  %6694 = vmatmul.mubr.f32.gmra.mrb[4].mxu1 %v1522_v6  ;;  %v10202_v23 = vsub.f32 %v8828_v4, %v1351_v24  ;;  %v6654_v54 = vpop.f32.mrb[14].mxu0  ;;  %v10207_v19 = vsub.f32 %v1382_v45, %v10189_v5  ;;  %v11416_v45 = vand.u32 4294901760, %v10182_v48 }
 0x1b7   :  { %v1384_v6 = vmul.f32 %v10194_v14, %v10194_v14  ;;  %v1354_v30 = vmul.f32 0.015625, %v6654_v54  ;;  %v1329_v39 = vpop.f32.mrb[15].mxu0  ;;  %7900 = vmatprep.subr.bf16.mxu1 %v9338_v53  ;;  %v1561_v24 = vsub.f32 %v10173_v41, %v11223_v18  ;;  %v10216_v4 = vsub.f32 %v1381_v42, %v10197_v56 }
 0x1b8   :  { %11415 = vst [vmem:[#allocation8_spill] sm:$0xff] %v10202_v23  ;;  %v1532_v28 = vand.u32 4294901760, %v1531_v51  ;;  %v1383_v51 = vmul.f32 %v10202_v23, %v10202_v23  ;;  %v1353_v8 = vmul.f32 0.015625, %v1329_v39  ;;  %v1551_v14 = vsub.f32 %v10182_v48, %v11416_v45 }
 0x1b9   :  { %v10223_v54 = vand.u32 4294901760, %v1384_v6  ;;  %v10228_v38 = vsub.f32 %v8829_v1, %v1354_v30  ;;  %v11227_v42 = vand.u32 4294901760, %v10207_v19  ;;  %7902 = vmatpush3.bf16.msra.mxu1 %v9338_v53  ;;  %v11230_v23 = vand.u32 4294901760, %v10216_v4 }
 0x1ba   :  { %6696 = vmatprep.mubr.f32.mxu1 %v1532_v28  ;;  %v10231_v18 = vand.u32 4294901760, %v1383_v51  ;;  %v8830_v28 = vld [vmem:[%s11101_s2 + $0x70] sm:$0xff]  ;;  %v1552_v45 = vand.u32 4294901760, %v1551_v14  ;;  %7904 = vmatprep.subr.bf16.mxu1 %v9347_v55 }
 0x1bb   :  { %11417 = vst [vmem:[#allocation21_spill] sm:$0xff] %v10228_v38  ;;  %6697 = vmatmul.mubr.f32.gmra.mrb[6].mxu1 %v1542_v44  ;;  %v10236_v39 = vsub.f32 %v8830_v28, %v1353_v8  ;;  %v10241_v10 = vsub.f32 %v1384_v6, %v10223_v54  ;;  %v1386_v1 = vmul.f32 %v10228_v38, %v10228_v38  ;;  %v1562_v44 = vand.u32 4294901760, %v1561_v24 }
 0x1bc   :  { %v1581_v30 = vsub.f32 %v10207_v19, %v11227_v42  ;;  %v10250_v8 = vsub.f32 %v1383_v51, %v10231_v18  ;;  %6699 = vmatprep.mubr.f32.mxu1 %v1552_v45  ;;  %v1571_v6 = vsub.f32 %v10216_v4, %v11230_v23 }
 0x1bd   :  { %11418 = vst [vmem:[#allocation22_spill] sm:$0xff] %v10236_v39  ;;  %v1385_v14 = vmul.f32 %v10236_v39, %v10236_v39  ;;  %v10257_v28 = vand.u32 4294901760, %v1386_v1  ;;  %v11234_v24 = vand.u32 4294901760, %v10241_v10  ;;  %7906 = vmatpush3.bf16.msra.mxu1 %v9347_v55 }
 0x1be   :  { %v1572_v42 = vand.u32 4294901760, %v1571_v6  ;;  %v1590_v51 = vand.u32 4294901760, %v10250_v8  ;;  %v1582_v45 = vand.u32 4294901760, %v1581_v30  ;;  %7908 = vmatprep.subr.bf16.mxu1 %v9413_v16 }
 0x1bf   :  { %6700 = vmatmul.mubr.f32.gmra.mrb[8].mxu1 %v1562_v44  ;;  %v10260_v38 = vand.u32 4294901760, %v1385_v14  ;;  %v10265_v53 = vsub.f32 %v1386_v1, %v10257_v28  ;;  %v1601_v23 = vsub.f32 %v10241_v10, %v11234_v24 }
 0x1c0   :  { %6702 = vmatprep.mubr.f32.mxu1 %v1572_v42  ;;  %v1591_v6 = vsub.f32 %v10250_v8, %v1590_v51 }
 0x1c1   :  { %v10272_v44 = vsub.f32 %v1385_v14, %v10260_v38  ;;  %v1620_v39 = vand.u32 4294901760, %v10265_v53  ;;  %7910 = vmatpush3.bf16.msra.mxu1 %v9413_v16  ;;  %v1602_v55 = vand.u32 4294901760, %v1601_v23  ;;  %v11420_v23 = vand.u32 4294901760, %v10047_v60 }
 0x1c2   :  { %v1592_v1 = vand.u32 4294901760, %v1591_v6  ;;  %7912 = vmatprep.subr.bf16.mxu1 %v9431_v3  ;;  %v11422_v6 = vand.u32 4294901760, %v10074_v61 }
 0x1c3   :  { %6703 = vmatmul.mubr.f32.gmra.mrb[10].mxu1 %v1582_v45  ;;  %v1610_v30 = vand.u32 4294901760, %v10272_v44  ;;  %v1621_v14 = vsub.f32 %v10265_v53, %v1620_v39 }
 0x1c4   :  { %6705 = vmatprep.mubr.f32.mxu1 %v1592_v1  ;;  %v11423_v1 = vand.u32 4294901760, %v10114_v25 }
 0x1c5   :  { %v1611_v42 = vsub.f32 %v10272_v44, %v1610_v30  ;;  %7914 = vmatpush3.bf16.msra.mxu1 %v9431_v3  ;;  %v1622_v24 = vand.u32 4294901760, %v1621_v14  ;;  %v11427_v14 = vld [vmem:[#allocation29_spill] sm:$0xff] }
 0x1c6   :  { %7916 = vmatprep.subr.bf16.mxu1 %v9438_v11 }
 0x1c7   :  { %6706 = vmatmul.mubr.f32.gmra.mrb[12].mxu1 %v1602_v55  ;;  %v1612_v45 = vand.u32 4294901760, %v1611_v42  ;;  %v11419_v55 = vand.u32 4294901760, %v10055_v7  ;;  %v11430_v42 = vld [vmem:[#allocation30_spill] sm:$0xff] }
 0x1c9   :  { %6708 = vmatprep.mubr.f32.mxu1 %v1612_v45  ;;  %7918 = vmatpush3.bf16.msra.mxu1 %v9438_v11  ;;  %v11433_v45 = vld [vmem:[#allocation31_spill] sm:$0xff] }
 0x1ca   :  { %7920 = vmatprep.subr.bf16.mxu1 %v9444_v43 }
 0x1cb   :  { %6709 = vmatmul.mubr.f32.gmra.mrb[14].mxu1 %v1622_v24  ;;  %v11421_v24 = vand.u32 4294901760, %v10082_v63 }
 0x1cc   :  { %6743 = vmatprep.mubr.f32.mxu1 %v10039_v31 }
 0x1cf   :  { %6744 = vmatmul.mubr.f32.vlgmr.msra.gmra.mrb[0].mxu1 %v10032_v15 }
 0x1d0   :  { %6746 = vmatprep.mubr.f32.mxu1 %v10065_v0  ;;  %7922 = vmatpush3.bf16.msra.mxu1 %v9444_v43 }
 0x1d1   :  { %7924 = vmatprep.subr.bf16.mxu1 %v9451_v58 }
 0x1d3   :  { %6747 = vmatmul.mubr.f32.gmra.mrb[2].mxu1 %v10057_v29 }
 0x1d4   :  { %6749 = vmatprep.mubr.f32.mxu1 %v10097_v62  ;;  %7926 = vmatpush3.bf16.msra.mxu1 %v9451_v58 }
 0x1d5   :  { %7928 = vmatprep.subr.bf16.mxu1 %v9459_v33 }
 0x1d7   :  { %6750 = vmatmul.mubr.f32.gmra.mrb[4].mxu1 %v10089_v35 }
 0x1d8   :  { %6752 = vmatprep.mubr.f32.mxu1 %v10129_v9  ;;  %7930 = vmatpush3.bf16.msra.mxu1 %v9459_v33 }
 0x1d9   :  { %7932 = vmatprep.subr.bf16.mxu1 %v9467_v34 }
 0x1db   :  { %6753 = vmatmul.mubr.f32.gmra.mrb[6].mxu1 %v10121_v50 }
 0x1dc   :  { %6755 = vmatprep.mubr.f32.mxu1 %v10163_v22  ;;  %7934 = vmatpush3.bf16.msra.mxu1 %v9467_v34 }
 0x1dd   :  { %7936 = vmatprep.subr.bf16.mxu1 %v9475_v40 }
 0x1df   :  { %6756 = vmatmul.mubr.f32.gmra.mrb[8].mxu1 %v10155_v13 }
 0x1e0   :  { %6758 = vmatprep.mubr.f32.mxu1 %v10197_v56  ;;  %7938 = vmatpush3.bf16.msra.mxu1 %v9475_v40 }
 0x1e1   :  { %7940 = vmatprep.subr.bf16.mxu1 %v9483_v49 }
 0x1e3   :  { %6759 = vmatmul.mubr.f32.gmra.mrb[10].mxu1 %v10189_v5 }
 0x1e4   :  { %6761 = vmatprep.mubr.f32.mxu1 %v10231_v18  ;;  %7942 = vmatpush3.bf16.msra.mxu1 %v9483_v49 }
 0x1e5   :  { %7944 = vmatprep.subr.bf16.mxu1 %v9491_v57 }
 0x1e7   :  { %6762 = vmatmul.mubr.f32.gmra.mrb[12].mxu1 %v10223_v54 }
 0x1e8   :  { %6764 = vmatprep.mubr.f32.mxu1 %v10260_v38  ;;  %7946 = vmatpush3.bf16.msra.mxu1 %v9491_v57 }
 0x1e9   :  { %7948 = vmatprep.subr.bf16.mxu1 %v9499_v59 }
 0x1eb   :  { %6765 = vmatmul.mubr.f32.gmra.mrb[14].mxu1 %v10257_v28 }
 0x1ec   :  { %7950 = vmatpush3.bf16.msra.mxu1 %v9499_v59  ;;  %6799 = vmatprep.mubr.f32.mxu1 %v10055_v7  ;;  %v11424_v7 = vld [vmem:[#allocation28_spill] sm:$0xff] }
 0x1ed   :  { %7952 = vmatprep.subr.bf16.mxu1 %v11330_v17 }
 0x1ef   :  { %6800 = vmatmul.mubr.f32.vlgmr.msra.gmra.mrb[0].mxu1 %v10047_v60  ;;  %v11425_v60 = vand.u32 4294901760, %v10106_v26 }
 0x1f0   :  { %6802 = vmatprep.mubr.f32.mxu1 %v10082_v63  ;;  %7954 = vmatpush3.bf16.msra.mxu1 %v11330_v17  ;;  %v11426_v63 = vand.u32 4294901760, %v10148_v47 }
 0x1f1   :  { %7956 = vmatprep.subr.bf16.mxu1 %v11333_v20 }
 0x1f3   :  { %6803 = vmatmul.mubr.f32.gmra.mrb[2].mxu1 %v10074_v61  ;;  %v11428_v61 = vand.u32 4294901760, %v10139_v36 }
 0x1f4   :  { %6805 = vmatprep.mubr.f32.mxu1 %v10114_v25  ;;  %7958 = vmatpush3.bf16.msra.mxu1 %v11333_v20  ;;  %v11429_v25 = vand.u32 4294901760, %v10182_v48 }
 0x1f5   :  { %7960 = vmatprep.subr.bf16.mxu1 %v11336_v2 }
 0x1f7   :  { %6806 = vmatmul.mubr.f32.gmra.mrb[4].mxu1 %v10106_v26  ;;  %v11431_v26 = vand.u32 4294901760, %v10173_v41 }
 0x1f8   :  { %6808 = vmatprep.mubr.f32.mxu1 %v10148_v47  ;;  %7962 = vmatpush3.bf16.msra.mxu1 %v11336_v2  ;;  %v11432_v47 = vand.u32 4294901760, %v10216_v4 }
 0x1f9   :  { %7964 = vmatprep.subr.bf16.mxu1 %v11339_v32 }
 0x1fb   :  { %6809 = vmatmul.mubr.f32.gmra.mrb[6].mxu1 %v10139_v36  ;;  %v11434_v36 = vand.u32 4294901760, %v10207_v19 }
 0x1fc   :  { %6811 = vmatprep.mubr.f32.mxu1 %v10182_v48  ;;  %7966 = vmatpush3.bf16.msra.mxu1 %v11339_v32  ;;  %v11435_v48 = vld [vmem:[#allocation32_spill] sm:$0xff] }
 0x1fd   :  { %7968 = vmatprep.subr.bf16.mxu1 %v11342_v21 }
 0x1ff   :  { %6812 = vmatmul.mubr.f32.gmra.mrb[8].mxu1 %v10173_v41  ;;  %v11436_v41 = vand.u32 4294901760, %v10241_v10 }
 0x200   :  { %6814 = vmatprep.mubr.f32.mxu1 %v10216_v4  ;;  %7970 = vmatpush3.bf16.msra.mxu1 %v11342_v21  ;;  %v11437_v4 = vld [vmem:[#allocation33_spill] sm:$0xff] }
 0x201   :  { %7972 = vmatprep.subr.bf16.mxu1 %v11345_v52 }
 0x203   :  { %6815 = vmatmul.mubr.f32.gmra.mrb[10].mxu1 %v10207_v19 }
 0x204   :  { %6817 = vmatprep.mubr.f32.mxu1 %v10250_v8  ;;  %7974 = vmatpush3.bf16.msra.mxu1 %v11345_v52 }
 0x205   :  { %7976 = vmatprep.subr.bf16.mxu1 %v11374_v37 }
 0x207   :  { %6818 = vmatmul.mubr.f32.gmra.mrb[12].mxu1 %v10241_v10 }
 0x208   :  { %6820 = vmatprep.mubr.f32.mxu1 %v10272_v44  ;;  %7978 = vmatpush3.bf16.msra.mxu1 %v11374_v37 }
 0x209   :  { %7980 = vmatprep.subr.bf16.mxu1 %v11375_v27 }
 0x20b   :  { %6821 = vmatmul.mubr.f32.gmra.mrb[14].mxu1 %v10265_v53 }
 0x20c   :  { %7982 = vmatpush3.bf16.msra.mxu1 %v11375_v27  ;;  %6855 = vmatprep.mubr.f32.mxu1 %v11419_v55 }
 0x20d   :  { %7984 = vmatprep.subr.bf16.mxu1 %v11377_v46 }
 0x20f   :  { %6856 = vmatmul.mubr.f32.vlgmr.msra.gmra.mrb[0].mxu1 %v11420_v23 }
 0x210   :  { %6858 = vmatprep.mubr.f32.mxu1 %v11421_v24  ;;  %7986 = vmatpush3.bf16.msra.mxu1 %v11377_v46 }
 0x211   :  { %7988 = vmatprep.subr.bf16.mxu1 %v11380_v12 }
 0x213   :  { %6859 = vmatmul.mubr.f32.gmra.mrb[2].mxu1 %v11422_v6 }
 0x214   :  { %6861 = vmatprep.mubr.f32.mxu1 %v11423_v1  ;;  %7990 = vmatpush3.bf16.msra.mxu1 %v11380_v12 }
 0x215   :  { %7992 = vmatprep.subr.bf16.mxu1 %v11424_v7 }
 0x217   :  { %6862 = vmatmul.mubr.f32.gmra.mrb[4].mxu1 %v11425_v60 }
 0x218   :  { %6864 = vmatprep.mubr.f32.mxu1 %v11426_v63  ;;  %7994 = vmatpush3.bf16.msra.mxu1 %v11424_v7 }
 0x219   :  { %7996 = vmatprep.subr.bf16.mxu1 %v11427_v14 }
 0x21b   :  { %6865 = vmatmul.mubr.f32.gmra.mrb[6].mxu1 %v11428_v61 }
 0x21c   :  { %6867 = vmatprep.mubr.f32.mxu1 %v11429_v25  ;;  %7998 = vmatpush3.bf16.msra.mxu1 %v11427_v14 }
 0x21d   :  { %8000 = vmatprep.subr.bf16.mxu1 %v11430_v42 }
 0x21f   :  { %6868 = vmatmul.mubr.f32.gmra.mrb[8].mxu1 %v11431_v26  ;;  %v8835_v26 = vld [vmem:[%s11102_s3 + $0x28] sm:$0xff] }
 0x220   :  { %6870 = vmatprep.mubr.f32.mxu1 %v11432_v47  ;;  %8002 = vmatpush3.bf16.msra.mxu1 %v11430_v42 }
 0x221   :  { %8004 = vmatprep.subr.bf16.mxu1 %v11433_v45 }
 0x223   :  { %6871 = vmatmul.mubr.f32.gmra.mrb[10].mxu1 %v11434_v36 }
 0x224   :  { %6873 = vmatprep.mubr.f32.mxu1 %v1590_v51  ;;  %8006 = vmatpush3.bf16.msra.mxu1 %v11433_v45 }
 0x225   :  { %8008 = vmatprep.subr.bf16.mxu1 %v11435_v48 }
 0x227   :  { %6874 = vmatmul.mubr.f32.gmra.mrb[12].mxu1 %v11436_v41  ;;  %v8836_v41 = vld [vmem:[%s11102_s3 + $0x20] sm:$0xff] }
 0x228   :  { %6876 = vmatprep.mubr.f32.mxu1 %v1610_v30  ;;  %8010 = vmatpush3.bf16.msra.mxu1 %v11435_v48  ;;  %v8834_v30 = vld [vmem:[%s11102_s3 + $0x10] sm:$0xff] }
 0x229   :  { %8012 = vmatprep.subr.bf16.mxu1 %v11437_v4 }
 0x22b   :  { %6877 = vmatmul.mubr.f32.gmra.mrb[14].mxu1 %v1620_v39 }
 0x22c   :  { %8014 = vmatpush3.bf16.msra.mxu1 %v11437_v4  ;;  %6911 = vmatprep.mubr.f32.mxu1 %v10039_v31 }
 0x22d   :  { %8016 = vmatprep.subr.bf16.mxu1 %v11330_v17 }
 0x22f   :  { %6912 = vmatmul.mubr.f32.vlgmr.msra.gmra.mrb[0].mxu1 %v10032_v15 }
 0x230   :  { %6914 = vmatprep.mubr.f32.mxu1 %v10065_v0  ;;  %8018 = vmatpush3.bf16.msra.mxu1 %v11330_v17 }
 0x231   :  { %8020 = vmatprep.subr.bf16.mxu1 %v11333_v20 }
 0x233   :  { %6915 = vmatmul.mubr.f32.gmra.mrb[2].mxu1 %v10057_v29 }
 0x234   :  { %6917 = vmatprep.mubr.f32.mxu1 %v10097_v62  ;;  %8022 = vmatpush3.bf16.msra.mxu1 %v11333_v20 }
 0x235   :  { %8024 = vmatprep.subr.bf16.mxu1 %v11336_v2 }
 0x237   :  { %6918 = vmatmul.mubr.f32.gmra.mrb[4].mxu1 %v10089_v35 }
 0x238   :  { %6920 = vmatprep.mubr.f32.mxu1 %v10129_v9  ;;  %8026 = vmatpush3.bf16.msra.mxu1 %v11336_v2 }
 0x239   :  { %8028 = vmatprep.subr.bf16.mxu1 %v11339_v32 }
 0x23b   :  { %6921 = vmatmul.mubr.f32.gmra.mrb[6].mxu1 %v10121_v50 }
 0x23c   :  { %6923 = vmatprep.mubr.f32.mxu1 %v10163_v22  ;;  %8030 = vmatpush3.bf16.msra.mxu1 %v11339_v32 }
 0x23d   :  { %8032 = vmatprep.subr.bf16.mxu1 %v11342_v21 }
 0x23f   :  { %6924 = vmatmul.mubr.f32.gmra.mrb[8].mxu1 %v10155_v13 }
 0x240   :  { %6926 = vmatprep.mubr.f32.mxu1 %v10197_v56  ;;  %8034 = vmatpush3.bf16.msra.mxu1 %v11342_v21 }
 0x241   :  { %8036 = vmatprep.subr.bf16.mxu1 %v11345_v52 }
 0x243   :  { %6927 = vmatmul.mubr.f32.gmra.mrb[10].mxu1 %v10189_v5 }
 0x244   :  { %6929 = vmatprep.mubr.f32.mxu1 %v10231_v18  ;;  %8038 = vmatpush3.bf16.msra.mxu1 %v11345_v52 }
 0x245   :  { %8040 = vmatprep.subr.bf16.mxu1 %v11374_v37 }
 0x247   :  { %6930 = vmatmul.mubr.f32.gmra.mrb[12].mxu1 %v10223_v54 }
 0x248   :  { %6932 = vmatprep.mubr.f32.mxu1 %v10260_v38  ;;  %8042 = vmatpush3.bf16.msra.mxu1 %v11374_v37 }
 0x249   :  { %8044 = vmatprep.subr.bf16.mxu1 %v11375_v27 }
 0x24b   :  { %6933 = vmatmul.mubr.f32.gmra.mrb[14].mxu1 %v10257_v28 }
 0x24c   :  { %8046 = vmatpush3.bf16.msra.mxu1 %v11375_v27  ;;  %6967 = vmatprep.mubr.f32.mxu1 %v10039_v31 }
 0x24d   :  { %8240 = vmatprep.subr.bf16.mxu1 %v11330_v17 }
 0x24f   :  { %6968 = vmatmul.mubr.f32.vlgmr.msra.gmra.mrb[0].mxu1 %v10032_v15 }
 0x250   :  { %6970 = vmatprep.mubr.f32.mxu1 %v10065_v0  ;;  %8242 = vmatpush3.bf16.msra.mxu1 %v11330_v17 }
 0x251   :  { %8244 = vmatprep.subr.bf16.mxu1 %v11333_v20 }
 0x253   :  { %6971 = vmatmul.mubr.f32.gmra.mrb[2].mxu1 %v10057_v29  ;;  %v8831_v29 = vld [vmem:[%s11102_s3 + $0x8] sm:$0xff] }
 0x254   :  { %6973 = vmatprep.mubr.f32.mxu1 %v10097_v62  ;;  %8246 = vmatpush3.bf16.msra.mxu1 %v11333_v20 }
 0x255   :  { %8248 = vmatprep.subr.bf16.mxu1 %v11336_v2 }
 0x257   :  { %6974 = vmatmul.mubr.f32.gmra.mrb[4].mxu1 %v10089_v35 }
 0x258   :  { %6976 = vmatprep.mubr.f32.mxu1 %v10129_v9  ;;  %8250 = vmatpush3.bf16.msra.mxu1 %v11336_v2  ;;  %v8832_v9 = vld [vmem:[%s11102_s3] sm:$0xff] }
 0x259   :  { %8252 = vmatprep.subr.bf16.mxu1 %v11339_v32  ;;  %v7305_v53 = vpop.f32.mrb[16].mxu0 }
 0x25a   :  { %v4096_v10 = vmul.f32 0.015625, %v7305_v53  ;;  %v4001_v15 = vpop.f32.mrb[17].mxu0 }
 0x25b   :  { %6977 = vmatmul.mubr.f32.gmra.mrb[6].mxu1 %v10121_v50  ;;  %v4095_v31 = vmul.f32 0.015625, %v4001_v15 }
 0x25c   :  { %6979 = vmatprep.mubr.f32.mxu1 %v10163_v22  ;;  %8254 = vmatpush3.bf16.msra.mxu1 %v11339_v32  ;;  %v10455_v0 = vsub.f32 %v8831_v29, %v4096_v10 }
 0x25d   :  { %8256 = vmatprep.subr.bf16.mxu1 %v11342_v21  ;;  %v10461_v35 = vsub.f32 %v8832_v9, %v4095_v31  ;;  %v7308_v62 = vpop.f32.mrb[18].mxu0 }
 0x25e   :  { %11438 = vst [vmem:[#allocation11_spill] sm:$0xff] %v10455_v0  ;;  %v4128_v22 = vmul.f32 %v10455_v0, %v10455_v0  ;;  %v4098_v50 = vmul.f32 0.015625, %v7308_v62  ;;  %v4013_v19 = vpop.f32.mrb[19].mxu0 }
 0x25f   :  { %6980 = vmatmul.mubr.f32.gmra.mrb[8].mxu1 %v10155_v13  ;;  %11439 = vst [vmem:[#allocation14_spill] sm:$0xff] %v10461_v35  ;;  %v4127_v13 = vmul.f32 %v10461_v35, %v10461_v35  ;;  %v4097_v39 = vmul.f32 0.015625, %v4013_v19 }
 0x260   :  { %6982 = vmatprep.mubr.f32.mxu1 %v10197_v56  ;;  %8258 = vmatpush3.bf16.msra.mxu1 %v11342_v21  ;;  %v10470_v8 = vand.u32 4294901760, %v4128_v22  ;;  %v8833_v56 = vld [vmem:[%s11102_s3 + $0x18] sm:$0xff] }
 0x261   :  { %8260 = vmatprep.subr.bf16.mxu1 %v11345_v52  ;;  %v10475_v51 = vsub.f32 %v8833_v56, %v4098_v50  ;;  %v10478_v44 = vand.u32 4294901760, %v4127_v13  ;;  %v10483_v55 = vsub.f32 %v8834_v30, %v4097_v39  ;;  %v7311_v23 = vpop.f32.mrb[20].mxu0  ;;  %v8837_v56 = vld [vmem:[%s11102_s3 + $0x38] sm:$0xff] }
 0x262   :  { %v10488_v24 = vsub.f32 %v4128_v22, %v10470_v8  ;;  %v4025_v1 = vpop.f32.mrb[21].mxu0 }
 0x263   :  { %11440 = vst [vmem:[#allocation15_spill] sm:$0xff] %v10475_v51  ;;  %6983 = vmatmul.mubr.f32.gmra.mrb[10].mxu1 %v10189_v5  ;;  %11441 = vst [vmem:[#allocation26_spill] sm:$0xff] %v10483_v55  ;;  %v4130_v6 = vmul.f32 %v10475_v51, %v10475_v51  ;;  %v4100_v5 = vmul.f32 0.015625, %v7311_v23  ;;  %v10494_v60 = vsub.f32 %v4127_v13, %v10478_v44 }
 0x264   :  { %6985 = vmatprep.mubr.f32.mxu1 %v10231_v18  ;;  %8262 = vmatpush3.bf16.msra.mxu1 %v11345_v52  ;;  %v4129_v63 = vmul.f32 %v10483_v55, %v10483_v55  ;;  %v4099_v18 = vmul.f32 0.015625, %v4025_v1  ;;  %v11235_v61 = vand.u32 4294901760, %v10488_v24 }
 0x265   :  { %8264 = vmatprep.subr.bf16.mxu1 %v11374_v37  ;;  %v10499_v25 = vand.u32 4294901760, %v4130_v6  ;;  %v10504_v47 = vsub.f32 %v8835_v26, %v4100_v5  ;;  %v7314_v10 = vpop.f32.mrb[22].mxu0  ;;  %v11237_v15 = vand.u32 4294901760, %v10494_v60  ;;  %v8838_v5 = vld [vmem:[%s11102_s3 + $0x30] sm:$0xff] }
 0x266   :  { %v10507_v36 = vand.u32 4294901760, %v4129_v63  ;;  %v10512_v53 = vsub.f32 %v8836_v41, %v4099_v18  ;;  %v4237_v31 = vsub.f32 %v10488_v24, %v11235_v61  ;;  %v4102_v9 = vmul.f32 0.015625, %v7314_v10  ;;  %v4037_v62 = vpop.f32.mrb[23].mxu0 }
 0x267   :  { %11442 = vst [vmem:[#allocation27_spill] sm:$0xff] %v10504_v47  ;;  %6986 = vmatmul.mubr.f32.gmra.mrb[12].mxu1 %v10223_v54  ;;  %v10521_v54 = vsub.f32 %v4130_v6, %v10499_v25  ;;  %v4132_v29 = vmul.f32 %v10504_v47, %v10504_v47  ;;  %v4101_v50 = vmul.f32 0.015625, %v4037_v62  ;;  %v4227_v19 = vsub.f32 %v10494_v60, %v11237_v15 }
 0x268   :  { %11443 = vst [vmem:[#allocation34_spill] sm:$0xff] %v10512_v53  ;;  %6988 = vmatprep.mubr.f32.mxu1 %v10260_v38  ;;  %8266 = vmatpush3.bf16.msra.mxu1 %v11374_v37  ;;  %v10527_v38 = vsub.f32 %v4129_v63, %v10507_v36  ;;  %v4131_v22 = vmul.f32 %v10512_v53, %v10512_v53  ;;  %v4238_v13 = vand.u32 4294901760, %v4237_v31 }
 0x269   :  { %8268 = vmatprep.subr.bf16.mxu1 %v11375_v27  ;;  %v10534_v39 = vand.u32 4294901760, %v4132_v29  ;;  %v10539_v30 = vsub.f32 %v8837_v56, %v4102_v9  ;;  %v11236_v23 = vand.u32 4294901760, %v10521_v54  ;;  %v10548_v1 = vsub.f32 %v8838_v5, %v4101_v50  ;;  %v7317_v63 = vpop.f32.mrb[24].mxu0  ;;  %v11446_v9 = vld [vmem:[#allocation17_spill] sm:$0xff] }
 0x26a   :  { %v10543_v6 = vand.u32 4294901760, %v4131_v22  ;;  %v4228_v18 = vand.u32 4294901760, %v4227_v19  ;;  %v11238_v26 = vand.u32 4294901760, %v10527_v38  ;;  %v4104_v10 = vmul.f32 0.015625, %v7317_v63  ;;  %v4049_v31 = vpop.f32.mrb[25].mxu0  ;;  %v8839_v63 = vld [vmem:[%s11102_s3 + $0x48] sm:$0xff] }
 0x26b   :  { %11444 = vst [vmem:[#allocation35_spill] sm:$0xff] %v10539_v30  ;;  %6989 = vmatmul.mubr.f32.gmra.mrb[14].mxu1 %v10257_v28  ;;  %11445 = vst [vmem:[#allocation36_spill] sm:$0xff] %v10548_v1  ;;  %v10553_v41 = vsub.f32 %v4132_v29, %v10534_v39  ;;  %v4134_v28 = vmul.f32 %v10539_v30, %v10539_v30  ;;  %v4257_v62 = vsub.f32 %v10521_v54, %v11236_v23  ;;  %v11449_v23 = vld [vmem:[#allocation19_spill] sm:$0xff] }
 0x26c   :  { %8270 = vmatpush3.bf16.msra.mxu1 %v11375_v27  ;;  %v10562_v50 = vsub.f32 %v4131_v22, %v10543_v6  ;;  %v4133_v19 = vmul.f32 %v10548_v1, %v10548_v1  ;;  %v4103_v56 = vmul.f32 0.015625, %v4049_v31  ;;  %7359 = vmatprep.mubr.f32.mxu1 %v4228_v18  ;;  %v4247_v29 = vsub.f32 %v10527_v38, %v11238_v26  ;;  %v8840_v18 = vld [vmem:[%s11102_s3 + $0x40] sm:$0xff] }
 0x26d   :  { %8272 = vmatprep.subr.bf16.mxu1 %v11446_v9  ;;  %v10569_v5 = vand.u32 4294901760, %v4134_v28  ;;  %v10574_v61 = vsub.f32 %v8839_v63, %v4104_v10  ;;  %v4258_v22 = vand.u32 4294901760, %v4257_v62  ;;  %v7320_v26 = vpop.f32.mrb[26].mxu0  ;;  %v11450_v53 = vand.u32 4294901760, %v10553_v41 }
 0x26e   :  { %v10577_v15 = vand.u32 4294901760, %v4133_v19  ;;  %v10582_v31 = vsub.f32 %v8840_v18, %v4103_v56  ;;  %v4248_v1 = vand.u32 4294901760, %v4247_v29  ;;  %v11245_v30 = vand.u32 4294901760, %v10562_v50  ;;  %v4061_v63 = vpop.f32.mrb[27].mxu0 }
 0x26f   :  { %11447 = vst [vmem:[#allocation17_spill] sm:$0xff] %v10574_v61  ;;  %7360 = vmatmul.mubr.f32.vlgmr.msra.gmra.mrb[16].mxu1 %v4238_v13  ;;  %v10587_v10 = vsub.f32 %v4134_v28, %v10569_v5  ;;  %v4136_v13 = vmul.f32 %v10574_v61, %v10574_v61  ;;  %v4106_v62 = vmul.f32 0.015625, %v7320_v26  ;;  %v4277_v56 = vsub.f32 %v10553_v41, %v11450_v53  ;;  %v8841_v61 = vld [vmem:[%s11102_s3 + $0x58] sm:$0xff] }
 0x270   :  { %11448 = vst [vmem:[#allocation37_spill] sm:$0xff] %v10582_v31  ;;  %8274 = vmatpush3.bf16.msra.mxu1 %v11446_v9  ;;  %v10596_v18 = vsub.f32 %v4133_v19, %v10577_v15  ;;  %v4135_v9 = vmul.f32 %v10582_v31, %v10582_v31  ;;  %v4105_v29 = vmul.f32 0.015625, %v4061_v63  ;;  %7362 = vmatprep.mubr.f32.mxu1 %v4248_v1  ;;  %v8842_v1 = vld [vmem:[%s11102_s3 + $0x50] sm:$0xff]  ;;  %v11453_v19 = vld [vmem:[#allocation23_spill] sm:$0xff] }
 0x271   :  { %8276 = vmatprep.subr.bf16.mxu1 %v11449_v23  ;;  %v4267_v28 = vsub.f32 %v10562_v50, %v11245_v30  ;;  %v10603_v26 = vand.u32 4294901760, %v4136_v13  ;;  %v10608_v47 = vsub.f32 %v8841_v61, %v4106_v62  ;;  %v4278_v53 = vand.u32 4294901760, %v4277_v56  ;;  %v7323_v30 = vpop.f32.mrb[28].mxu0 }
 0x272   :  { %v10611_v55 = vand.u32 4294901760, %v4135_v9  ;;  %v10616_v63 = vsub.f32 %v8842_v1, %v4105_v29  ;;  %v11252_v51 = vand.u32 4294901760, %v10596_v18  ;;  %v4108_v62 = vmul.f32 0.015625, %v7323_v30  ;;  %v4073_v56 = vpop.f32.mrb[29].mxu0 }
 0x273   :  { %11451 = vst [vmem:[#allocation19_spill] sm:$0xff] %v10608_v47  ;;  %7363 = vmatmul.mubr.f32.gmra.mrb[18].mxu1 %v4258_v22  ;;  %v4268_v31 = vand.u32 4294901760, %v4267_v28  ;;  %v10621_v61 = vsub.f32 %v4136_v13, %v10603_v26  ;;  %v4138_v22 = vmul.f32 %v10608_v47, %v10608_v47  ;;  %v11454_v35 = vand.u32 4294901760, %v10587_v10  ;;  %v8843_v47 = vld [vmem:[%s11102_s3 + $0x68] sm:$0xff] }
 0x274   :  { %11452 = vst [vmem:[#allocation38_spill] sm:$0xff] %v10616_v63  ;;  %8278 = vmatpush3.bf16.msra.mxu1 %v11449_v23  ;;  %v10630_v1 = vsub.f32 %v4135_v9, %v10611_v55  ;;  %v4137_v23 = vmul.f32 %v10616_v63, %v10616_v63  ;;  %v4107_v28 = vmul.f32 0.015625, %v4073_v56  ;;  %v4287_v13 = vsub.f32 %v10596_v18, %v11252_v51  ;;  %v11457_v9 = vld [vmem:[#allocation24_spill] sm:$0xff] }
 0x275   :  { %8280 = vmatprep.subr.bf16.mxu1 %v11453_v19  ;;  %v4297_v29 = vsub.f32 %v10587_v10, %v11454_v35  ;;  %7365 = vmatprep.mubr.f32.mxu1 %v4268_v31  ;;  %v10637_v30 = vand.u32 4294901760, %v4138_v22  ;;  %v10642_v0 = vsub.f32 %v8843_v47, %v4108_v62  ;;  %v8844_v31 = vld [vmem:[%s11102_s3 + $0x60] sm:$0xff]  ;;  %v7326_v51 = vpop.f32.mrb[30].mxu0  ;;  %v11458_v45 = vand.u32 4294901760, %v10621_v61 }
 0x276   :  { %v10645_v4 = vand.u32 4294901760, %v4137_v23  ;;  %v10650_v56 = vsub.f32 %v8844_v31, %v4107_v28  ;;  %v4288_v63 = vand.u32 4294901760, %v4287_v13  ;;  %v11258_v48 = vand.u32 4294901760, %v10630_v1 }
 0x277   :  { %11455 = vst [vmem:[#allocation23_spill] sm:$0xff] %v10642_v0  ;;  %7366 = vmatmul.mubr.f32.gmra.mrb[20].mxu1 %v4278_v53  ;;  %v4298_v35 = vand.u32 4294901760, %v4297_v29  ;;  %v10655_v47 = vsub.f32 %v4138_v22, %v10637_v30  ;;  %v4140_v53 = vmul.f32 %v10642_v0, %v10642_v0  ;;  %v4110_v62 = vmul.f32 0.015625, %v7326_v51  ;;  %v4085_v29 = vpop.f32.mrb[31].mxu0  ;;  %v8845_v0 = vld [vmem:[%s11102_s3 + $0x78] sm:$0xff] }
 0x278   :  { %11456 = vst [vmem:[#allocation39_spill] sm:$0xff] %v10650_v56  ;;  %8282 = vmatpush3.bf16.msra.mxu1 %v11453_v19  ;;  %v4317_v28 = vsub.f32 %v10621_v61, %v11458_v45  ;;  %v10664_v31 = vsub.f32 %v4137_v23, %v10645_v4  ;;  %v4139_v19 = vmul.f32 %v10650_v56, %v10650_v56  ;;  %v4109_v13 = vmul.f32 0.015625, %v4085_v29 }
 0x279   :  { %8284 = vmatprep.subr.bf16.mxu1 %v11457_v9  ;;  %7368 = vmatprep.mubr.f32.mxu1 %v4288_v63  ;;  %v4307_v22 = vsub.f32 %v10630_v1, %v11258_v48  ;;  %v10671_v51 = vand.u32 4294901760, %v4140_v53  ;;  %v10676_v42 = vsub.f32 %v8845_v0, %v4110_v62  ;;  %v11262_v45 = vand.u32 4294901760, %v10655_v47  ;;  %v8846_v63 = vld [vmem:[%s11102_s3 + $0x70] sm:$0xff]  ;;  %v11461_v62 = vld [vmem:[#allocation25_spill] sm:$0xff] }
 0x27a   :  { %v10679_v23 = vand.u32 4294901760, %v4139_v19  ;;  %v10684_v29 = vsub.f32 %v8846_v63, %v4109_v13  ;;  %v11264_v56 = vand.u32 4294901760, %v10664_v31 }
 0x27b   :  { %11459 = vst [vmem:[#allocation24_spill] sm:$0xff] %v10676_v42  ;;  %7369 = vmatmul.mubr.f32.gmra.mrb[22].mxu1 %v4298_v35  ;;  %v4308_v48 = vand.u32 4294901760, %v4307_v22  ;;  %v10689_v14 = vsub.f32 %v4140_v53, %v10671_v51  ;;  %v4142_v0 = vmul.f32 %v10676_v42, %v10676_v42  ;;  %v4318_v35 = vand.u32 4294901760, %v4317_v28 }
 0x27c   :  { %11460 = vst [vmem:[#allocation40_spill] sm:$0xff] %v10684_v29  ;;  %8286 = vmatpush3.bf16.msra.mxu1 %v11457_v9  ;;  %v4337_v7 = vsub.f32 %v10655_v47, %v11262_v45  ;;  %v10698_v13 = vsub.f32 %v4139_v19, %v10679_v23  ;;  %v4141_v9 = vmul.f32 %v10684_v29, %v10684_v29 }
 0x27d   :  { %8288 = vmatprep.subr.bf16.mxu1 %v11461_v62  ;;  %7371 = vmatprep.mubr.f32.mxu1 %v4308_v48  ;;  %v4327_v53 = vsub.f32 %v10664_v31, %v11264_v56  ;;  %v10705_v22 = vand.u32 4294901760, %v4142_v0  ;;  %v4356_v28 = vand.u32 4294901760, %v10689_v14 }
 0x27e   :  { %v10708_v63 = vand.u32 4294901760, %v4141_v9  ;;  %v4346_v19 = vand.u32 4294901760, %v10698_v13  ;;  %v4338_v48 = vand.u32 4294901760, %v4337_v7 }
 0x27f   :  { %7372 = vmatmul.mubr.f32.gmra.mrb[24].mxu1 %v4318_v35  ;;  %v4328_v45 = vand.u32 4294901760, %v4327_v53  ;;  %v10713_v42 = vsub.f32 %v4142_v0, %v10705_v22  ;;  %v4357_v56 = vsub.f32 %v10689_v14, %v4356_v28 }
 0x280   :  { %8290 = vmatpush3.bf16.msra.mxu1 %v11461_v62  ;;  %v10720_v35 = vsub.f32 %v4141_v9, %v10708_v63  ;;  %v4347_v62 = vsub.f32 %v10698_v13, %v4346_v19 }
 0x281   :  { %8292 = vmatprep.subr.bf16.mxu1 %v9413_v16  ;;  %7374 = vmatprep.mubr.f32.mxu1 %v4328_v45  ;;  %v4376_v53 = vand.u32 4294901760, %v10713_v42  ;;  %v4358_v29 = vand.u32 4294901760, %v4357_v56  ;;  %v11480_v56 = vld [vmem:[#allocation5_spill] sm:$0xff] }
 0x282   :  { %v4348_v7 = vand.u32 4294901760, %v4347_v62  ;;  %v4366_v0 = vand.u32 4294901760, %v10720_v35 }
 0x283   :  { %7375 = vmatmul.mubr.f32.gmra.mrb[26].mxu1 %v4338_v48  ;;  %v4377_v9 = vsub.f32 %v10713_v42, %v4376_v53 }
 0x284   :  { %8294 = vmatpush3.bf16.msra.mxu1 %v9413_v16  ;;  %7377 = vmatprep.mubr.f32.mxu1 %v4348_v7  ;;  %v4367_v45 = vsub.f32 %v10720_v35, %v4366_v0 }
 0x285   :  { %8296 = vmatprep.subr.bf16.mxu1 %v9431_v3  ;;  %v4378_v16 = vand.u32 4294901760, %v4377_v9  ;;  %v11482_v9 = vld [vmem:[#allocation7_spill] sm:$0xff] }
 0x286   :  { %v4368_v48 = vand.u32 4294901760, %v4367_v45 }
 0x287   :  { %7378 = vmatmul.mubr.f32.gmra.mrb[28].mxu1 %v4358_v29  ;;  %v11481_v29 = vld [vmem:[#allocation2_spill] sm:$0xff] }
 0x288   :  { %8298 = vmatpush3.bf16.msra.mxu1 %v9431_v3  ;;  %7380 = vmatprep.mubr.f32.mxu1 %v4368_v48  ;;  %v11462_v3 = vand.u32 4294901760, %v10494_v60 }
 0x289   :  { %8300 = vmatprep.subr.bf16.mxu1 %v9438_v11 }
 0x28b   :  { %7381 = vmatmul.mubr.f32.gmra.mrb[30].mxu1 %v4378_v16 }
 0x28c   :  { %8302 = vmatpush3.bf16.msra.mxu1 %v9438_v11  ;;  %7415 = vmatprep.mubr.f32.mxu1 %v10478_v44  ;;  %v11463_v11 = vand.u32 4294901760, %v10488_v24 }
 0x28d   :  { %8304 = vmatprep.subr.bf16.mxu1 %v9444_v43 }
 0x28f   :  { %7416 = vmatmul.mubr.f32.vlgmr.msra.gmra.mrb[16].mxu1 %v10470_v8 }
 0x290   :  { %7418 = vmatprep.mubr.f32.mxu1 %v10507_v36  ;;  %8306 = vmatpush3.bf16.msra.mxu1 %v9444_v43  ;;  %v11464_v43 = vand.u32 4294901760, %v10527_v38 }
 0x291   :  { %8308 = vmatprep.subr.bf16.mxu1 %v9451_v58 }
 0x293   :  { %7419 = vmatmul.mubr.f32.gmra.mrb[18].mxu1 %v10499_v25 }
 0x294   :  { %7421 = vmatprep.mubr.f32.mxu1 %v10543_v6  ;;  %8310 = vmatpush3.bf16.msra.mxu1 %v9451_v58  ;;  %v11465_v58 = vand.u32 4294901760, %v10521_v54 }
 0x295   :  { %8312 = vmatprep.subr.bf16.mxu1 %v9459_v33 }
 0x297   :  { %7422 = vmatmul.mubr.f32.gmra.mrb[20].mxu1 %v10534_v39 }
 0x298   :  { %7424 = vmatprep.mubr.f32.mxu1 %v10577_v15  ;;  %8314 = vmatpush3.bf16.msra.mxu1 %v9459_v33  ;;  %v11466_v33 = vand.u32 4294901760, %v10562_v50 }
 0x299   :  { %8316 = vmatprep.subr.bf16.mxu1 %v9467_v34 }
 0x29b   :  { %7425 = vmatmul.mubr.f32.gmra.mrb[22].mxu1 %v10569_v5 }
 0x29c   :  { %7427 = vmatprep.mubr.f32.mxu1 %v10611_v55  ;;  %8318 = vmatpush3.bf16.msra.mxu1 %v9467_v34  ;;  %v11467_v34 = vld [vmem:[#allocation28_spill] sm:$0xff] }
 0x29d   :  { %8320 = vmatprep.subr.bf16.mxu1 %v9475_v40 }
 0x29f   :  { %7428 = vmatmul.mubr.f32.gmra.mrb[24].mxu1 %v10603_v26 }
 0x2a0   :  { %7430 = vmatprep.mubr.f32.mxu1 %v10645_v4  ;;  %8322 = vmatpush3.bf16.msra.mxu1 %v9475_v40  ;;  %v11468_v40 = vand.u32 4294901760, %v10553_v41 }
 0x2a1   :  { %8324 = vmatprep.subr.bf16.mxu1 %v9483_v49 }
 0x2a3   :  { %7431 = vmatmul.mubr.f32.gmra.mrb[26].mxu1 %v10637_v30 }
 0x2a4   :  { %7433 = vmatprep.mubr.f32.mxu1 %v10679_v23  ;;  %8326 = vmatpush3.bf16.msra.mxu1 %v9483_v49  ;;  %v11469_v49 = vand.u32 4294901760, %v10596_v18 }
 0x2a5   :  { %8328 = vmatprep.subr.bf16.mxu1 %v9491_v57 }
 0x2a7   :  { %7434 = vmatmul.mubr.f32.gmra.mrb[28].mxu1 %v10671_v51 }
 0x2a8   :  { %7436 = vmatprep.mubr.f32.mxu1 %v10708_v63  ;;  %8330 = vmatpush3.bf16.msra.mxu1 %v9491_v57  ;;  %v11470_v57 = vld [vmem:[#allocation29_spill] sm:$0xff] }
 0x2a9   :  { %8332 = vmatprep.subr.bf16.mxu1 %v9499_v59 }
 0x2ab   :  { %7437 = vmatmul.mubr.f32.gmra.mrb[30].mxu1 %v10705_v22 }
 0x2ac   :  { %8334 = vmatpush3.bf16.msra.mxu1 %v9499_v59  ;;  %7471 = vmatprep.mubr.f32.mxu1 %v10494_v60  ;;  %v11471_v59 = vand.u32 4294901760, %v10587_v10  ;;  %v11475_v60 = vand.u32 4294901760, %v10664_v31 }
 0x2ad   :  { %8336 = vmatprep.subr.bf16.mxu1 %v11330_v17 }
 0x2af   :  { %7472 = vmatmul.mubr.f32.vlgmr.msra.gmra.mrb[16].mxu1 %v10488_v24  ;;  %v11474_v24 = vand.u32 4294901760, %v10621_v61 }
 0x2b0   :  { %7474 = vmatprep.mubr.f32.mxu1 %v10527_v38  ;;  %8338 = vmatpush3.bf16.msra.mxu1 %v11330_v17  ;;  %v11477_v38 = vand.u32 4294901760, %v10655_v47 }
 0x2b1   :  { %8340 = vmatprep.subr.bf16.mxu1 %v11333_v20 }
 0x2b3   :  { %7475 = vmatmul.mubr.f32.gmra.mrb[18].mxu1 %v10521_v54  ;;  %v11476_v54 = vld [vmem:[#allocation31_spill] sm:$0xff] }
 0x2b4   :  { %7477 = vmatprep.mubr.f32.mxu1 %v10562_v50  ;;  %8342 = vmatpush3.bf16.msra.mxu1 %v11333_v20  ;;  %v11479_v50 = vld [vmem:[#allocation33_spill] sm:$0xff] }
 0x2b5   :  { %8344 = vmatprep.subr.bf16.mxu1 %v11336_v2 }
 0x2b7   :  { %7478 = vmatmul.mubr.f32.gmra.mrb[20].mxu1 %v10553_v41  ;;  %v11478_v41 = vld [vmem:[#allocation32_spill] sm:$0xff] }
 0x2b8   :  { %7480 = vmatprep.mubr.f32.mxu1 %v10596_v18  ;;  %8346 = vmatpush3.bf16.msra.mxu1 %v11336_v2 }
 0x2b9   :  { %8348 = vmatprep.subr.bf16.mxu1 %v11339_v32 }
 0x2bb   :  { %7481 = vmatmul.mubr.f32.gmra.mrb[22].mxu1 %v10587_v10 }
 0x2bc   :  { %7483 = vmatprep.mubr.f32.mxu1 %v10630_v1  ;;  %8350 = vmatpush3.bf16.msra.mxu1 %v11339_v32 }
 0x2bd   :  { %8352 = vmatprep.subr.bf16.mxu1 %v11342_v21 }
 0x2bf   :  { %7484 = vmatmul.mubr.f32.gmra.mrb[24].mxu1 %v10621_v61  ;;  %v10901_v61 = vld [vmem:[%s11103_s0] ss:$0 sm:$0xff] }
 0x2c0   :  { %7486 = vmatprep.mubr.f32.mxu1 %v10664_v31  ;;  %8354 = vmatpush3.bf16.msra.mxu1 %v11342_v21 }
 0x2c1   :  { %8356 = vmatprep.subr.bf16.mxu1 %v11345_v52 }
 0x2c3   :  { %7487 = vmatmul.mubr.f32.gmra.mrb[26].mxu1 %v10655_v47 }
 0x2c4   :  { %7489 = vmatprep.mubr.f32.mxu1 %v10698_v13  ;;  %8358 = vmatpush3.bf16.msra.mxu1 %v11345_v52 }
 0x2c5   :  { %8360 = vmatprep.subr.bf16.mxu1 %v11374_v37 }
 0x2c7   :  { %7490 = vmatmul.mubr.f32.gmra.mrb[28].mxu1 %v10689_v14 }
 0x2c8   :  { %7492 = vmatprep.mubr.f32.mxu1 %v10720_v35  ;;  %8362 = vmatpush3.bf16.msra.mxu1 %v11374_v37 }
 0x2c9   :  { %8364 = vmatprep.subr.bf16.mxu1 %v11375_v27 }
 0x2cb   :  { %7493 = vmatmul.mubr.f32.gmra.mrb[30].mxu1 %v10713_v42 }
 0x2cc   :  { %8366 = vmatpush3.bf16.msra.mxu1 %v11375_v27  ;;  %7527 = vmatprep.mubr.f32.mxu1 %v11462_v3 }
 0x2cd   :  { %8368 = vmatprep.subr.bf16.mxu1 %v11377_v46 }
 0x2cf   :  { %7528 = vmatmul.mubr.f32.vlgmr.msra.gmra.mrb[16].mxu1 %v11463_v11  ;;  %v11483_v11 = vld [vmem:[#allocation9_spill] sm:$0xff] }
 0x2d0   :  { %7530 = vmatprep.mubr.f32.mxu1 %v11464_v43  ;;  %8370 = vmatpush3.bf16.msra.mxu1 %v11377_v46  ;;  %v11472_v46 = vand.u32 4294901760, %v10630_v1 }
 0x2d1   :  { %8372 = vmatprep.subr.bf16.mxu1 %v11380_v12 }
 0x2d3   :  { %7531 = vmatmul.mubr.f32.gmra.mrb[18].mxu1 %v11465_v58 }
 0x2d4   :  { %7533 = vmatprep.mubr.f32.mxu1 %v11466_v33  ;;  %8374 = vmatpush3.bf16.msra.mxu1 %v11380_v12  ;;  %v11473_v12 = vld [vmem:[#allocation30_spill] sm:$0xff] }
 0x2d5   :  { %8376 = vmatprep.subr.bf16.mxu1 %v11467_v34 }
 0x2d7   :  { %7534 = vmatmul.mubr.f32.gmra.mrb[20].mxu1 %v11468_v40 }
 0x2d8   :  { %7536 = vmatprep.mubr.f32.mxu1 %v11469_v49  ;;  %8378 = vmatpush3.bf16.msra.mxu1 %v11467_v34 }
 0x2d9   :  { %8380 = vmatprep.subr.bf16.mxu1 %v11470_v57 }
 0x2db   :  { %7537 = vmatmul.mubr.f32.gmra.mrb[22].mxu1 %v11471_v59 }
 0x2dc   :  { %7539 = vmatprep.mubr.f32.mxu1 %v11472_v46  ;;  %8382 = vmatpush3.bf16.msra.mxu1 %v11470_v57 }
 0x2dd   :  { %8384 = vmatprep.subr.bf16.mxu1 %v11473_v12 }
 0x2df   :  { %7540 = vmatmul.mubr.f32.gmra.mrb[24].mxu1 %v11474_v24  ;;  %v11484_v24 = vld [vmem:[#allocation3_spill] sm:$0xff] }
 0x2e0   :  { %7542 = vmatprep.mubr.f32.mxu1 %v11475_v60  ;;  %8386 = vmatpush3.bf16.msra.mxu1 %v11473_v12 }
 0x2e1   :  { %8388 = vmatprep.subr.bf16.mxu1 %v11476_v54 }
 0x2e3   :  { %7543 = vmatmul.mubr.f32.gmra.mrb[26].mxu1 %v11477_v38 }
 0x2e4   :  { %7545 = vmatprep.mubr.f32.mxu1 %v4346_v19  ;;  %8390 = vmatpush3.bf16.msra.mxu1 %v11476_v54 }
 0x2e5   :  { %8392 = vmatprep.subr.bf16.mxu1 %v11478_v41 }
 0x2e7   :  { %7546 = vmatmul.mubr.f32.gmra.mrb[28].mxu1 %v4356_v28 }
 0x2e8   :  { %7548 = vmatprep.mubr.f32.mxu1 %v4366_v0  ;;  %8394 = vmatpush3.bf16.msra.mxu1 %v11478_v41 }
 0x2e9   :  { %8396 = vmatprep.subr.bf16.mxu1 %v11479_v50 }
 0x2eb   :  { %7549 = vmatmul.mubr.f32.gmra.mrb[30].mxu1 %v4376_v53 }
 0x2ec   :  { %8398 = vmatpush3.bf16.msra.mxu1 %v11479_v50  ;;  %7583 = vmatprep.mubr.f32.mxu1 %v10478_v44  ;;  %v11485_v50 = vld [vmem:[#allocation10_spill] sm:$0xff] }
 0x2ed   :  { %8400 = vmatprep.subr.bf16.mxu1 %v11330_v17 }
 0x2ef   :  { %7584 = vmatmul.mubr.f32.vlgmr.msra.gmra.mrb[16].mxu1 %v10470_v8 }
 0x2f0   :  { %7586 = vmatprep.mubr.f32.mxu1 %v10507_v36  ;;  %8402 = vmatpush3.bf16.msra.mxu1 %v11330_v17 }
 0x2f1   :  { %8404 = vmatprep.subr.bf16.mxu1 %v11333_v20 }
 0x2f3   :  { %7587 = vmatmul.mubr.f32.gmra.mrb[18].mxu1 %v10499_v25 }
 0x2f4   :  { %7589 = vmatprep.mubr.f32.mxu1 %v10543_v6  ;;  %8406 = vmatpush3.bf16.msra.mxu1 %v11333_v20 }
 0x2f5   :  { %8408 = vmatprep.subr.bf16.mxu1 %v11336_v2 }
 0x2f7   :  { %7590 = vmatmul.mubr.f32.gmra.mrb[20].mxu1 %v10534_v39 }
 0x2f8   :  { %7592 = vmatprep.mubr.f32.mxu1 %v10577_v15  ;;  %8410 = vmatpush3.bf16.msra.mxu1 %v11336_v2 }
 0x2f9   :  { %8412 = vmatprep.subr.bf16.mxu1 %v11339_v32 }
 0x2fb   :  { %7593 = vmatmul.mubr.f32.gmra.mrb[22].mxu1 %v10569_v5 }
 0x2fc   :  { %7595 = vmatprep.mubr.f32.mxu1 %v10611_v55  ;;  %8414 = vmatpush3.bf16.msra.mxu1 %v11339_v32 }
 0x2fd   :  { %8416 = vmatprep.subr.bf16.mxu1 %v11342_v21 }
 0x2ff   :  { %7596 = vmatmul.mubr.f32.gmra.mrb[24].mxu1 %v10603_v26 }
 0x300   :  { %7598 = vmatprep.mubr.f32.mxu1 %v10645_v4  ;;  %8418 = vmatpush3.bf16.msra.mxu1 %v11342_v21 }
 0x301   :  { %8420 = vmatprep.subr.bf16.mxu1 %v11345_v52 }
 0x303   :  { %7599 = vmatmul.mubr.f32.gmra.mrb[26].mxu1 %v10637_v30 }
 0x304   :  { %7601 = vmatprep.mubr.f32.mxu1 %v10679_v23  ;;  %8422 = vmatpush3.bf16.msra.mxu1 %v11345_v52 }
 0x305   :  { %8424 = vmatprep.subr.bf16.mxu1 %v11374_v37 }
 0x307   :  { %7602 = vmatmul.mubr.f32.gmra.mrb[28].mxu1 %v10671_v51 }
 0x308   :  { %7604 = vmatprep.mubr.f32.mxu1 %v10708_v63  ;;  %8426 = vmatpush3.bf16.msra.mxu1 %v11374_v37 }
 0x309   :  { %8428 = vmatprep.subr.bf16.mxu1 %v11375_v27 }
 0x30b   :  { %7605 = vmatmul.mubr.f32.gmra.mrb[30].mxu1 %v10705_v22 }
 0x30c   :  { %8430 = vmatpush3.bf16.msra.mxu1 %v11375_v27  ;;  %7639 = vmatprep.mubr.f32.mxu1 %v10478_v44 }
 0x30f   :  { %7640 = vmatmul.mubr.f32.vlgmr.msra.gmra.mrb[16].mxu1 %v10470_v8 }
 0x310   :  { %7642 = vmatprep.mubr.f32.mxu1 %v10507_v36 }
 0x313   :  { %7643 = vmatmul.mubr.f32.gmra.mrb[18].mxu1 %v10499_v25 }
 0x314   :  { %7645 = vmatprep.mubr.f32.mxu1 %v10543_v6 }
 0x317   :  { %7646 = vmatmul.mubr.f32.gmra.mrb[20].mxu1 %v10534_v39 }
 0x318   :  { %7648 = vmatprep.mubr.f32.mxu1 %v10577_v15 }
 0x31b   :  { %7649 = vmatmul.mubr.f32.gmra.mrb[22].mxu1 %v10569_v5 }
 0x31c   :  { %7651 = vmatprep.mubr.f32.mxu1 %v10611_v55 }
 0x31f   :  { %7652 = vmatmul.mubr.f32.gmra.mrb[24].mxu1 %v10603_v26 }
 0x320   :  { %7654 = vmatprep.mubr.f32.mxu1 %v10645_v4 }
 0x322   :  { %v6969_v17 = vpop.f32.mrb[0].mxu1 }
 0x323   :  { %v2674_v20 = vmul.f32 0.015625, %v6969_v17  ;;  %v2579_v2 = vpop.f32.mrb[1].mxu1  ;;  %7655 = vmatmul.mubr.f32.gmra.mrb[26].mxu1 %v10637_v30 }
 0x324   :  { %v2673_v32 = vmul.f32 0.015625, %v2579_v2  ;;  %7657 = vmatprep.mubr.f32.mxu1 %v10679_v23  ;;  %v10907_v23 = vld [vmem:[%s11103_s0 + $0x1] ss:$0 sm:$0xff] }
 0x325   :  { %v2690_v21 = vadd.f32 1e-05, %v2674_v20 }
 0x326   :  { %v2689_v52 = vadd.f32 1e-05, %v2673_v32  ;;  %v6972_v37 = vpop.f32.mrb[2].mxu1 }
 0x327   :  { %8751 = vrsqrt.f32 %v2690_v21  ;;  %v2676_v27 = vmul.f32 0.015625, %v6972_v37  ;;  %v2591_v14 = vpop.f32.mrb[3].mxu1  ;;  %7658 = vmatmul.mubr.f32.gmra.mrb[28].mxu1 %v10671_v51 }
 0x328   :  { %8753 = vrsqrt.f32 %v2689_v52  ;;  %v2675_v42 = vmul.f32 0.015625, %v2591_v14  ;;  %7660 = vmatprep.mubr.f32.mxu1 %v10708_v63 }
 0x329   :  { %v2692_v4 = vadd.f32 1e-05, %v2676_v27 }
 0x32a   :  { %v2691_v8 = vadd.f32 1e-05, %v2675_v42  ;;  %v6975_v44 = vpop.f32.mrb[4].mxu1 }
 0x32b   :  { %8755 = vrsqrt.f32 %v2692_v4  ;;  %v2678_v55 = vmul.f32 0.015625, %v6975_v44  ;;  %v2603_v25 = vpop.f32.mrb[5].mxu1  ;;  %7661 = vmatmul.mubr.f32.gmra.mrb[30].mxu1 %v10705_v22  ;;  %v11486_v4 = vld [vmem:[#allocation12_spill] sm:$0xff] }
 0x32c   :  { %8757 = vrsqrt.f32 %v2691_v8  ;;  %v2677_v36 = vmul.f32 0.015625, %v2603_v25 }
 0x32d   :  { %v2694_v15 = vadd.f32 1e-05, %v2678_v55 }
 0x32e   :  { %v2693_v39 = vadd.f32 1e-05, %v2677_v36  ;;  %v6978_v6 = vpop.f32.mrb[6].mxu1  ;;  %v11487_v36 = vld [vmem:[#allocation4_spill] sm:$0xff] }
 0x32f   :  { %8759 = vrsqrt.f32 %v2694_v15  ;;  %v2680_v5 = vmul.f32 0.015625, %v6978_v6  ;;  %v2615_v10 = vpop.f32.mrb[7].mxu1 }
 0x330   :  { %8761 = vrsqrt.f32 %v2693_v39  ;;  %v2679_v18 = vmul.f32 0.015625, %v2615_v10 }
 0x331   :  { %v8752_v26 = vpop.eup %8751  ;;  %v2696_v1 = vadd.f32 1e-05, %v2680_v5 }
 0x332   :  { %v8754_v30 = vpop.eup %8753  ;;  %v2722_v47 = vmul.f32 %v8752_v26, %v11480_v56  ;;  %v2695_v31 = vadd.f32 1e-05, %v2679_v18  ;;  %v6981_v51 = vpop.f32.mrb[8].mxu1 }
 0x333   :  { %v2721_v13 = vmul.f32 %v8754_v30, %v11481_v29  ;;  %8763 = vrsqrt.f32 %v2696_v1  ;;  %v2682_v22 = vmul.f32 0.015625, %v6981_v51  ;;  %v2627_v28 = vpop.f32.mrb[9].mxu1 }
 0x334   :  { %v2742_v63 = vmul.f32 %v10901_v61, %v2722_v47  ;;  %8765 = vrsqrt.f32 %v2695_v31  ;;  %v2681_v19 = vmul.f32 0.015625, %v2627_v28  ;;  %v11488_v47 = vld [vmem:[#allocation13_spill] sm:$0xff] }
 0x335   :  { %v8756_v35 = vpop.eup %8755  ;;  %v2741_v62 = vmul.f32 %v10901_v61, %v2721_v13  ;;  %v2698_v53 = vadd.f32 1e-05, %v2682_v22  ;;  %v11489_v13 = vld [vmem:[#allocation16_spill] sm:$0xff] }
 0x336   :  { %v8758_v7 = vpop.eup %8757  ;;  %v2762_v0 = vadd.f32 %v10907_v23, %v2742_v63  ;;  %v2724_v45 = vmul.f32 %v8756_v35, %v11482_v9  ;;  %v2697_v48 = vadd.f32 1e-05, %v2681_v19  ;;  %v6984_v16 = vpop.f32.mrb[10].mxu1  ;;  %v11491_v9 = vld [vmem:[#allocation18_spill] sm:$0xff] }
 0x337   :  { %v2761_v3 = vadd.f32 %v10907_v23, %v2741_v62  ;;  %v2723_v43 = vmul.f32 %v8758_v7, %v11483_v11  ;;  %8767 = vrsqrt.f32 %v2698_v53  ;;  %v2684_v58 = vmul.f32 0.015625, %v6984_v16  ;;  %v2639_v33 = vpop.f32.mrb[11].mxu1  ;;  %v11490_v53 = vld [vmem:[#allocation6_spill] sm:$0xff] }
 0x338   :  { %2778 = vst [vmem:[%s11104_s4 + $0x8] sm:$0xff] %v2762_v0  ;;  %v2744_v34 = vmul.f32 %v10901_v61, %v2724_v45  ;;  %8769 = vrsqrt.f32 %v2697_v48  ;;  %v2683_v40 = vmul.f32 0.015625, %v2639_v33 }
 0x339   :  { %v8760_v49 = vpop.eup %8759  ;;  %2777 = vst [vmem:[%s11104_s4] sm:$0xff] %v2761_v3  ;;  %v2743_v57 = vmul.f32 %v10901_v61, %v2723_v43  ;;  %v2700_v59 = vadd.f32 1e-05, %v2684_v58  ;;  %v11492_v58 = vld [vmem:[#allocation20_spill] sm:$0xff] }
 0x33a   :  { %v8762_v46 = vpop.eup %8761  ;;  %v2764_v12 = vadd.f32 %v10907_v23, %v2744_v34  ;;  %v2726_v60 = vmul.f32 %v8760_v49, %v11484_v24  ;;  %v2699_v54 = vadd.f32 1e-05, %v2683_v40  ;;  %v6987_v38 = vpop.f32.mrb[12].mxu1  ;;  %v11493_v40 = vld [vmem:[#allocation8_spill] sm:$0xff] }
 0x33b   :  { %v2763_v41 = vadd.f32 %v10907_v23, %v2743_v57  ;;  %v2725_v17 = vmul.f32 %v8762_v46, %v11485_v50  ;;  %8771 = vrsqrt.f32 %v2700_v59  ;;  %v2686_v20 = vmul.f32 0.015625, %v6987_v38  ;;  %v2651_v2 = vpop.f32.mrb[13].mxu1 }
 0x33c   :  { %2780 = vst [vmem:[%s11104_s4 + $0x18] sm:$0xff] %v2764_v12  ;;  %v2746_v32 = vmul.f32 %v10901_v61, %v2726_v60  ;;  %8773 = vrsqrt.f32 %v2699_v54  ;;  %v2685_v21 = vmul.f32 0.015625, %v2651_v2  ;;  %v11494_v60 = vld [vmem:[#allocation21_spill] sm:$0xff] }
 0x33d   :  { %v8764_v52 = vpop.eup %8763  ;;  %2779 = vst [vmem:[%s11104_s4 + $0x10] sm:$0xff] %v2763_v41  ;;  %v2745_v37 = vmul.f32 %v10901_v61, %v2725_v17  ;;  %v2702_v27 = vadd.f32 1e-05, %v2686_v20  ;;  %v11495_v41 = vld [vmem:[#allocation22_spill] sm:$0xff] }
 0x33e   :  { %v8766_v14 = vpop.eup %8765  ;;  %v2766_v42 = vadd.f32 %v10907_v23, %v2746_v32  ;;  %v2728_v8 = vmul.f32 %v8764_v52, %v11486_v4  ;;  %v2701_v44 = vadd.f32 1e-05, %v2685_v21  ;;  %v6990_v55 = vpop.f32.mrb[14].mxu1 }
 0x33f   :  { %v2765_v25 = vadd.f32 %v10907_v23, %v2745_v37  ;;  %v2727_v15 = vmul.f32 %v8766_v14, %v11487_v36  ;;  %8775 = vrsqrt.f32 %v2702_v27  ;;  %v2688_v39 = vmul.f32 0.015625, %v6990_v55  ;;  %v2663_v6 = vpop.f32.mrb[15].mxu1 }
 0x340   :  { %2782 = vst [vmem:[%s11104_s4 + $0x28] sm:$0xff] %v2766_v42  ;;  %v2748_v5 = vmul.f32 %v10901_v61, %v2728_v8  ;;  %8777 = vrsqrt.f32 %v2701_v44  ;;  %v2687_v10 = vmul.f32 0.015625, %v2663_v6 }
 0x341   :  { %v8768_v18 = vpop.eup %8767  ;;  %2781 = vst [vmem:[%s11104_s4 + $0x20] sm:$0xff] %v2765_v25  ;;  %v2747_v26 = vmul.f32 %v10901_v61, %v2727_v15  ;;  %v2704_v1 = vadd.f32 1e-05, %v2688_v39 }
 0x342   :  { %v8770_v30 = vpop.eup %8769  ;;  %v2768_v56 = vadd.f32 %v10907_v23, %v2748_v5  ;;  %v2730_v31 = vmul.f32 %v8768_v18, %v11488_v47  ;;  %v2703_v51 = vadd.f32 1e-05, %v2687_v10 }
 0x343   :  { %v2767_v29 = vadd.f32 %v10907_v23, %v2747_v26  ;;  %v2729_v22 = vmul.f32 %v8770_v30, %v11489_v13  ;;  %8779 = vrsqrt.f32 %v2704_v1 }
 0x344   :  { %2784 = vst [vmem:[%s11104_s4 + $0x38] sm:$0xff] %v2768_v56  ;;  %v2750_v28 = vmul.f32 %v10901_v61, %v2730_v31  ;;  %8781 = vrsqrt.f32 %v2703_v51 }
 0x345   :  { %v8772_v63 = vpop.eup %8771  ;;  %2783 = vst [vmem:[%s11104_s4 + $0x30] sm:$0xff] %v2767_v29  ;;  %v2749_v19 = vmul.f32 %v10901_v61, %v2729_v22  ;;  %v11496_v29 = vld [vmem:[#allocation11_spill] sm:$0xff] }
 0x346   :  { %v8774_v35 = vpop.eup %8773  ;;  %v2770_v62 = vadd.f32 %v10907_v23, %v2750_v28  ;;  %v2732_v7 = vmul.f32 %v8772_v63, %v11490_v53  ;;  %v11497_v63 = vld [vmem:[#allocation14_spill] sm:$0xff] }
 0x347   :  { %v2769_v0 = vadd.f32 %v10907_v23, %v2749_v19  ;;  %v2731_v45 = vmul.f32 %v8774_v35, %v11491_v9 }
 0x348   :  { %2786 = vst [vmem:[%s11104_s4 + $0x48] sm:$0xff] %v2770_v62  ;;  %v2752_v48 = vmul.f32 %v10901_v61, %v2732_v7 }
 0x349   :  { %v8776_v16 = vpop.eup %8775  ;;  %2785 = vst [vmem:[%s11104_s4 + $0x40] sm:$0xff] %v2769_v0  ;;  %v2751_v3 = vmul.f32 %v10901_v61, %v2731_v45 }
 0x34a   :  { %v8778_v11 = vpop.eup %8777  ;;  %v2772_v43 = vadd.f32 %v10907_v23, %v2752_v48  ;;  %v2734_v33 = vmul.f32 %v8776_v16, %v11492_v58 }
 0x34b   :  { %v2771_v34 = vadd.f32 %v10907_v23, %v2751_v3  ;;  %v2733_v49 = vmul.f32 %v8778_v11, %v11493_v40  ;;  %v11498_v3 = vld [vmem:[#allocation15_spill] sm:$0xff] }
 0x34c   :  { %2788 = vst [vmem:[%s11104_s4 + $0x58] sm:$0xff] %v2772_v43  ;;  %v2754_v57 = vmul.f32 %v10901_v61, %v2734_v33 }
 0x34d   :  { %v8780_v59 = vpop.eup %8779  ;;  %2787 = vst [vmem:[%s11104_s4 + $0x50] sm:$0xff] %v2771_v34  ;;  %v2753_v46 = vmul.f32 %v10901_v61, %v2733_v49  ;;  %v11499_v34 = vld [vmem:[#allocation26_spill] sm:$0xff] }
 0x34e   :  { %v8782_v12 = vpop.eup %8781  ;;  %v2774_v24 = vadd.f32 %v10907_v23, %v2754_v57  ;;  %v2736_v54 = vmul.f32 %v8780_v59, %v11494_v60 }
 0x34f   :  { %v2773_v38 = vadd.f32 %v10907_v23, %v2753_v46  ;;  %v2735_v50 = vmul.f32 %v8782_v12, %v11495_v41  ;;  %v11500_v41 = vld [vmem:[#allocation27_spill] sm:$0xff] }
 0x350   :  { %2790 = vst [vmem:[%s11104_s4 + $0x68] sm:$0xff] %v2774_v24  ;;  %v2756_v17 = vmul.f32 %v10901_v61, %v2736_v54 }
 0x351   :  { %2789 = vst [vmem:[%s11104_s4 + $0x60] sm:$0xff] %v2773_v38  ;;  %v2755_v20 = vmul.f32 %v10901_v61, %v2735_v50 }
 0x352   :  { %v2776_v2 = vadd.f32 %v10907_v23, %v2756_v17 }
 0x353   :  { %v2775_v32 = vadd.f32 %v10907_v23, %v2755_v20 }
 0x354   :  { %2792 = vst [vmem:[%s11104_s4 + $0x78] sm:$0xff] %v2776_v2 }
 0x355   :  { %2791 = vst [vmem:[%s11104_s4 + $0x70] sm:$0xff] %v2775_v32  ;;  %v11501_v32 = vld [vmem:[#allocation34_spill] sm:$0xff] }
 0x3e2   :  { %v7641_v21 = vpop.f32.mrb[16].mxu1 }
 0x3e3   :  { %v5430_v52 = vmul.f32 0.015625, %v7641_v21  ;;  %v5335_v37 = vpop.f32.mrb[17].mxu1 }
 0x3e4   :  { %v5429_v27 = vmul.f32 0.015625, %v5335_v37 }
 0x3e5   :  { %v5446_v14 = vadd.f32 1e-05, %v5430_v52 }
 0x3e6   :  { %v5445_v42 = vadd.f32 1e-05, %v5429_v27  ;;  %v7644_v4 = vpop.f32.mrb[18].mxu1 }
 0x3e7   :  { %8783 = vrsqrt.f32 %v5446_v14  ;;  %v5432_v8 = vmul.f32 0.015625, %v7644_v4  ;;  %v5347_v44 = vpop.f32.mrb[19].mxu1 }
 0x3e8   :  { %8785 = vrsqrt.f32 %v5445_v42  ;;  %v5431_v55 = vmul.f32 0.015625, %v5347_v44 }
 0x3e9   :  { %v5448_v25 = vadd.f32 1e-05, %v5432_v8 }
 0x3ea   :  { %v5447_v36 = vadd.f32 1e-05, %v5431_v55  ;;  %v7647_v15 = vpop.f32.mrb[20].mxu1 }
 0x3eb   :  { %8787 = vrsqrt.f32 %v5448_v25  ;;  %v5434_v39 = vmul.f32 0.015625, %v7647_v15  ;;  %v5359_v6 = vpop.f32.mrb[21].mxu1  ;;  %v11502_v25 = vld [vmem:[#allocation35_spill] sm:$0xff] }
 0x3ec   :  { %8789 = vrsqrt.f32 %v5447_v36  ;;  %v5433_v5 = vmul.f32 0.015625, %v5359_v6 }
 0x3ed   :  { %v5450_v10 = vadd.f32 1e-05, %v5434_v39 }
 0x3ee   :  { %v5449_v18 = vadd.f32 1e-05, %v5433_v5  ;;  %v7650_v26 = vpop.f32.mrb[22].mxu1  ;;  %v11503_v5 = vld [vmem:[#allocation36_spill] sm:$0xff] }
 0x3ef   :  { %8791 = vrsqrt.f32 %v5450_v10  ;;  %v5436_v1 = vmul.f32 0.015625, %v7650_v26  ;;  %v5371_v30 = vpop.f32.mrb[23].mxu1 }
 0x3f0   :  { %8793 = vrsqrt.f32 %v5449_v18  ;;  %v5435_v56 = vmul.f32 0.015625, %v5371_v30 }
 0x3f1   :  { %v8784_v47 = vpop.eup %8783  ;;  %v5452_v31 = vadd.f32 1e-05, %v5436_v1 }
 0x3f2   :  { %v8786_v51 = vpop.eup %8785  ;;  %v5478_v13 = vmul.f32 %v8784_v47, %v11496_v29  ;;  %v5451_v22 = vadd.f32 1e-05, %v5435_v56  ;;  %v7653_v28 = vpop.f32.mrb[24].mxu1 }
 0x3f3   :  { %v5477_v19 = vmul.f32 %v8786_v51, %v11497_v63  ;;  %8795 = vrsqrt.f32 %v5452_v31  ;;  %v5438_v35 = vmul.f32 0.015625, %v7653_v28  ;;  %v5383_v62 = vpop.f32.mrb[25].mxu1 }
 0x3f4   :  { %v5494_v53 = vmul.f32 %v10901_v61, %v5478_v13  ;;  %8797 = vrsqrt.f32 %v5451_v22  ;;  %v5437_v7 = vmul.f32 0.015625, %v5383_v62  ;;  %v11504_v13 = vld [vmem:[#allocation17_spill] sm:$0xff] }
 0x3f5   :  { %v8788_v0 = vpop.eup %8787  ;;  %v5493_v9 = vmul.f32 %v10901_v61, %v5477_v19  ;;  %v5454_v45 = vadd.f32 1e-05, %v5438_v35  ;;  %v11505_v19 = vld [vmem:[#allocation37_spill] sm:$0xff] }
 0x3f6   :  { %v8790_v48 = vpop.eup %8789  ;;  %v5510_v16 = vadd.f32 %v10907_v23, %v5494_v53  ;;  %v5480_v11 = vmul.f32 %v8788_v0, %v11498_v3  ;;  %v5453_v43 = vadd.f32 1e-05, %v5437_v7  ;;  %v7656_v58 = vpop.f32.mrb[26].mxu1  ;;  %v11507_v3 = vld [vmem:[#allocation38_spill] sm:$0xff] }
 0x3f7   :  { %v5509_v33 = vadd.f32 %v10907_v23, %v5493_v9  ;;  %v5479_v40 = vmul.f32 %v8790_v48, %v11499_v34  ;;  %8799 = vrsqrt.f32 %v5454_v45  ;;  %v5440_v49 = vmul.f32 0.015625, %v7656_v58  ;;  %v5395_v57 = vpop.f32.mrb[27].mxu1  ;;  %v11506_v45 = vld [vmem:[#allocation19_spill] sm:$0xff] }
 0x3f8   :  { %5526 = vst [vmem:[%s11105_s5 + $0x8] sm:$0xff] %v5510_v16  ;;  %v5496_v59 = vmul.f32 %v10901_v61, %v5480_v11  ;;  %8801 = vrsqrt.f32 %v5453_v43  ;;  %v5439_v46 = vmul.f32 0.015625, %v5395_v57 }
 0x3f9   :  { %v8792_v12 = vpop.eup %8791  ;;  %5525 = vst [vmem:[%s11105_s5] sm:$0xff] %v5509_v33  ;;  %v5495_v24 = vmul.f32 %v10901_v61, %v5479_v40  ;;  %v5456_v60 = vadd.f32 1e-05, %v5440_v49  ;;  %v11508_v49 = vld [vmem:[#allocation23_spill] sm:$0xff] }
 0x3fa   :  { %v8794_v54 = vpop.eup %8793  ;;  %v5512_v38 = vadd.f32 %v10907_v23, %v5496_v59  ;;  %v5482_v50 = vmul.f32 %v8792_v12, %v11500_v41  ;;  %v5455_v17 = vadd.f32 1e-05, %v5439_v46  ;;  %v7659_v20 = vpop.f32.mrb[28].mxu1  ;;  %v11509_v46 = vld [vmem:[#allocation39_spill] sm:$0xff] }
 0x3fb   :  { %v5511_v2 = vadd.f32 %v10907_v23, %v5495_v24  ;;  %v5481_v21 = vmul.f32 %v8794_v54, %v11501_v32  ;;  %8803 = vrsqrt.f32 %v5456_v60  ;;  %v5442_v52 = vmul.f32 0.015625, %v7659_v20  ;;  %v5407_v37 = vpop.f32.mrb[29].mxu1 }
 0x3fc   :  { %5528 = vst [vmem:[%s11105_s5 + $0x18] sm:$0xff] %v5512_v38  ;;  %v5498_v27 = vmul.f32 %v10901_v61, %v5482_v50  ;;  %8805 = vrsqrt.f32 %v5455_v17  ;;  %v5441_v14 = vmul.f32 0.015625, %v5407_v37  ;;  %v11510_v50 = vld [vmem:[#allocation24_spill] sm:$0xff] }
 0x3fd   :  { %v8796_v42 = vpop.eup %8795  ;;  %5527 = vst [vmem:[%s11105_s5 + $0x10] sm:$0xff] %v5511_v2  ;;  %v5497_v4 = vmul.f32 %v10901_v61, %v5481_v21  ;;  %v5458_v8 = vadd.f32 1e-05, %v5442_v52  ;;  %v11511_v2 = vld [vmem:[#allocation40_spill] sm:$0xff] }
 0x3fe   :  { %v8798_v44 = vpop.eup %8797  ;;  %v5514_v55 = vadd.f32 %v10907_v23, %v5498_v27  ;;  %v5484_v36 = vmul.f32 %v8796_v42, %v11502_v25  ;;  %v5457_v15 = vadd.f32 1e-05, %v5441_v14  ;;  %v7662_v39 = vpop.f32.mrb[30].mxu1 }
 0x3ff   :  { %v5513_v6 = vadd.f32 %v10907_v23, %v5497_v4  ;;  %v5483_v10 = vmul.f32 %v8798_v44, %v11503_v5  ;;  %8807 = vrsqrt.f32 %v5458_v8  ;;  %v5444_v18 = vmul.f32 0.015625, %v7662_v39  ;;  %v5419_v26 = vpop.f32.mrb[31].mxu1 }
 0x400   :  { %5530 = vst [vmem:[%s11105_s5 + $0x28] sm:$0xff] %v5514_v55  ;;  %v5500_v1 = vmul.f32 %v10901_v61, %v5484_v36  ;;  %8809 = vrsqrt.f32 %v5457_v15  ;;  %v5443_v30 = vmul.f32 0.015625, %v5419_v26 }
 0x401   :  { %v8800_v56 = vpop.eup %8799  ;;  %5529 = vst [vmem:[%s11105_s5 + $0x20] sm:$0xff] %v5513_v6  ;;  %v5499_v47 = vmul.f32 %v10901_v61, %v5483_v10  ;;  %v5460_v31 = vadd.f32 1e-05, %v5444_v18 }
 0x402   :  { %v8802_v51 = vpop.eup %8801  ;;  %v5516_v29 = vadd.f32 %v10907_v23, %v5500_v1  ;;  %v5486_v22 = vmul.f32 %v8800_v56, %v11504_v13  ;;  %v5459_v28 = vadd.f32 1e-05, %v5443_v30 }
 0x403   :  { %v5515_v63 = vadd.f32 %v10907_v23, %v5499_v47  ;;  %v5485_v35 = vmul.f32 %v8802_v51, %v11505_v19  ;;  %8811 = vrsqrt.f32 %v5460_v31 }
 0x404   :  { %5532 = vst [vmem:[%s11105_s5 + $0x38] sm:$0xff] %v5516_v29  ;;  %v5502_v62 = vmul.f32 %v10901_v61, %v5486_v22  ;;  %8813 = vrsqrt.f32 %v5459_v28 }
 0x405   :  { %v8804_v53 = vpop.eup %8803  ;;  %5531 = vst [vmem:[%s11105_s5 + $0x30] sm:$0xff] %v5515_v63  ;;  %v5501_v7 = vmul.f32 %v10901_v61, %v5485_v35 }
 0x406   :  { %v8806_v0 = vpop.eup %8805  ;;  %v5518_v9 = vadd.f32 %v10907_v23, %v5502_v62  ;;  %v5488_v48 = vmul.f32 %v8804_v53, %v11506_v45 }
 0x407   :  { %v5517_v16 = vadd.f32 %v10907_v23, %v5501_v7  ;;  %v5487_v11 = vmul.f32 %v8806_v0, %v11507_v3 }
 0x408   :  { %5534 = vst [vmem:[%s11105_s5 + $0x48] sm:$0xff] %v5518_v9  ;;  %v5504_v43 = vmul.f32 %v10901_v61, %v5488_v48 }
 0x409   :  { %v8808_v58 = vpop.eup %8807  ;;  %5533 = vst [vmem:[%s11105_s5 + $0x40] sm:$0xff] %v5517_v16  ;;  %v5503_v33 = vmul.f32 %v10901_v61, %v5487_v11 }
 0x40a   :  { %v8810_v34 = vpop.eup %8809  ;;  %v5520_v40 = vadd.f32 %v10907_v23, %v5504_v43  ;;  %v5490_v57 = vmul.f32 %v8808_v58, %v11508_v49 }
 0x40b   :  { %v5519_v59 = vadd.f32 %v10907_v23, %v5503_v33  ;;  %v5489_v12 = vmul.f32 %v8810_v34, %v11509_v46 }
 0x40c   :  { %5536 = vst [vmem:[%s11105_s5 + $0x58] sm:$0xff] %v5520_v40  ;;  %v5506_v24 = vmul.f32 %v10901_v61, %v5490_v57 }
 0x40d   :  { %v8812_v60 = vpop.eup %8811  ;;  %5535 = vst [vmem:[%s11105_s5 + $0x50] sm:$0xff] %v5519_v59  ;;  %v5505_v54 = vmul.f32 %v10901_v61, %v5489_v12 }
 0x40e   :  { %v8814_v38 = vpop.eup %8813  ;;  %v5522_v41 = vadd.f32 %v10907_v23, %v5506_v24  ;;  %v5492_v17 = vmul.f32 %v8812_v60, %v11510_v50 }
 0x40f   :  { %v5521_v20 = vadd.f32 %v10907_v23, %v5505_v54  ;;  %v5491_v32 = vmul.f32 %v8814_v38, %v11511_v2 }
 0x410   :  { %5538 = vst [vmem:[%s11105_s5 + $0x68] sm:$0xff] %v5522_v41  ;;  %v5508_v21 = vmul.f32 %v10901_v61, %v5492_v17 }
 0x411   :  { %5537 = vst [vmem:[%s11105_s5 + $0x60] sm:$0xff] %v5521_v20  ;;  %v5507_v52 = vmul.f32 %v10901_v61, %v5491_v32 }
 0x412   :  { %v5524_v37 = vadd.f32 %v10907_v23, %v5508_v21 }
 0x413   :  { %v5523_v27 = vadd.f32 %v10907_v23, %v5507_v52 }
 0x414   :  { %5540 = vst [vmem:[%s11105_s5 + $0x78] sm:$0xff] %v5524_v37 }
 0x415   :  { %5539 = vst [vmem:[%s11105_s5 + $0x70] sm:$0xff] %v5523_v27 }

</bundles_post_ra>
